<compile_context>
chip_gen: v6e
topology: v6e:2x2x1
jax: 0.10.0
libtpu: 0.0.40
codegen_flags: <defaults>
</compile_context>

<pallas_src>
import functools

import jax
import jax.numpy as jnp
import numpy as np
from jax.experimental import pallas as pl
from jax.experimental.pallas import tpu as pltpu


def _stn_kernel(img_ref, mesh_ref, out_ref, *, Hp, Wp):
    # img_ref : (Cp, Kblk)  K-block of the padded+regrouped image for this batch
    #                       (torch `img.view(-1, nch)` semantics), zero-padded
    # mesh_ref: (2, TP)     sample coordinates for this tile of output pixels
    #                       (meshgrid + displacement + 1 already applied):
    #                       row 0 = H_upmesh, row 1 = W_upmesh
    # out_ref : (C, TP)     resident across the K grid axis (f32 accumulator)
    Kblk = img_ref.shape[1]
    TP = mesh_ref.shape[1]
    C = out_ref.shape[0]
    kidx = pl.program_id(2)

    @pl.when(kidx == 0)
    def _():
        out_ref[...] = jnp.zeros_like(out_ref)

    Hup = mesh_ref[0:1, :]                      # (1, TP)
    Wup = mesh_ref[1:2, :]                      # (1, TP)

    hf0 = jnp.floor(Hup).astype(jnp.int32)
    wf0 = jnp.floor(Wup).astype(jnp.int32)
    hc = jnp.clip(hf0 + 1, 0, Hp - 1)
    wc = jnp.clip(wf0 + 1, 0, Wp - 1)
    hf = jnp.clip(hf0, 0, Hp - 1)
    wf = jnp.clip(wf0, 0, Wp - 1)

    # Bilinear weights; intentionally NOT clamped (matches the PyTorch reference,
    # which extrapolates when the sample point leaves the 1-pixel replicate pad).
    dH = hc.astype(jnp.float32) - Hup
    dW = wc.astype(jnp.float32) - Wup
    w00 = dH * dW
    w10 = dH * (1.0 - dW)
    w01 = (1.0 - dH) * dW
    w11 = (1.0 - dW) * (1.0 - dH)

    # Clip collisions make corner indices equal (hc==hf and/or wc==wf). Fold the
    # colliding weight onto the corner that wins the nested select below; this is
    # O(TP) work and lets the four one-hot terms be mutually exclusive, so the
    # gather matrix needs only compares + selects (no full-size adds).
    w_col = wc == wf
    h_col = hc == hf
    w00 = w00 + jnp.where(w_col, w10, 0.0)
    w01 = w01 + jnp.where(w_col, w11, 0.0)
    w00 = w00 + jnp.where(h_col, w01, 0.0)
    w10 = w10 + jnp.where(h_col, w11, 0.0)

    # Flat gather indices, rebased to this K block (offset applied on the (1,TP)
    # rows, not on the (Kblk,TP) iota).
    base = kidx * Kblk
    i00 = hf * Wp + wf - base
    i10 = hf * Wp + wc - base
    i01 = hc * Wp + wf - base
    i11 = hc * Wp + wc - base

    krow = jax.lax.broadcasted_iota(jnp.int32, (Kblk, TP), 0)
    wcomb = jnp.where(
        krow == i00, w00,
        jnp.where(krow == i10, w10,
                  jnp.where(krow == i01, w01,
                            jnp.where(krow == i11, w11, 0.0))))

    # One MXU contraction over this K block; accumulate into the resident output.
    # (Mosaic only lowers DEFAULT/HIGHEST dot precision; DEFAULT (bf16 operands)
    # would exceed the 1e-4 tolerance, so keep HIGHEST — MXU is not binding at
    # small C.)
    partial = jax.lax.dot_general(
        img_ref[...], wcomb,
        dimension_numbers=(((1,), (0,)), ((), ())),
        precision=jax.lax.Precision.HIGHEST,
        preferred_element_type=jnp.float32)          # (Cp, TP)
    out_ref[...] += partial[:C, :]


def _round_up(x, m):
    return (x + m - 1) // m * m


def _choose_tiles(K, HW):
    """Pick (Kblk, Kpad, tile_p, HWpad).

    Bounds the dominant per-step live intermediates (the (Kblk, tile_p) gather
    matrix, int32 iota and select temps, ~16 B/elem) to a few MiB so the kernel
    fits scoped VMEM on every generation (v7x: 64 MiB physical), while keeping
    every block dim a multiple of 128 on the lane axis.  Works for any H, W
    (HW not a multiple of 128 is padded, never single-tiled).
    """
    kblk = min(512, _round_up(K, 128))
    kpad = _round_up(K, kblk)
    hw128 = _round_up(HW, 128)
    budget = 6 * 1024 * 1024          # bytes of (Kblk, tile_p)-sized intermediates
    tile_p = 128
    while (tile_p < 1024
           and tile_p * 2 <= hw128
           and 16 * kblk * (tile_p * 2) <= budget):
        tile_p *= 2
    # Prefer a tile that divides the 128-aligned pixel count (no padded work).
    while tile_p > 128 and hw128 % tile_p != 0:
        tile_p //= 2
    hwpad = _round_up(HW, tile_p)
    return kblk, kpad, tile_p, hwpad


def dense2d_spatial_transformer(input1, input2):
    """input1: (N, C, H, W) image; input2: (N, 2, H, W) flow. Returns (N, C, H, W)."""
    N, C, H, W = input1.shape
    Hp, Wp = H + 2, W + 2
    K = Hp * Wp
    HW = H * W
    Cp = _round_up(C, 8)
    Kblk, Kpad, tile_p, HWpad = _choose_tiles(K, HW)
    n_tiles = HWpad // tile_p
    n_k = Kpad // Kblk

    x = input1.astype(jnp.float32)
    # 1-pixel edge-replicate pad (matches the reference's manual border copies),
    # then reproduce torch's `img.view(-1, nch)` flattening exactly: per batch the
    # raw NCHW memory regrouped into rows of length C, transposed so the gather
    # axis K is lane-dense.  Zero-pad C->Cp (MXU operand sublanes) and K->Kpad
    # (lane/MXU contraction align); padded rows/cols are never selected.
    # TODO(synk): fuse this pad + regroup into the producer (or a windowed in-kernel
    # gather) to save the extra image-sized HBM passes at production resolutions.
    img_pad = jnp.pad(x, ((0, 0), (0, 0), (1, 1), (1, 1)), mode="edge")
    img2 = img_pad.reshape(N, K, C).transpose(0, 2, 1)            # (N, C, K)
    img2 = jnp.pad(img2, ((0, 0), (0, Cp - C), (0, Kpad - K)))    # (N, Cp, Kpad)

    # Sample coordinates (meshgrid + displacement + 1 for the pad shift), flattened
    # to a lane-dense (2, HWpad) layout per batch.  Padded pixels get the valid
    # coordinate 1.0; their outputs are sliced off below.
    row = jax.lax.broadcasted_iota(jnp.float32, (H, W), 0)
    col = jax.lax.broadcasted_iota(jnp.float32, (H, W), 1)
    mesh = jnp.stack([row, col], axis=0)                          # (2, H, W)
    upmesh = (input2.astype(jnp.float32) + mesh[None] + 1.0).reshape(N, 2, HW)
    if HWpad != HW:
        upmesh = jnp.pad(upmesh, ((0, 0), (0, 0), (0, HWpad - HW)),
                         constant_values=1.0)

    # TODO(synk): for large images with bounded displacement, switch to scalar-
    # prefetched per-tile K windows (PrefetchScalarGridSpec) to make the gather
    # linear instead of O(K * HW) — the dense one-hot re-reads the image per tile.
    kernel = functools.partial(_stn_kernel, Hp=Hp, Wp=Wp)
    out = pl.pallas_call(
        kernel,
        out_shape=jax.ShapeDtypeStruct((N, C, HWpad), jnp.float32),
        grid_spec=pltpu.PrefetchScalarGridSpec(
            num_scalar_prefetch=0,
            grid=(N, n_tiles, n_k),                 # K (reduction) innermost
            in_specs=[
                pl.BlockSpec((None, Cp, Kblk), lambda n, t, k: (n, 0, k)),
                pl.BlockSpec((None, 2, tile_p), lambda n, t, k: (n, 0, t)),
            ],
            # Output block index constant across k -> resident accumulator.
            out_specs=pl.BlockSpec((None, C, tile_p), lambda n, t, k: (n, 0, t)),
        ),
        compiler_params=pltpu.CompilerParams(
            # Batch + pixel-tile axes are independent (megacore-splittable);
            # the K axis accumulates into the output block.
            dimension_semantics=("parallel", "parallel", "arbitrary"),
            # Headroom over v5e's 16 MiB default; intermediates are budgeted to
            # ~6 MiB by _choose_tiles so this also fits v7x's 64 MiB physical.
            vmem_limit_bytes=32 * 1024 * 1024,
        ),
    )(img2, upmesh)

    if HWpad != HW:
        out = out[:, :, :HW]
    return out.reshape(N, C, H, W)


dense2d_spatial_transformer = jax.jit(dense2d_spatial_transformer)


def reference_forward(input1, input2):
    """Pure-JAX transcription of the PyTorch module (for verification)."""
    dH = input2[:, 0].astype(jnp.float32)
    dW = input2[:, 1].astype(jnp.float32)
    N, C, H, W = input1.shape
    Hp, Wp = H + 2, W + 2
    img = jnp.pad(input1.astype(jnp.float32),
                  ((0, 0), (0, 0), (1, 1), (1, 1)), mode="edge")
    h_mesh = jnp.arange(H, dtype=jnp.float32)[:, None] * jnp.ones((1, W), jnp.float32)
    w_mesh = jnp.ones((H, 1), jnp.float32) * jnp.arange(W, dtype=jnp.float32)[None, :]
    Hup = (dH + h_mesh[None]).reshape(-1) + 1.0
    Wup = (dW + w_mesh[None]).reshape(-1) + 1.0
    hf = jnp.floor(Hup).astype(jnp.int32); hc = hf + 1
    wf = jnp.floor(Wup).astype(jnp.int32); wc = wf + 1
    hf = jnp.clip(hf, 0, Hp - 1); hc = jnp.clip(hc, 0, Hp - 1)
    wf = jnp.clip(wf, 0, Wp - 1); wc = jnp.clip(wc, 0, Wp - 1)
    bHW = jnp.repeat(jnp.arange(N, dtype=jnp.int32) * (Hp * Wp), H * W)
    idx00 = bHW + hf * Wp + wf
    idx10 = bHW + hf * Wp + wc
    idx01 = bHW + hc * Wp + wf
    idx11 = bHW + hc * Wp + wc
    img_flat = img.reshape(-1, C)
    v00 = img_flat[idx00]; v10 = img_flat[idx10]
    v01 = img_flat[idx01]; v11 = img_flat[idx11]
    dHgt = hc.astype(jnp.float32) - Hup
    dWdt = wc.astype(jnp.float32) - Wup
    out = (v00 * (dHgt * dWdt)[:, None]
           + v10 * (dHgt * (1 - dWdt))[:, None]
           + v01 * ((1 - dHgt) * dWdt)[:, None]
           + v11 * ((1 - dWdt) * (1 - dHgt))[:, None])
    return out.reshape(N, H, W, C).transpose(0, 3, 1, 2)


if __name__ == "__main__":
    key = jax.random.PRNGKey(0)
    k1, k2 = jax.random.split(key)
    N, C, H, W = 2, 4, 16, 16
    input1 = jax.random.normal(k1, (N, C, H, W), dtype=jnp.float32)
    input2 = jax.random.normal(k2, (N, 2, H, W), dtype=jnp.float32) * 3.0  # exercises clamping

    out = dense2d_spatial_transformer(input1, input2)
    out = jax.block_until_ready(out)

    ref = reference_forward(input1, input2)
    np.testing.assert_allclose(np.asarray(out), np.asarray(ref), rtol=1e-4, atol=1e-4)
    print("KERNEL_OK")
</pallas_src>

<mosaic_0001>
module attributes {stable_mosaic.version = 11 : i64} {
  func.func @_stn_kernel(%arg0: i32, %arg1: i32, %arg2: i32, %arg3: memref<1x8x384xf32, #tpu.memory_space<vmem>>, %arg4: memref<1x2x256xf32, #tpu.memory_space<vmem>>, %arg5: memref<1x4x256xf32, #tpu.memory_space<vmem>>) attributes {dimension_semantics = [#tpu.dimension_semantics<parallel>, #tpu.dimension_semantics<parallel>, #tpu.dimension_semantics<arbitrary>], iteration_bounds = array<i64: 2, 1, 1>, scalar_prefetch = 0 : i64, scratch_operands = 0 : i64, tpu.core_type = #tpu.core_type<tc>, window_params = [{transform_indices = @transform_0, window_bounds = array<i64: 1, 8, 384>}, {transform_indices = @transform_1, window_bounds = array<i64: 1, 2, 256>}, {transform_indices = @transform_2, window_bounds = array<i64: 1, 4, 256>}]} {
    %c0_i32 = arith.constant 0 : i32
    %0 = arith.cmpi eq, %arg2, %c0_i32 : i32
    %1 = arith.extui %0 : i1 to i32
    %c0_i32_0 = arith.constant 0 : i32
    %2 = arith.cmpi ne, %1, %c0_i32_0 : i32
    scf.if %2 {
      %cst_34 = arith.constant 0.000000e+00 : f32
      %114 = vector.broadcast %cst_34 : f32 to vector<4x256xf32>
      %c0_35 = arith.constant 0 : index
      %c0_36 = arith.constant 0 : index
      %c0_37 = arith.constant 0 : index
      %115 = vector.load %arg5[%c0_35, %c0_36, %c0_37] : memref<1x4x256xf32, #tpu.memory_space<vmem>>, vector<1x4x256xf32>
      %116 = vector.shape_cast %115 : vector<1x4x256xf32> to vector<4x256xf32>
      %117 = vector.shape_cast %114 : vector<4x256xf32> to vector<1x4x256xf32>
      tpu.vector_store %arg5[%c0_35, %c0_36, %c0_37], %117 {strides = array<i32>} : memref<1x4x256xf32, #tpu.memory_space<vmem>>, vector<1x4x256xf32>,
    } else {
    }
    %c0 = arith.constant 0 : index
    %c0_1 = arith.constant 0 : index
    %c0_2 = arith.constant 0 : index
    %3 = vector.load %arg4[%c0, %c0_1, %c0_2] : memref<1x2x256xf32, #tpu.memory_space<vmem>>, vector<1x1x256xf32>
    %4 = vector.shape_cast %3 : vector<1x1x256xf32> to vector<1x256xf32>
    %c0_3 = arith.constant 0 : index
    %c1 = arith.constant 1 : index
    %c0_4 = arith.constant 0 : index
    %5 = vector.load %arg4[%c0_3, %c1, %c0_4] : memref<1x2x256xf32, #tpu.memory_space<vmem>>, vector<1x1x256xf32>
    %6 = vector.shape_cast %5 : vector<1x1x256xf32> to vector<1x256xf32>
    %7 = math.floor %4 : vector<1x256xf32>
    %8 = arith.fptosi %7 : vector<1x256xf32> to vector<1x256xi32>
    %9 = math.floor %6 : vector<1x256xf32>
    %10 = arith.fptosi %9 : vector<1x256xf32> to vector<1x256xi32>
    %c1_i32 = arith.constant 1 : i32
    %11 = vector.broadcast %c1_i32 : i32 to vector<1x256xi32>
    %12 = arith.addi %8, %11 : vector<1x256xi32>
    %c0_i32_5 = arith.constant 0 : i32
    %c17_i32 = arith.constant 17 : i32
    %13 = vector.broadcast %c0_i32_5 : i32 to vector<1x256xi32>
    %14 = arith.maxsi %13, %12 : vector<1x256xi32>
    %15 = vector.broadcast %c17_i32 : i32 to vector<1x256xi32>
    %16 = arith.minsi %15, %14 : vector<1x256xi32>
    %c1_i32_6 = arith.constant 1 : i32
    %17 = vector.broadcast %c1_i32_6 : i32 to vector<1x256xi32>
    %18 = arith.addi %10, %17 : vector<1x256xi32>
    %c0_i32_7 = arith.constant 0 : i32
    %c17_i32_8 = arith.constant 17 : i32
    %19 = vector.broadcast %c0_i32_7 : i32 to vector<1x256xi32>
    %20 = arith.maxsi %19, %18 : vector<1x256xi32>
    %21 = vector.broadcast %c17_i32_8 : i32 to vector<1x256xi32>
    %22 = arith.minsi %21, %20 : vector<1x256xi32>
    %c0_i32_9 = arith.constant 0 : i32
    %c17_i32_10 = arith.constant 17 : i32
    %23 = vector.broadcast %c0_i32_9 : i32 to vector<1x256xi32>
    %24 = arith.maxsi %23, %8 : vector<1x256xi32>
    %25 = vector.broadcast %c17_i32_10 : i32 to vector<1x256xi32>
    %26 = arith.minsi %25, %24 : vector<1x256xi32>
    %c0_i32_11 = arith.constant 0 : i32
    %c17_i32_12 = arith.constant 17 : i32
    %27 = vector.broadcast %c0_i32_11 : i32 to vector<1x256xi32>
    %28 = arith.maxsi %27, %10 : vector<1x256xi32>
    %29 = vector.broadcast %c17_i32_12 : i32 to vector<1x256xi32>
    %30 = arith.minsi %29, %28 : vector<1x256xi32>
    %31 = arith.sitofp %16 : vector<1x256xi32> to vector<1x256xf32>
    %32 = arith.subf %31, %4 : vector<1x256xf32>
    %33 = arith.sitofp %22 : vector<1x256xi32> to vector<1x256xf32>
    %34 = arith.subf %33, %6 : vector<1x256xf32>
    %35 = arith.mulf %32, %34 : vector<1x256xf32>
    %cst = arith.constant 1.000000e+00 : f32
    %36 = vector.broadcast %cst : f32 to vector<1x256xf32>
    %37 = arith.subf %36, %34 : vector<1x256xf32>
    %38 = arith.mulf %32, %37 : vector<1x256xf32>
    %cst_13 = arith.constant 1.000000e+00 : f32
    %39 = vector.broadcast %cst_13 : f32 to vector<1x256xf32>
    %40 = arith.subf %39, %32 : vector<1x256xf32>
    %41 = arith.mulf %40, %34 : vector<1x256xf32>
    %cst_14 = arith.constant 1.000000e+00 : f32
    %42 = vector.broadcast %cst_14 : f32 to vector<1x256xf32>
    %43 = arith.subf %42, %34 : vector<1x256xf32>
    %cst_15 = arith.constant 1.000000e+00 : f32
    %44 = vector.broadcast %cst_15 : f32 to vector<1x256xf32>
    %45 = arith.subf %44, %32 : vector<1x256xf32>
    %46 = arith.mulf %43, %45 : vector<1x256xf32>
    %47 = arith.cmpi eq, %22, %30 : vector<1x256xi32>
    %48 = arith.cmpi eq, %16, %26 : vector<1x256xi32>
    %cst_16 = arith.constant 0.000000e+00 : f32
    %49 = vector.broadcast %cst_16 : f32 to vector<1x256xf32>
    %50 = arith.select %47, %38, %49 : vector<1x256xi1>, vector<1x256xf32>
    %51 = arith.addf %35, %50 : vector<1x256xf32>
    %cst_17 = arith.constant 0.000000e+00 : f32
    %52 = vector.broadcast %cst_17 : f32 to vector<1x256xf32>
    %53 = arith.select %47, %46, %52 : vector<1x256xi1>, vector<1x256xf32>
    %54 = arith.addf %41, %53 : vector<1x256xf32>
    %cst_18 = arith.constant 0.000000e+00 : f32
    %55 = vector.broadcast %cst_18 : f32 to vector<1x256xf32>
    %56 = arith.select %48, %54, %55 : vector<1x256xi1>, vector<1x256xf32>
    %57 = arith.addf %51, %56 : vector<1x256xf32>
    %cst_19 = arith.constant 0.000000e+00 : f32
    %58 = vector.broadcast %cst_19 : f32 to vector<1x256xf32>
    %59 = arith.select %48, %46, %58 : vector<1x256xi1>, vector<1x256xf32>
    %60 = arith.addf %38, %59 : vector<1x256xf32>
    %c384_i32 = arith.constant 384 : i32
    %61 = arith.muli %arg2, %c384_i32 : i32
    %c18_i32 = arith.constant 18 : i32
    %62 = vector.broadcast %c18_i32 : i32 to vector<1x256xi32>
    %63 = arith.muli %26, %62 : vector<1x256xi32>
    %64 = arith.addi %63, %30 : vector<1x256xi32>
    %65 = vector.broadcast %61 : i32 to vector<1x256xi32>
    %66 = arith.subi %64, %65 : vector<1x256xi32>
    %c18_i32_20 = arith.constant 18 : i32
    %67 = vector.broadcast %c18_i32_20 : i32 to vector<1x256xi32>
    %68 = arith.muli %26, %67 : vector<1x256xi32>
    %69 = arith.addi %68, %22 : vector<1x256xi32>
    %70 = vector.broadcast %61 : i32 to vector<1x256xi32>
    %71 = arith.subi %69, %70 : vector<1x256xi32>
    %c18_i32_21 = arith.constant 18 : i32
    %72 = vector.broadcast %c18_i32_21 : i32 to vector<1x256xi32>
    %73 = arith.muli %16, %72 : vector<1x256xi32>
    %74 = arith.addi %73, %30 : vector<1x256xi32>
    %75 = vector.broadcast %61 : i32 to vector<1x256xi32>
    %76 = arith.subi %74, %75 : vector<1x256xi32>
    %c18_i32_22 = arith.constant 18 : i32
    %77 = vector.broadcast %c18_i32_22 : i32 to vector<1x256xi32>
    %78 = arith.muli %16, %77 : vector<1x256xi32>
    %79 = arith.addi %78, %22 : vector<1x256xi32>
    %80 = vector.broadcast %61 : i32 to vector<1x256xi32>
    %81 = arith.subi %79, %80 : vector<1x256xi32>
    %82 = tpu.iota {dimensions = array<i32: 0>} : vector<384x256xi32>
    %83 = vector.broadcast %66 : vector<1x256xi32> to vector<384x256xi32>
    %84 = arith.cmpi eq, %82, %83 : vector<384x256xi32>
    %85 = vector.broadcast %71 : vector<1x256xi32> to vector<384x256xi32>
    %86 = arith.cmpi eq, %82, %85 : vector<384x256xi32>
    %87 = vector.broadcast %76 : vector<1x256xi32> to vector<384x256xi32>
    %88 = arith.cmpi eq, %82, %87 : vector<384x256xi32>
    %89 = vector.broadcast %81 : vector<1x256xi32> to vector<384x256xi32>
    %90 = arith.cmpi eq, %82, %89 : vector<384x256xi32>
    %cst_23 = arith.constant 0.000000e+00 : f32
    %91 = vector.shape_cast %46 : vector<1x256xf32> to vector<1x256xf32>
    %92 = vector.broadcast %91 : vector<1x256xf32> to vector<384x256xf32>
    %93 = vector.broadcast %cst_23 : f32 to vector<384x256xf32>
    %94 = arith.select %90, %92, %93 : vector<384x256xi1>, vector<384x256xf32>
    %95 = vector.shape_cast %54 : vector<1x256xf32> to vector<1x256xf32>
    %96 = vector.broadcast %95 : vector<1x256xf32> to vector<384x256xf32>
    %97 = arith.select %88, %96, %94 : vector<384x256xi1>, vector<384x256xf32>
    %98 = vector.shape_cast %60 : vector<1x256xf32> to vector<1x256xf32>
    %99 = vector.broadcast %98 : vector<1x256xf32> to vector<384x256xf32>
    %100 = arith.select %86, %99, %97 : vector<384x256xi1>, vector<384x256xf32>
    %101 = vector.shape_cast %57 : vector<1x256xf32> to vector<1x256xf32>
    %102 = vector.broadcast %101 : vector<1x256xf32> to vector<384x256xf32>
    %103 = arith.select %84, %102, %100 : vector<384x256xi1>, vector<384x256xf32>
    %c0_24 = arith.constant 0 : index
    %c0_25 = arith.constant 0 : index
    %c0_26 = arith.constant 0 : index
    %104 = vector.load %arg3[%c0_24, %c0_25, %c0_26] : memref<1x8x384xf32, #tpu.memory_space<vmem>>, vector<1x8x384xf32>
    %105 = vector.shape_cast %104 : vector<1x8x384xf32> to vector<8x384xf32>
    %cst_27 = arith.constant dense<0.000000e+00> : vector<8x256xf32>
    %106 = tpu.matmul %105, %103, %cst_27 {dimension_numbers = #tpu.dot_dimension_numbers<[1], [0], [0], [1], [0, 0, 1, 1], [], []>, precision = #tpu.contract_precision<fp32>} : vector<8x384xf32>, vector<384x256xf32>, vector<8x256xf32> -> vector<8x256xf32>
    %c0_28 = arith.constant 0 : index
    %c0_29 = arith.constant 0 : index
    %c0_30 = arith.constant 0 : index
    %107 = vector.load %arg5[%c0_28, %c0_29, %c0_30] : memref<1x4x256xf32, #tpu.memory_space<vmem>>, vector<1x4x256xf32>
    %108 = vector.shape_cast %107 : vector<1x4x256xf32> to vector<4x256xf32>
    %109 = vector.extract_strided_slice %106 {offsets = [0, 0], sizes = [4, 256], strides = [1, 1]} : vector<8x256xf32> to vector<4x256xf32>
    %110 = arith.addf %108, %109 : vector<4x256xf32>
    %c0_31 = arith.constant 0 : index
    %c0_32 = arith.constant 0 : index
    %c0_33 = arith.constant 0 : index
    %111 = vector.load %arg5[%c0_31, %c0_32, %c0_33] : memref<1x4x256xf32, #tpu.memory_space<vmem>>, vector<1x4x256xf32>
    %112 = vector.shape_cast %111 : vector<1x4x256xf32> to vector<4x256xf32>
    %113 = vector.shape_cast %110 : vector<4x256xf32> to vector<1x4x256xf32>
    tpu.vector_store %arg5[%c0_31, %c0_32, %c0_33], %113 {strides = array<i32>} : memref<1x4x256xf32, #tpu.memory_space<vmem>>, vector<1x4x256xf32>,
    return
  }
  func.func @transform_0(%arg0: i32, %arg1: i32, %arg2: i32) -> (i32, i32, i32) {
    %c0_i32 = arith.constant 0 : i32
    %c0_i32_0 = arith.constant 0 : i32
    return %arg0, %c0_i32, %arg2 : i32, i32, i32
  }
  func.func @transform_1(%arg0: i32, %arg1: i32, %arg2: i32) -> (i32, i32, i32) {
    %c0_i32 = arith.constant 0 : i32
    %c0_i32_0 = arith.constant 0 : i32
    return %arg0, %c0_i32, %arg1 : i32, i32, i32
  }
  func.func @transform_2(%arg0: i32, %arg1: i32, %arg2: i32) -> (i32, i32, i32) {
    %c0_i32 = arith.constant 0 : i32
    %c0_i32_0 = arith.constant 0 : i32
    return %arg0, %c0_i32, %arg1 : i32, i32, i32
  }
}

</mosaic_0001>

<bundles_post_ra>
// kernel: dense2d_spatial_transformer.1
= control target key start
LH: loop header
LB: loop body
LE: loop exit
PB: predicated region body
PF: predicated region fallthrough
CT: control target
= control target key end

     0   :  { %s3523_s9 = smov 0   ;;  %s3525_s10 = smov 0   ;;  %s7390_s0 = inlined_call_operand.vmem [shape: f32[2,8,384], index: 0, kind: input, shape index: {}]   ;;  %s7391_s1 = inlined_call_operand.vmem [shape: f32[2,2,256], index: 1, kind: input, shape index: {}]   ;;  %s7392_s2 = inlined_call_operand.vmem [shape: f32[2,4,256], index: 2, kind: output, shape index: {}]  }
   0x1   :  { %s3527_s11 = smov 0  }
   0x2 LB: > { %s31_s12 = sadd.s32 1, %s3501_s10  ;;  %p3442_p0 = scmp.ge.s32.totalorder %s3505_s11, 1  ;;  %s3505_s11 = sphi %s3527_s11, %s12_s11   ;;  %s3501_s10 = sphi %s3525_s10, %s8292_s10   ;;  %s3497_s9 = sphi %s3523_s9, %s8291_s9  }
   0x3   : > { %p33_p1 = scmp.ge.s32.totalorder %s31_s12, 2  ;;  %p157_p2 = scmp.lt.s32.totalorder %s3505_s11, 3 }
   0x5   : > { %s8294_s12 = smov (%p33_p1, %s31_s12), 0  ;;  %p158_p3 = pnand %p3442_p0, %p157_p2 }
   0x7   : > { %161 = sbr.rel (%p158_p3) target bundleno = 720 (0x2d0), region = 28 }
   0xc   : > { %p197_p4 = scmp.lt.s32.totalorder %s3497_s9, 1  ;;  %v288_v0 = vlaneseq }
   0xe   : > { %s8296_s9 = smov (!%p197_p4, %s3497_s9), 1  ;;  %v3544_v1 = vshrl.u32 %v288_v0, 7 }
   0xf   : > { %s3451_s13 = sshll.u32 %s8296_s9, 2  ;;  %s3453_s17 = smul.u32 24, %s8296_s9 }
  0x10   : > { %s214_s16 = scalar_lea.vmem %s7391_s1, %s3451_s13  ;;  %v3550_v6 = vadd.s32 120, %v3544_v1  ;;  %v3553_v7 = vsub.s32 1, %v3544_v1  ;;  %v3556_v10 = vsub.s32 0, %v3544_v1  ;;  %v3559_v11 = vadd.s32 112, %v3544_v1  ;;  %s3452_s21 = sshll.u32 %s8296_s9, 3 }
  0x11   : > { %v231_v2 = vld [vmem:[%s214_s16] ss:$2 sm:$0x3]  ;;  %v3448_v3 = vld [vmem:[%s214_s16 + $0x1] ss:$2 sm:$0x3]  ;;  %s5424_s20 = scalar_lea.vmem %s7390_s0, %s3453_s17  ;;  %s224_s24 = scalar_lea.vmem %s7392_s2, %s3452_s21 }
  0x12   : > { %v234_v4 = vfloor.f32 %v231_v2  ;;  %v236_v5 = vfloor.f32 %v3448_v3  ;;  %v3562_v12 = vadd.s32 104, %v3544_v1  ;;  %v3565_v13 = vadd.s32 96, %v3544_v1 }
  0x13   : > { %v3568_v14 = vadd.s32 88, %v3544_v1  ;;  %v3571_v15 = vadd.s32 80, %v3544_v1  ;;  %v3574_v18 = vadd.s32 72, %v3544_v1  ;;  %v3577_v19 = vadd.s32 64, %v3544_v1 }
  0x14   : > { %v3454_v8 = vtrunc.f32 %v234_v4  ;;  %v3456_v9 = vtrunc.f32 %v236_v5  ;;  %v3580_v20 = vadd.s32 56, %v3544_v1  ;;  %v3583_v21 = vadd.s32 48, %v3544_v1 }
  0x15   : > { %v3586_v22 = vadd.s32 40, %v3544_v1  ;;  %v3589_v23 = vadd.s32 32, %v3544_v1  ;;  %v3592_v28 = vadd.s32 24, %v3544_v1  ;;  %v3595_v29 = vadd.s32 16, %v3544_v1 }
  0x16   : > { %v3455_v16 = vcvt.f32.s32 %v3454_v8  ;;  %v3457_v17 = vcvt.f32.s32 %v3456_v9  ;;  %v3598_v33 = vadd.s32 8, %v3544_v1  ;;  %v3601_v38 = vadd.s32 248, %v3544_v1 }
  0x17   : > { %v3604_v39 = vadd.s32 240, %v3544_v1  ;;  %v3607_v42 = vadd.s32 232, %v3544_v1  ;;  %v3610_v43 = vadd.s32 224, %v3544_v1  ;;  %v3613_v49 = vadd.s32 216, %v3544_v1 }
  0x18   : > { %v238_v24 = vadd.s32 1, %v3455_v16  ;;  %v243_v25 = vadd.s32 1, %v3457_v17  ;;  %vm248_vm0 = vcmp.gt.s32.totalorder %v3455_v16, 0  ;;  %vm252_vm1 = vcmp.gt.s32.totalorder %v3457_v17, 0 }
  0x19   : > { %v249_v26 = vsel %vm248_vm0, %v3455_v16, 0  ;;  %v253_v27 = vsel %vm252_vm1, %v3457_v17, 0 }
  0x1a   : > { %vm239_vm2 = vcmp.gt.s32.totalorder %v238_v24, 0  ;;  %vm244_vm3 = vcmp.gt.s32.totalorder %v243_v25, 0  ;;  %vm250_vm4 = vcmp.lt.s32.totalorder %v249_v26, 17  ;;  %vm254_vm5 = vcmp.lt.s32.totalorder %v253_v27, 17 }
  0x1b   : > { %v240_v30 = vsel %vm239_vm2, %v238_v24, 0  ;;  %v245_v31 = vsel %vm244_vm3, %v243_v25, 0  ;;  %v251_v32 = vsel %vm250_vm4, %v249_v26, 17  ;;  %v255_v34 = vsel %vm254_vm5, %v253_v27, 17 }
  0x1c   : > { %vm241_vm6 = vcmp.lt.s32.totalorder %v240_v30, 17  ;;  %vm246_vm7 = vcmp.lt.s32.totalorder %v245_v31, 17  ;;  %v277_v35 = vmul.u32 18, %v251_v32 }
  0x1d   : > { %v242_v36 = vsel %vm241_vm6, %v240_v30, 17  ;;  %v247_v37 = vsel %vm246_vm7, %v245_v31, 17 }
  0x1e   : > { %v256_v40 = vcvt.s32.f32 %v242_v36  ;;  %v258_v41 = vcvt.s32.f32 %v247_v37  ;;  %vm266_vm8 = vcmp.eq.s32.totalorder %v247_v37, %v255_v34  ;;  %v278_v44 = vadd.s32 %v277_v35, %v255_v34 }
  0x1f   : > { %v281_v45 = vadd.s32 %v277_v35, %v247_v37  ;;  %v283_v46 = vmul.u32 18, %v242_v36  ;;  %vm267_vm9 = vcmp.eq.s32.totalorder %v242_v36, %v251_v32 }
  0x20   : > { %v257_v47 = vsub.f32 %v256_v40, %v231_v2  ;;  %v259_v48 = vsub.f32 %v258_v41, %v3448_v3  ;;  %v3616_v52 = vrot.slane %v278_v44, %v3553_v7  ;;  %v3622_v57 = vrot.slane %v278_v44, %v3556_v10 }
  0x21   : > { %v284_v50 = vadd.s32 %v283_v46, %v255_v34  ;;  %v286_v51 = vadd.s32 %v283_v46, %v247_v37  ;;  %v3619_v53 = vrot.slane %v281_v45, %v3553_v7  ;;  %v3641_v63 = vrot.slane %v281_v45, %v3556_v10 }
  0x22   : > { %v260_v54 = vmul.f32 %v259_v48, %v257_v47  ;;  %v261_v55 = vsub.f32 1.0, %v259_v48  ;;  %v263_v56 = vsub.f32 1.0, %v257_v47  ;;  %vm376_vm10 = vcmp.eq.s32.totalorder %v3550_v6, %v3616_v52 }
  0x23   : > { %vm480_vm11 = vcmp.eq.s32.totalorder %v3550_v6, %v3619_v53  ;;  %v3629_v58 = vrot.slane %v284_v50, %v3553_v7  ;;  %v3632_v59 = vrot.slane %v286_v51, %v3553_v7  ;;  %vm375_vm12 = vcmp.eq.s32.totalorder %v3550_v6, %v3622_v57 }
  0x24   : > { %v262_v60 = vmul.f32 %v261_v55, %v257_v47  ;;  %v264_v61 = vmul.f32 %v263_v56, %v259_v48  ;;  %v265_v62 = vmul.f32 %v263_v56, %v261_v55  ;;  %v3644_v0 = vrot.slane %v284_v50, %v3556_v10 }
  0x25   : > { %vm584_vm13 = vcmp.eq.s32.totalorder %v3550_v6, %v3629_v58  ;;  %vm688_vm14 = vcmp.eq.s32.totalorder %v3550_v6, %v3632_v59  ;;  %vm479_vm15 = vcmp.eq.s32.totalorder %v3550_v6, %v3641_v63  ;;  %v3658_v24 = vrot.slane %v286_v51, %v3556_v10 }
  0x26   : > { %v268_v2 = vsel %vm266_vm8, %v262_v60, 0.0  ;;  %v270_v3 = vsel %vm266_vm8, %v265_v62, 0.0  ;;  %v274_v4 = vsel %vm267_vm9, %v265_v62, 0.0  ;;  %v3650_v5 = vrot.slane %v265_v62, %v3553_v7 }
  0x27   : > { %v269_v8 = vadd.f32 %v268_v2, %v260_v54  ;;  %v271_v9 = vadd.f32 %v270_v3, %v264_v61  ;;  %v275_v16 = vadd.f32 %v274_v4, %v262_v60  ;;  %vm583_vm0 = vcmp.eq.s32.totalorder %v3550_v6, %v3644_v0 }
  0x28   : > { %7748 = vst [vmem:[#allocation2_spill] sm:$0xff] %v3650_v5  ;;  %v795_v17 = vsel %vm688_vm14, %v3650_v5, 0.0  ;;  %v3661_v25 = vrot.slane %v265_v62, %v3556_v10  ;;  %vm687_vm1 = vcmp.eq.s32.totalorder %v3550_v6, %v3658_v24  ;;  %vm374_vm2 = vcmp.eq.s32.totalorder %v3559_v11, %v3616_v52 }
  0x29   : > { %v272_v26 = vsel %vm267_vm9, %v271_v9, 0.0  ;;  %v3665_v27 = vrot.slane %v271_v9, %v3553_v7  ;;  %v3668_v30 = vrot.slane %v275_v16, %v3553_v7  ;;  %v3671_v31 = vrot.slane %v271_v9, %v3556_v10 }
  0x2a   : > { %v273_v34 = vadd.f32 %v272_v26, %v269_v8  ;;  %v3676_v35 = vrot.slane %v275_v16, %v3556_v10  ;;  %v794_v36 = vsel %vm687_vm1, %v3661_v25, 0.0  ;;  %vm478_vm3 = vcmp.eq.s32.totalorder %v3559_v11, %v3619_v53 }
  0x2b   : > { %7749 = vst [vmem:[#allocation3_spill] sm:$0xff] %v3665_v27  ;;  %v902_v32 = vsel %vm584_vm13, %v3665_v27, %v795_v17  ;;  %vm582_vm4 = vcmp.eq.s32.totalorder %v3559_v11, %v3629_v58  ;;  %v901_v41 = vsel %vm583_vm0, %v3671_v31, %v794_v36  ;;  %vm686_vm5 = vcmp.eq.s32.totalorder %v3559_v11, %v3632_v59 }
  0x2c   : > { %v1009_v37 = vsel %vm480_vm11, %v3668_v30, %v902_v32  ;;  %v3694_v40 = vrot.slane %v273_v34, %v3553_v7  ;;  %v3701_v44 = vrot.slane %v273_v34, %v3556_v10  ;;  %v1008_v45 = vsel %vm479_vm15, %v3676_v35, %v901_v41 }
  0x2d   : > { %vm373_vm6 = vcmp.eq.s32.totalorder %v3559_v11, %v3622_v57  ;;  %vm477_vm7 = vcmp.eq.s32.totalorder %v3559_v11, %v3641_v63  ;;  %v793_v46 = vsel %vm686_vm5, %v3650_v5, 0.0  ;;  %vm581_vm8 = vcmp.eq.s32.totalorder %v3559_v11, %v3644_v0 }
  0x2e   : > { %v1116_v7 = vsel %vm376_vm10, %v3694_v40, %v1009_v37  ;;  %v3721_v10 = vsel %vm375_vm12, %v3701_v44, %v1008_v45  ;;  %v900_v50 = vsel %vm582_vm4, %v3665_v27, %v793_v46  ;;  %vm685_vm9 = vcmp.eq.s32.totalorder %v3559_v11, %v3658_v24 }
  0x2f   : > { %v3726_v47 = vand.u32 4294901760, %v1116_v7  ;;  %v3729_v48 = vand.u32 4294901760, %v3721_v10  ;;  %v1007_v6 = vsel %vm478_vm3, %v3668_v30, %v900_v50  ;;  %v792_v51 = vsel %vm685_vm9, %v3661_v25, 0.0 }
  0x30   : > { %vm372_vm10 = vcmp.eq.s32.totalorder %v3562_v12, %v3616_v52  ;;  %vm476_vm11 = vcmp.eq.s32.totalorder %v3562_v12, %v3619_v53  ;;  %v3748_v54 = vsel %vm374_vm2, %v3694_v40, %v1007_v6  ;;  %v899_v55 = vsel %vm581_vm8, %v3671_v31, %v792_v51 }
  0x31   : > { %1185 = vmatprep.subr.mxu0 %v3726_v47  ;;  %vm580_vm12 = vcmp.eq.s32.totalorder %v3562_v12, %v3629_v58  ;;  %vm684_vm13 = vcmp.eq.s32.totalorder %v3562_v12, %v3632_v59  ;;  %v3757_v56 = vand.u32 4294901760, %v3748_v54  ;;  %v1006_v60 = vsel %vm477_vm7, %v3676_v35, %v899_v55 }
  0x32   : > { %1187 = vmatpush1.msra.mxu0 %v3729_v48  ;;  %v791_v61 = vsel %vm684_vm13, %v3650_v5, 0.0  ;;  %vm371_vm14 = vcmp.eq.s32.totalorder %v3562_v12, %v3622_v57  ;;  %v3770_v62 = vsel %vm373_vm6, %v3701_v44, %v1006_v60  ;;  %vm475_vm15 = vcmp.eq.s32.totalorder %v3562_v12, %v3641_v63 }
  0x33   : > { %7750 = vst [vmem:[#allocation4_spill] sm:$0xff] %v3757_v56  ;;  %v898_v2 = vsel %vm580_vm12, %v3665_v27, %v791_v61  ;;  %vm579_vm0 = vcmp.eq.s32.totalorder %v3562_v12, %v3644_v0  ;;  %1189 = vmatprep.subr.mxu0 %v3757_v56  ;;  %v3779_v3 = vand.u32 4294901760, %v3770_v62  ;;  %vm683_vm1 = vcmp.eq.s32.totalorder %v3562_v12, %v3658_v24 }
  0x34   : > { %v1005_v11 = vsel %vm476_vm11, %v3668_v30, %v898_v2  ;;  %vm370_vm2 = vcmp.eq.s32.totalorder %v3565_v13, %v3616_v52  ;;  %v790_v8 = vsel %vm683_vm1, %v3661_v25, 0.0  ;;  %vm474_vm3 = vcmp.eq.s32.totalorder %v3565_v13, %v3619_v53 }
  0x35   : > { %7751 = vst [vmem:[#allocation5_spill] sm:$0xff] %v3779_v3  ;;  %v3793_v4 = vsel %vm372_vm10, %v3694_v40, %v1005_v11  ;;  %vm578_vm4 = vcmp.eq.s32.totalorder %v3565_v13, %v3629_v58  ;;  %1191 = vmatpush1.msra.mxu0 %v3779_v3  ;;  %v897_v16 = vsel %vm579_vm0, %v3671_v31, %v790_v8 }
  0x36   : > { %v3802_v9 = vand.u32 4294901760, %v3793_v4  ;;  %vm682_vm5 = vcmp.eq.s32.totalorder %v3565_v13, %v3632_v59  ;;  %vm369_vm6 = vcmp.eq.s32.totalorder %v3565_v13, %v3622_v57  ;;  %v1004_v17 = vsel %vm475_vm15, %v3676_v35, %v897_v16 }
  0x37   : > { %v789_v26 = vsel %vm682_vm5, %v3650_v5, 0.0  ;;  %vm473_vm7 = vcmp.eq.s32.totalorder %v3565_v13, %v3641_v63  ;;  %vm577_vm8 = vcmp.eq.s32.totalorder %v3565_v13, %v3644_v0  ;;  %v3823_v34 = vsel %vm371_vm14, %v3701_v44, %v1004_v17 }
  0x38   : > { %7752 = vst [vmem:[#allocation6_spill] sm:$0xff] %v3802_v9  ;;  %1193 = vmatprep.subr.mxu0 %v3802_v9  ;;  %v896_v32 = vsel %vm578_vm4, %v3665_v27, %v789_v26  ;;  %vm681_vm9 = vcmp.eq.s32.totalorder %v3565_v13, %v3658_v24  ;;  %vm368_vm10 = vcmp.eq.s32.totalorder %v3568_v14, %v3616_v52  ;;  %v3831_v36 = vand.u32 4294901760, %v3823_v34 }
  0x39   : > { %v1003_v37 = vsel %vm474_vm3, %v3668_v30, %v896_v32  ;;  %v788_v12 = vsel %vm681_vm9, %v3661_v25, 0.0  ;;  %vm472_vm11 = vcmp.eq.s32.totalorder %v3568_v14, %v3619_v53  ;;  %vm576_vm12 = vcmp.eq.s32.totalorder %v3568_v14, %v3629_v58 }
  0x3a   : > { %7753 = vst [vmem:[#allocation7_spill] sm:$0xff] %v3831_v36  ;;  %v3844_v41 = vsel %vm370_vm2, %v3694_v40, %v1003_v37  ;;  %v895_v45 = vsel %vm577_vm8, %v3671_v31, %v788_v12  ;;  %vm680_vm13 = vcmp.eq.s32.totalorder %v3568_v14, %v3632_v59  ;;  %1195 = vmatpush1.msra.mxu0 %v3831_v36 }
  0x3b   : > { %v3853_v46 = vand.u32 4294901760, %v3844_v41  ;;  %v1002_v50 = vsel %vm473_vm7, %v3676_v35, %v895_v45  ;;  %v787_v6 = vsel %vm680_vm13, %v3650_v5, 0.0  ;;  %v3861_v51 = vsub.f32 %v1116_v7, %v3726_v47 }
  0x3c   : > { %v3867_v55 = vsel %vm369_vm6, %v3701_v44, %v1002_v50  ;;  %v894_v60 = vsel %vm576_vm12, %v3665_v27, %v787_v6  ;;  %vm367_vm14 = vcmp.eq.s32.totalorder %v3568_v14, %v3622_v57  ;;  %vm471_vm15 = vcmp.eq.s32.totalorder %v3568_v14, %v3641_v63 }
  0x3d   : > { %7754 = vst [vmem:[#allocation8_spill] sm:$0xff] %v3853_v46  ;;  %7755 = vst [vmem:[#allocation9_spill] sm:$0xff] %v3861_v51  ;;  %1197 = vmatprep.subr.mxu0 %v3853_v46  ;;  %v3876_v61 = vand.u32 4294901760, %v3867_v55  ;;  %v1001_v13 = vsel %vm472_vm11, %v3668_v30, %v894_v60  ;;  %v7396_v7 = vand.u32 4294901760, %v3861_v51  ;;  %vm575_vm0 = vcmp.eq.s32.totalorder %v3568_v14, %v3644_v0 }
  0x3e   : > { %v3889_v2 = vsel %vm368_vm10, %v3694_v40, %v1001_v13  ;;  %vm679_vm1 = vcmp.eq.s32.totalorder %v3568_v14, %v3658_v24  ;;  %v3895_v11 = vsub.f32 %v3721_v10, %v3729_v48  ;;  %vm366_vm2 = vcmp.eq.s32.totalorder %v3571_v15, %v3616_v52 }
  0x3f   : > { %7756 = vst [vmem:[#allocation10_spill] sm:$0xff] %v3876_v61  ;;  %1199 = vmatpush1.msra.mxu0 %v3876_v61  ;;  %v3901_v8 = vand.u32 4294901760, %v3889_v2  ;;  %v1332_v16 = vsub.f32 %v3861_v51, %v7396_v7  ;;  %v786_v17 = vsel %vm679_vm1, %v3661_v25, 0.0  ;;  %vm470_vm3 = vcmp.eq.s32.totalorder %v3571_v15, %v3619_v53 }
  0x40   : > { %v893_v10 = vsel %vm575_vm0, %v3671_v31, %v786_v17  ;;  %v7395_v26 = vand.u32 4294901760, %v3895_v11  ;;  %vm574_vm4 = vcmp.eq.s32.totalorder %v3571_v15, %v3629_v58  ;;  %vm678_vm5 = vcmp.eq.s32.totalorder %v3571_v15, %v3632_v59 }
  0x41   : > { %7757 = vst [vmem:[#allocation11_spill] sm:$0xff] %v3901_v8  ;;  %1201 = vmatprep.subr.mxu0 %v3901_v8  ;;  %v1333_v32 = vand.u32 4294901760, %v1332_v16  ;;  %v1000_v37 = vsel %vm471_vm15, %v3676_v35, %v893_v10  ;;  %v785_v12 = vsel %vm678_vm5, %v3650_v5, 0.0  ;;  %v3923_v45 = vsub.f32 %v3748_v54, %v3757_v56 }
  0x42   : > { %v3929_v50 = vsel %vm367_vm14, %v3701_v44, %v1000_v37  ;;  %v1338_v6 = vsub.f32 %v3895_v11, %v7395_v26  ;;  %v892_v60 = vsel %vm574_vm4, %v3665_v27, %v785_v12  ;;  %vm365_vm6 = vcmp.eq.s32.totalorder %v3571_v15, %v3622_v57 }
  0x43   : > { %1334 = vmatprep.subr.mxu1 %v1333_v32  ;;  %v3938_v13 = vand.u32 4294901760, %v3929_v50  ;;  %v999_v14 = vsel %vm470_vm3, %v3668_v30, %v892_v60  ;;  %v7393_v54 = vand.u32 4294901760, %v3923_v45  ;;  %vm469_vm7 = vcmp.eq.s32.totalorder %v3571_v15, %v3641_v63 }
  0x44   : > { %v1339_v16 = vand.u32 4294901760, %v1338_v6  ;;  %v3951_v17 = vsel %vm366_vm2, %v3694_v40, %v999_v14  ;;  %vm573_vm8 = vcmp.eq.s32.totalorder %v3571_v15, %v3644_v0  ;;  %vm677_vm9 = vcmp.eq.s32.totalorder %v3571_v15, %v3658_v24 }
  0x45   : > { %7758 = vst [vmem:[#allocation12_spill] sm:$0xff] %v3938_v13  ;;  %1203 = vmatpush1.msra.mxu0 %v3938_v13  ;;  %v3959_v10 = vand.u32 4294901760, %v3951_v17  ;;  %v1344_v32 = vsub.f32 %v3923_v45, %v7393_v54  ;;  %v784_v37 = vsel %vm677_vm9, %v3661_v25, 0.0  ;;  %v3967_v12 = vsub.f32 %v3770_v62, %v3779_v3 }
  0x46   : > { %1340 = vmatpush1.msra.mxu1 %v1339_v16  ;;  %v891_v6 = vsel %vm573_vm8, %v3671_v31, %v784_v37  ;;  %vm364_vm10 = vcmp.eq.s32.totalorder %v3574_v18, %v3616_v52  ;;  %vm468_vm11 = vcmp.eq.s32.totalorder %v3574_v18, %v3619_v53  ;;  %vm572_vm12 = vcmp.eq.s32.totalorder %v3574_v18, %v3629_v58 }
  0x47   : > { %7759 = vst [vmem:[#allocation13_spill] sm:$0xff] %v3959_v10  ;;  %1205 = vmatprep.subr.mxu0 %v3959_v10  ;;  %v1345_v60 = vand.u32 4294901760, %v1344_v32  ;;  %v998_v62 = vsel %vm469_vm7, %v3676_v35, %v891_v6  ;;  %v7394_v14 = vand.u32 4294901760, %v3967_v12  ;;  %vm676_vm13 = vcmp.eq.s32.totalorder %v3574_v18, %v3632_v59 }
  0x48   : > { %v3988_v16 = vsel %vm365_vm6, %v3701_v44, %v998_v62  ;;  %v783_v37 = vsel %vm676_vm13, %v3650_v5, 0.0  ;;  %v3993_v32 = vsub.f32 %v3793_v4, %v3802_v9  ;;  %vm363_vm14 = vcmp.eq.s32.totalorder %v3574_v18, %v3622_v57 }
  0x49   : > { %1346 = vmatprep.subr.mxu1 %v1345_v60  ;;  %v3998_v6 = vand.u32 4294901760, %v3988_v16  ;;  %v1350_v54 = vsub.f32 %v3967_v12, %v7394_v14  ;;  %v890_v15 = vsel %vm572_vm12, %v3665_v27, %v783_v37  ;;  %vm467_vm15 = vcmp.eq.s32.totalorder %v3574_v18, %v3641_v63 }
  0x4a   : > { %v997_v4 = vsel %vm468_vm11, %v3668_v30, %v890_v15  ;;  %v7399_v62 = vand.u32 4294901760, %v3993_v32  ;;  %vm571_vm0 = vcmp.eq.s32.totalorder %v3574_v18, %v3644_v0  ;;  %vm675_vm1 = vcmp.eq.s32.totalorder %v3574_v18, %v3658_v24 }
  0x4b   : > { %7760 = vst [vmem:[#allocation14_spill] sm:$0xff] %v3998_v6  ;;  %1207 = vmatpush1.msra.mxu0 %v3998_v6  ;;  %v1351_v60 = vand.u32 4294901760, %v1350_v54  ;;  %v4020_v37 = vsel %vm364_vm10, %v3694_v40, %v997_v4  ;;  %v782_v14 = vsel %vm675_vm1, %v3661_v25, 0.0  ;;  %v4025_v15 = vsub.f32 %v3823_v34, %v3831_v36 }
  0x4c   : > { %v4028_v26 = vand.u32 4294901760, %v4020_v37  ;;  %v1356_v7 = vsub.f32 %v3993_v32, %v7399_v62  ;;  %v889_v54 = vsel %vm571_vm0, %v3671_v31, %v782_v14  ;;  %vm362_vm2 = vcmp.eq.s32.totalorder %v3577_v19, %v3616_v52 }
  0x4d   : > { %1352 = vmatpush1.msra.mxu1 %v1351_v60  ;;  %v996_v4 = vsel %vm467_vm15, %v3676_v35, %v889_v54  ;;  %v7400_v9 = vand.u32 4294901760, %v4025_v15  ;;  %vm466_vm3 = vcmp.eq.s32.totalorder %v3577_v19, %v3619_v53  ;;  %vm570_vm4 = vcmp.eq.s32.totalorder %v3577_v19, %v3629_v58 }
  0x4e   : > { %7761 = vst [vmem:[#allocation15_spill] sm:$0xff] %v4028_v26  ;;  %1209 = vmatprep.subr.mxu0 %v4028_v26  ;;  %v1357_v34 = vand.u32 4294901760, %v1356_v7  ;;  %v4047_v14 = vsel %vm363_vm14, %v3701_v44, %v996_v4  ;;  %vm674_vm5 = vcmp.eq.s32.totalorder %v3577_v19, %v3632_v59  ;;  %v4053_v60 = vsub.f32 %v3844_v41, %v3853_v46 }
  0x4f   : > { %v4056_v54 = vand.u32 4294901760, %v4047_v14  ;;  %v1362_v7 = vsub.f32 %v4025_v15, %v7400_v9  ;;  %v781_v62 = vsel %vm674_vm5, %v3650_v5, 0.0  ;;  %vm361_vm6 = vcmp.eq.s32.totalorder %v3577_v19, %v3622_v57 }
  0x50   : > { %1358 = vmatprep.subr.mxu1 %v1357_v34  ;;  %v888_v18 = vsel %vm570_vm4, %v3665_v27, %v781_v62  ;;  %v7405_v4 = vand.u32 4294901760, %v4053_v60  ;;  %vm465_vm7 = vcmp.eq.s32.totalorder %v3577_v19, %v3641_v63  ;;  %vm569_vm8 = vcmp.eq.s32.totalorder %v3577_v19, %v3644_v0 }
  0x51   : > { %7762 = vst [vmem:[#allocation16_spill] sm:$0xff] %v4056_v54  ;;  %1211 = vmatpush1.msra.mxu0 %v4056_v54  ;;  %v1363_v41 = vand.u32 4294901760, %v1362_v7  ;;  %v995_v9 = vsel %vm466_vm3, %v3668_v30, %v888_v18  ;;  %vm673_vm9 = vcmp.eq.s32.totalorder %v3577_v19, %v3658_v24  ;;  %v4079_v62 = vsub.f32 %v3867_v55, %v3876_v61 }
  0x52   : > { %v4085_v34 = vsel %vm362_vm2, %v3694_v40, %v995_v9  ;;  %v1368_v7 = vsub.f32 %v4053_v60, %v7405_v4  ;;  %v780_v46 = vsel %vm673_vm9, %v3661_v25, 0.0  ;;  %vm360_vm10 = vcmp.eq.s32.totalorder %v3580_v20, %v3616_v52 }
  0x53   : > { %1364 = vmatpush1.msra.mxu1 %v1363_v41  ;;  %v4094_v18 = vand.u32 4294901760, %v4085_v34  ;;  %v887_v55 = vsel %vm569_vm8, %v3671_v31, %v780_v46  ;;  %v7410_v61 = vand.u32 4294901760, %v4079_v62  ;;  %vm464_vm11 = vcmp.eq.s32.totalorder %v3580_v20, %v3619_v53 }
  0x54   : > { %v1369_v9 = vand.u32 4294901760, %v1368_v7  ;;  %v994_v4 = vsel %vm465_vm7, %v3676_v35, %v887_v55  ;;  %vm568_vm12 = vcmp.eq.s32.totalorder %v3580_v20, %v3629_v58  ;;  %vm672_vm13 = vcmp.eq.s32.totalorder %v3580_v20, %v3632_v59 }
  0x55   : > { %7763 = vst [vmem:[#allocation17_spill] sm:$0xff] %v4094_v18  ;;  %1213 = vmatprep.subr.mxu0 %v4094_v18  ;;  %v4113_v46 = vsel %vm361_vm6, %v3701_v44, %v994_v4  ;;  %v1374_v41 = vsub.f32 %v4079_v62, %v7410_v61  ;;  %v779_v7 = vsel %vm672_vm13, %v3650_v5, 0.0  ;;  %v4121_v55 = vsub.f32 %v3889_v2, %v3901_v8 }
  0x56   : > { %1370 = vmatprep.subr.mxu1 %v1369_v9  ;;  %v4124_v36 = vand.u32 4294901760, %v4113_v46  ;;  %v886_v3 = vsel %vm568_vm12, %v3665_v27, %v779_v7  ;;  %vm359_vm14 = vcmp.eq.s32.totalorder %v3580_v20, %v3622_v57  ;;  %vm463_vm15 = vcmp.eq.s32.totalorder %v3580_v20, %v3641_v63 }
  0x57   : > { %v1375_v19 = vand.u32 4294901760, %v1374_v41  ;;  %v993_v4 = vsel %vm464_vm11, %v3668_v30, %v886_v3  ;;  %v7411_v2 = vand.u32 4294901760, %v4121_v55  ;;  %vm567_vm0 = vcmp.eq.s32.totalorder %v3580_v20, %v3644_v0 }
  0x58   : > { %7764 = vst [vmem:[#allocation18_spill] sm:$0xff] %v4124_v36  ;;  %1215 = vmatpush1.msra.mxu0 %v4124_v36  ;;  %v4143_v9 = vsel %vm360_vm10, %v3694_v40, %v993_v4  ;;  %vm671_vm1 = vcmp.eq.s32.totalorder %v3580_v20, %v3658_v24  ;;  %v4149_v41 = vsub.f32 %v3929_v50, %v3938_v13 }
  0x59   : > { %vm358_vm2 = vcmp.eq.s32.totalorder %v3583_v21, %v3616_v52  ;;  %1376 = vmatpush1.msra.mxu1 %v1375_v19  ;;  %v4154_v3 = vand.u32 4294901760, %v4143_v9  ;;  %v1380_v7 = vsub.f32 %v4121_v55, %v7411_v2  ;;  %v778_v4 = vsel %vm671_vm1, %v3661_v25, 0.0 }
  0x5a   : > { %vm462_vm3 = vcmp.eq.s32.totalorder %v3583_v21, %v3619_v53  ;;  %v885_v61 = vsel %vm567_vm0, %v3671_v31, %v778_v4  ;;  %vm566_vm4 = vcmp.eq.s32.totalorder %v3583_v21, %v3629_v58  ;;  %vm670_vm5 = vcmp.eq.s32.totalorder %v3583_v21, %v3632_v59 }
  0x5b   : > { %7765 = vst [vmem:[#allocation19_spill] sm:$0xff] %v4154_v3  ;;  %1217 = vmatprep.subr.mxu0 %v4154_v3  ;;  %v1381_v19 = vand.u32 4294901760, %v1380_v7  ;;  %v992_v2 = vsel %vm463_vm15, %v3676_v35, %v885_v61  ;;  %v777_v13 = vsel %vm670_vm5, %v3650_v5, 0.0  ;;  %v4176_v4 = vsub.f32 %v3951_v17, %v3959_v10 }
  0x5c   : > { %v4182_v50 = vsel %vm359_vm14, %v3701_v44, %v992_v2  ;;  %v7767_v8 = vand.u32 4294901760, %v4149_v41  ;;  %v884_v56 = vsel %vm566_vm4, %v3665_v27, %v777_v13  ;;  %vm357_vm6 = vcmp.eq.s32.totalorder %v3583_v21, %v3622_v57 }
  0x5d   : > { %7766 = vst [vmem:[#allocation20_spill] sm:$0xff] %v4176_v4  ;;  %1382 = vmatprep.subr.mxu1 %v1381_v19  ;;  %v4191_v61 = vand.u32 4294901760, %v4182_v50  ;;  %v991_v20 = vsel %vm462_vm3, %v3668_v30, %v884_v56  ;;  %v7418_v17 = vand.u32 4294901760, %v4176_v4  ;;  %vm461_vm7 = vcmp.eq.s32.totalorder %v3583_v21, %v3641_v63 }
  0x5e   : > { %v1386_v7 = vsub.f32 %v4149_v41, %v7767_v8  ;;  %v4204_v13 = vsel %vm358_vm2, %v3694_v40, %v991_v20  ;;  %vm565_vm8 = vcmp.eq.s32.totalorder %v3583_v21, %v3644_v0  ;;  %vm669_vm9 = vcmp.eq.s32.totalorder %v3583_v21, %v3658_v24 }
  0x5f   : > { %7768 = vst [vmem:[#allocation21_spill] sm:$0xff] %v4191_v61  ;;  %1219 = vmatpush1.msra.mxu0 %v4191_v61  ;;  %v4212_v56 = vand.u32 4294901760, %v4204_v13  ;;  %v1392_v2 = vsub.f32 %v4176_v4, %v7418_v17  ;;  %v776_v19 = vsel %vm669_vm9, %v3661_v25, 0.0  ;;  %vm356_vm10 = vcmp.eq.s32.totalorder %v3586_v22, %v3616_v52 }
  0x60   : > { %v1387_v8 = vand.u32 4294901760, %v1386_v7  ;;  %v4220_v7 = vsub.f32 %v3988_v16, %v3998_v6  ;;  %v883_v20 = vsel %vm565_vm8, %v3671_v31, %v776_v19  ;;  %vm460_vm11 = vcmp.eq.s32.totalorder %v3586_v22, %v3619_v53 }
  0x61   : > { %7769 = vst [vmem:[#allocation22_spill] sm:$0xff] %v4212_v56  ;;  %vm564_vm12 = vcmp.eq.s32.totalorder %v3586_v22, %v3629_v58  ;;  %1221 = vmatprep.subr.mxu0 %v4212_v56  ;;  %v1393_v17 = vand.u32 4294901760, %v1392_v2  ;;  %v990_v16 = vsel %vm461_vm7, %v3676_v35, %v883_v20  ;;  %vm668_vm13 = vcmp.eq.s32.totalorder %v3586_v22, %v3632_v59 }
  0x62   : > { %7770 = vst [vmem:[#allocation23_spill] sm:$0xff] %v4220_v7  ;;  %1388 = vmatpush1.msra.mxu1 %v1387_v8  ;;  %v7423_v8 = vand.u32 4294901760, %v4220_v7  ;;  %v4241_v19 = vsel %vm357_vm6, %v3701_v44, %v990_v16  ;;  %v775_v6 = vsel %vm668_vm13, %v3650_v5, 0.0  ;;  %v4246_v2 = vsub.f32 %v4020_v37, %v4028_v26 }
  0x63   : > { %vm355_vm14 = vcmp.eq.s32.totalorder %v3586_v22, %v3622_v57  ;;  %1394 = vmatprep.subr.mxu1 %v1393_v17  ;;  %v4251_v20 = vand.u32 4294901760, %v4241_v19  ;;  %v882_v21 = vsel %vm564_vm12, %v3665_v27, %v775_v6  ;;  %vm459_vm15 = vcmp.eq.s32.totalorder %v3586_v22, %v3641_v63 }
  0x64   : > { %v1398_v10 = vsub.f32 %v4220_v7, %v7423_v8  ;;  %v989_v37 = vsel %vm460_vm11, %v3668_v30, %v882_v21  ;;  %vm563_vm0 = vcmp.eq.s32.totalorder %v3586_v22, %v3644_v0  ;;  %vm667_vm1 = vcmp.eq.s32.totalorder %v3586_v22, %v3658_v24 }
  0x65   : > { %7771 = vst [vmem:[#allocation24_spill] sm:$0xff] %v4251_v20  ;;  %1223 = vmatpush1.msra.mxu0 %v4251_v20  ;;  %v4273_v6 = vsel %vm356_vm10, %v3694_v40, %v989_v37  ;;  %v774_v8 = vsel %vm667_vm1, %v3661_v25, 0.0  ;;  %v4278_v21 = vsub.f32 %v4047_v14, %v4056_v54  ;;  %v7773_v26 = vand.u32 4294901760, %v4246_v2 }
  0x66   : > { %v1399_v17 = vand.u32 4294901760, %v1398_v10  ;;  %v4281_v16 = vand.u32 4294901760, %v4273_v6  ;;  %v881_v10 = vsel %vm563_vm0, %v3671_v31, %v774_v8  ;;  %vm354_vm2 = vcmp.eq.s32.totalorder %v3589_v23, %v3616_v52 }
  0x67   : > { %v1404_v7 = vsub.f32 %v4246_v2, %v7773_v26  ;;  %v988_v37 = vsel %vm459_vm15, %v3676_v35, %v881_v10  ;;  %v7430_v4 = vand.u32 4294901760, %v4278_v21  ;;  %vm458_vm3 = vcmp.eq.s32.totalorder %v3589_v23, %v3619_v53 }
  0x68   : > { %7772 = vst [vmem:[#allocation25_spill] sm:$0xff] %v4281_v16  ;;  %1400 = vmatpush1.msra.mxu1 %v1399_v17  ;;  %vm562_vm4 = vcmp.eq.s32.totalorder %v3589_v23, %v3629_v58  ;;  %1225 = vmatprep.subr.mxu0 %v4281_v16  ;;  %v4300_v26 = vsel %vm355_vm14, %v3701_v44, %v988_v37 }
  0x69   : > { %v1405_v14 = vand.u32 4294901760, %v1404_v7  ;;  %vm666_vm5 = vcmp.eq.s32.totalorder %v3589_v23, %v3632_v59  ;;  %v4306_v8 = vsub.f32 %v4085_v34, %v4094_v18  ;;  %v4309_v17 = vand.u32 4294901760, %v4300_v26 }
  0x6a   : > { %v1410_v7 = vsub.f32 %v4278_v21, %v7430_v4  ;;  %v773_v10 = vsel %vm666_vm5, %v3650_v5, 0.0  ;;  %vm353_vm6 = vcmp.eq.s32.totalorder %v3589_v23, %v3622_v57  ;;  %vm457_vm7 = vcmp.eq.s32.totalorder %v3589_v23, %v3641_v63 }
  0x6b   : > { %7774 = vst [vmem:[#allocation26_spill] sm:$0xff] %v4306_v8  ;;  %7775 = vst [vmem:[#allocation27_spill] sm:$0xff] %v4309_v17  ;;  %1406 = vmatprep.subr.mxu1 %v1405_v14  ;;  %v880_v22 = vsel %vm562_vm4, %v3665_v27, %v773_v10  ;;  %v7435_v37 = vand.u32 4294901760, %v4306_v8  ;;  %vm561_vm8 = vcmp.eq.s32.totalorder %v3589_v23, %v3644_v0  ;;  %1227 = vmatpush1.msra.mxu0 %v4309_v17 }
  0x6c   : > { %v1411_v34 = vand.u32 4294901760, %v1410_v7  ;;  %v987_v4 = vsel %vm458_vm3, %v3668_v30, %v880_v22  ;;  %vm665_vm9 = vcmp.eq.s32.totalorder %v3589_v23, %v3658_v24  ;;  %v4332_v14 = vsub.f32 %v4113_v46, %v4124_v36 }
  0x6d   : > { %v4338_v10 = vsel %vm354_vm2, %v3694_v40, %v987_v4  ;;  %v1416_v7 = vsub.f32 %v4306_v8, %v7435_v37  ;;  %v772_v18 = vsel %vm665_vm9, %v3661_v25, 0.0  ;;  %vm352_vm10 = vcmp.eq.s32.totalorder %v3592_v28, %v3616_v52 }
  0x6e   : > { %1412 = vmatpush1.msra.mxu1 %v1411_v34  ;;  %v4347_v22 = vand.u32 4294901760, %v4338_v10  ;;  %v879_v46 = vsel %vm561_vm8, %v3671_v31, %v772_v18  ;;  %v7440_v36 = vand.u32 4294901760, %v4332_v14  ;;  %vm456_vm11 = vcmp.eq.s32.totalorder %v3592_v28, %v3619_v53 }
  0x6f   : > { %v1417_v4 = vand.u32 4294901760, %v1416_v7  ;;  %v986_v37 = vsel %vm457_vm7, %v3676_v35, %v879_v46  ;;  %vm560_vm12 = vcmp.eq.s32.totalorder %v3592_v28, %v3629_v58  ;;  %vm664_vm13 = vcmp.eq.s32.totalorder %v3592_v28, %v3632_v59 }
  0x70   : > { %7776 = vst [vmem:[#allocation28_spill] sm:$0xff] %v4347_v22  ;;  %1229 = vmatprep.subr.mxu0 %v4347_v22  ;;  %v4366_v18 = vsel %vm353_vm6, %v3701_v44, %v986_v37  ;;  %v1422_v34 = vsub.f32 %v4332_v14, %v7440_v36  ;;  %v771_v7 = vsel %vm664_vm13, %v3650_v5, 0.0  ;;  %v4374_v46 = vsub.f32 %v4143_v9, %v4154_v3 }
  0x71   : > { %1418 = vmatprep.subr.mxu1 %v1417_v4  ;;  %v4377_v54 = vand.u32 4294901760, %v4366_v18  ;;  %v878_v8 = vsel %vm560_vm12, %v3665_v27, %v771_v7  ;;  %vm351_vm14 = vcmp.eq.s32.totalorder %v3592_v28, %v3622_v57  ;;  %vm455_vm15 = vcmp.eq.s32.totalorder %v3592_v28, %v3641_v63 }
  0x72   : > { %7777 = vst [vmem:[#allocation29_spill] sm:$0xff] %v4374_v46  ;;  %v1423_v23 = vand.u32 4294901760, %v1422_v34  ;;  %v985_v37 = vsel %vm456_vm11, %v3668_v30, %v878_v8  ;;  %v7441_v9 = vand.u32 4294901760, %v4374_v46  ;;  %vm559_vm0 = vcmp.eq.s32.totalorder %v3592_v28, %v3644_v0 }
  0x73   : > { %7778 = vst [vmem:[#allocation30_spill] sm:$0xff] %v4377_v54  ;;  %1231 = vmatpush1.msra.mxu0 %v4377_v54  ;;  %v4396_v4 = vsel %vm352_vm10, %v3694_v40, %v985_v37  ;;  %vm663_vm1 = vcmp.eq.s32.totalorder %v3592_v28, %v3658_v24  ;;  %v4402_v34 = vsub.f32 %v4182_v50, %v4191_v61 }
  0x74   : > { %vm350_vm2 = vcmp.eq.s32.totalorder %v3595_v29, %v3616_v52  ;;  %1424 = vmatpush1.msra.mxu1 %v1423_v23  ;;  %v4407_v8 = vand.u32 4294901760, %v4396_v4  ;;  %v1428_v7 = vsub.f32 %v4374_v46, %v7441_v9  ;;  %v770_v37 = vsel %vm663_vm1, %v3661_v25, 0.0 }
  0x75   : > { %7779 = vst [vmem:[#allocation31_spill] sm:$0xff] %v4402_v34  ;;  %vm454_vm3 = vcmp.eq.s32.totalorder %v3595_v29, %v3619_v53  ;;  %v877_v36 = vsel %vm559_vm0, %v3671_v31, %v770_v37  ;;  %vm558_vm4 = vcmp.eq.s32.totalorder %v3595_v29, %v3629_v58  ;;  %vm662_vm5 = vcmp.eq.s32.totalorder %v3595_v29, %v3632_v59 }
  0x76   : > { %7780 = vst [vmem:[#allocation32_spill] sm:$0xff] %v4407_v8  ;;  %1233 = vmatprep.subr.mxu0 %v4407_v8  ;;  %v1429_v23 = vand.u32 4294901760, %v1428_v7  ;;  %v984_v9 = vsel %vm455_vm15, %v3676_v35, %v877_v36  ;;  %v769_v61 = vsel %vm662_vm5, %v3650_v5, 0.0  ;;  %v4429_v37 = vsub.f32 %v4204_v13, %v4212_v56 }
  0x77   : > { %v4435_v50 = vsel %vm351_vm14, %v3701_v44, %v984_v9  ;;  %v7782_v3 = vand.u32 4294901760, %v4402_v34  ;;  %v876_v46 = vsel %vm558_vm4, %v3665_v27, %v769_v61  ;;  %vm349_vm6 = vcmp.eq.s32.totalorder %v3595_v29, %v3622_v57 }
  0x78   : > { %7781 = vst [vmem:[#allocation33_spill] sm:$0xff] %v4429_v37  ;;  %1430 = vmatprep.subr.mxu1 %v1429_v23  ;;  %v4444_v36 = vand.u32 4294901760, %v4435_v50  ;;  %v983_v28 = vsel %vm454_vm3, %v3668_v30, %v876_v46  ;;  %v7448_v13 = vand.u32 4294901760, %v4429_v37  ;;  %vm453_vm7 = vcmp.eq.s32.totalorder %v3595_v29, %v3641_v63 }
  0x79   : > { %v1434_v7 = vsub.f32 %v4402_v34, %v7782_v3  ;;  %v4457_v61 = vsel %vm350_vm2, %v3694_v40, %v983_v28  ;;  %vm557_vm8 = vcmp.eq.s32.totalorder %v3595_v29, %v3644_v0  ;;  %vm661_vm9 = vcmp.eq.s32.totalorder %v3595_v29, %v3658_v24 }
  0x7a   : > { %7783 = vst [vmem:[#allocation34_spill] sm:$0xff] %v4444_v36  ;;  %1235 = vmatpush1.msra.mxu0 %v4444_v36  ;;  %v4465_v46 = vand.u32 4294901760, %v4457_v61  ;;  %v1440_v9 = vsub.f32 %v4429_v37, %v7448_v13  ;;  %v768_v23 = vsel %vm661_vm9, %v3661_v25, 0.0  ;;  %vm348_vm10 = vcmp.eq.s32.totalorder %v3598_v33, %v3616_v52 }
  0x7b   : > { %v1435_v3 = vand.u32 4294901760, %v1434_v7  ;;  %v4473_v7 = vsub.f32 %v4241_v19, %v4251_v20  ;;  %v875_v28 = vsel %vm557_vm8, %v3671_v31, %v768_v23  ;;  %vm452_vm11 = vcmp.eq.s32.totalorder %v3598_v33, %v3619_v53 }
  0x7c   : > { %7784 = vst [vmem:[#allocation35_spill] sm:$0xff] %v4465_v46  ;;  %vm556_vm12 = vcmp.eq.s32.totalorder %v3598_v33, %v3629_v58  ;;  %1237 = vmatprep.subr.mxu0 %v4465_v46  ;;  %v1441_v13 = vand.u32 4294901760, %v1440_v9  ;;  %v982_v19 = vsel %vm453_vm7, %v3676_v35, %v875_v28  ;;  %vm660_vm13 = vcmp.eq.s32.totalorder %v3598_v33, %v3632_v59 }
  0x7d   : > { %7785 = vst [vmem:[#allocation36_spill] sm:$0xff] %v4473_v7  ;;  %1436 = vmatpush1.msra.mxu1 %v1435_v3  ;;  %v7453_v3 = vand.u32 4294901760, %v4473_v7  ;;  %v4494_v23 = vsel %vm349_vm6, %v3701_v44, %v982_v19  ;;  %v767_v20 = vsel %vm660_vm13, %v3650_v5, 0.0  ;;  %v4499_v9 = vsub.f32 %v4273_v6, %v4281_v16 }
  0x7e   : > { %vm347_vm14 = vcmp.eq.s32.totalorder %v3598_v33, %v3622_v57  ;;  %1442 = vmatprep.subr.mxu1 %v1441_v13  ;;  %v4504_v28 = vand.u32 4294901760, %v4494_v23  ;;  %v874_v29 = vsel %vm556_vm12, %v3665_v27, %v767_v20  ;;  %vm451_vm15 = vcmp.eq.s32.totalorder %v3598_v33, %v3641_v63 }
  0x7f   : > { %7786 = vst [vmem:[#allocation37_spill] sm:$0xff] %v4499_v9  ;;  %v1446_v56 = vsub.f32 %v4473_v7, %v7453_v3  ;;  %v981_v6 = vsel %vm452_vm11, %v3668_v30, %v874_v29  ;;  %vm555_vm0 = vcmp.eq.s32.totalorder %v3598_v33, %v3644_v0  ;;  %vm659_vm1 = vcmp.eq.s32.totalorder %v3598_v33, %v3658_v24 }
  0x80   : > { %7787 = vst [vmem:[#allocation38_spill] sm:$0xff] %v4504_v28  ;;  %1239 = vmatpush1.msra.mxu0 %v4504_v28  ;;  %v4526_v20 = vsel %vm348_vm10, %v3694_v40, %v981_v6  ;;  %v766_v3 = vsel %vm659_vm1, %v3661_v25, 0.0  ;;  %v4531_v29 = vsub.f32 %v4300_v26, %v4309_v17  ;;  %v7790_v16 = vand.u32 4294901760, %v4499_v9 }
  0x81   : > { %v1447_v13 = vand.u32 4294901760, %v1446_v56  ;;  %v4534_v19 = vand.u32 4294901760, %v4526_v20  ;;  %v873_v56 = vsel %vm555_vm0, %v3671_v31, %v766_v3  ;;  %vm346_vm2 = vcmp.eq.s32.totalorder %v3544_v1, %v3616_v52 }
  0x82   : > { %7788 = vst [vmem:[#allocation39_spill] sm:$0xff] %v4531_v29  ;;  %v1452_v7 = vsub.f32 %v4499_v9, %v7790_v16  ;;  %v980_v6 = vsel %vm451_vm15, %v3676_v35, %v873_v56  ;;  %v7460_v37 = vand.u32 4294901760, %v4531_v29  ;;  %vm450_vm3 = vcmp.eq.s32.totalorder %v3544_v1, %v3619_v53 }
  0x83   : > { %7789 = vst [vmem:[#allocation40_spill] sm:$0xff] %v4534_v19  ;;  %1448 = vmatpush1.msra.mxu1 %v1447_v13  ;;  %vm554_vm4 = vcmp.eq.s32.totalorder %v3544_v1, %v3629_v58  ;;  %1241 = vmatprep.subr.mxu0 %v4534_v19  ;;  %v4553_v16 = vsel %vm347_vm14, %v3701_v44, %v980_v6 }
  0x84   : > { %v1453_v26 = vand.u32 4294901760, %v1452_v7  ;;  %vm658_vm5 = vcmp.eq.s32.totalorder %v3544_v1, %v3632_v59  ;;  %v4559_v3 = vsub.f32 %v4338_v10, %v4347_v22  ;;  %v4562_v13 = vand.u32 4294901760, %v4553_v16 }
  0x85   : > { %v1458_v7 = vsub.f32 %v4531_v29, %v7460_v37  ;;  %v765_v56 = vsel %vm658_vm5, %v3650_v5, 0.0  ;;  %vm345_vm6 = vcmp.eq.s32.totalorder %v3544_v1, %v3622_v57  ;;  %vm449_vm7 = vcmp.eq.s32.totalorder %v3544_v1, %v3641_v63 }
  0x86   : > { %7791 = vst [vmem:[#allocation41_spill] sm:$0xff] %v4559_v3  ;;  %7792 = vst [vmem:[#allocation42_spill] sm:$0xff] %v4562_v13  ;;  %1454 = vmatprep.subr.mxu1 %v1453_v26  ;;  %v872_v33 = vsel %vm554_vm4, %v3665_v27, %v765_v56  ;;  %v7465_v6 = vand.u32 4294901760, %v4559_v3  ;;  %vm553_vm8 = vcmp.eq.s32.totalorder %v3544_v1, %v3644_v0  ;;  %1243 = vmatpush1.msra.mxu0 %v4562_v13 }
  0x87   : > { %v1459_v10 = vand.u32 4294901760, %v1458_v7  ;;  %v979_v37 = vsel %vm450_vm3, %v3668_v30, %v872_v33  ;;  %vm657_vm9 = vcmp.eq.s32.totalorder %v3544_v1, %v3658_v24  ;;  %v4585_v26 = vsub.f32 %v4366_v18, %v4377_v54 }
  0x88   : > { %v4591_v56 = vsel %vm346_vm2, %v3694_v40, %v979_v37  ;;  %v1464_v7 = vsub.f32 %v4559_v3, %v7465_v6  ;;  %v764_v22 = vsel %vm657_vm9, %v3661_v25, 0.0  ;;  %vm408_vm10 = vcmp.eq.s32.totalorder %v3601_v38, %v3616_v52 }
  0x89   : > { %7793 = vst [vmem:[#allocation43_spill] sm:$0xff] %v4585_v26  ;;  %1460 = vmatpush1.msra.mxu1 %v1459_v10  ;;  %v4600_v33 = vand.u32 4294901760, %v4591_v56  ;;  %v871_v18 = vsel %vm553_vm8, %v3671_v31, %v764_v22  ;;  %v7470_v54 = vand.u32 4294901760, %v4585_v26  ;;  %vm512_vm11 = vcmp.eq.s32.totalorder %v3601_v38, %v3619_v53 }
  0x8a   : > { %v1465_v37 = vand.u32 4294901760, %v1464_v7  ;;  %v978_v6 = vsel %vm449_vm7, %v3676_v35, %v871_v18  ;;  %vm616_vm12 = vcmp.eq.s32.totalorder %v3601_v38, %v3629_v58  ;;  %vm720_vm13 = vcmp.eq.s32.totalorder %v3601_v38, %v3632_v59 }
  0x8b   : > { %7794 = vst [vmem:[#allocation44_spill] sm:$0xff] %v4600_v33  ;;  %1245 = vmatprep.subr.mxu0 %v4600_v33  ;;  %v4619_v22 = vsel %vm345_vm6, %v3701_v44, %v978_v6  ;;  %v1470_v10 = vsub.f32 %v4585_v26, %v7470_v54  ;;  %v827_v7 = vsel %vm720_vm13, %v3650_v5, 0.0  ;;  %v4627_v18 = vsub.f32 %v4396_v4, %v4407_v8 }
  0x8c   : > { %1466 = vmatprep.subr.mxu1 %v1465_v37  ;;  %v4630_v17 = vand.u32 4294901760, %v4619_v22  ;;  %v934_v3 = vsel %vm616_vm12, %v3665_v27, %v827_v7  ;;  %vm407_vm14 = vcmp.eq.s32.totalorder %v3601_v38, %v3622_v57  ;;  %vm511_vm15 = vcmp.eq.s32.totalorder %v3601_v38, %v3641_v63 }
  0x8d   : > { %7795 = vst [vmem:[#allocation45_spill] sm:$0xff] %v4627_v18  ;;  %v1471_v6 = vand.u32 4294901760, %v1470_v10  ;;  %v1041_v54 = vsel %vm512_vm11, %v3668_v30, %v934_v3  ;;  %v7473_v4 = vand.u32 4294901760, %v4627_v18  ;;  %vm615_vm0 = vcmp.eq.s32.totalorder %v3601_v38, %v3644_v0 }
  0x8e   : > { %7796 = vst [vmem:[#allocation46_spill] sm:$0xff] %v4630_v17  ;;  %1247 = vmatpush1.msra.mxu0 %v4630_v17  ;;  %v4649_v37 = vsel %vm408_vm10, %v3694_v40, %v1041_v54  ;;  %vm719_vm1 = vcmp.eq.s32.totalorder %v3601_v38, %v3658_v24  ;;  %v4655_v10 = vsub.f32 %v4435_v50, %v4444_v36 }
  0x8f   : > { %vm406_vm2 = vcmp.eq.s32.totalorder %v3604_v39, %v3616_v52  ;;  %1472 = vmatpush1.msra.mxu1 %v1471_v6  ;;  %v4660_v3 = vand.u32 4294901760, %v4649_v37  ;;  %v1476_v7 = vsub.f32 %v4627_v18, %v7473_v4  ;;  %v826_v54 = vsel %vm719_vm1, %v3661_v25, 0.0 }
  0x90   : > { %7797 = vst [vmem:[#allocation47_spill] sm:$0xff] %v4655_v10  ;;  %vm510_vm3 = vcmp.eq.s32.totalorder %v3604_v39, %v3619_v53  ;;  %v933_v8 = vsel %vm615_vm0, %v3671_v31, %v826_v54  ;;  %vm614_vm4 = vcmp.eq.s32.totalorder %v3604_v39, %v3629_v58  ;;  %vm718_vm5 = vcmp.eq.s32.totalorder %v3604_v39, %v3632_v59 }
  0x91   : > { %7798 = vst [vmem:[#allocation48_spill] sm:$0xff] %v4660_v3  ;;  %1249 = vmatprep.subr.mxu0 %v4660_v3  ;;  %v1477_v6 = vand.u32 4294901760, %v1476_v7  ;;  %v1040_v4 = vsel %vm511_vm15, %v3676_v35, %v933_v8  ;;  %v825_v36 = vsel %vm718_vm5, %v3650_v5, 0.0  ;;  %v4682_v54 = vsub.f32 %v4457_v61, %v4465_v46 }
  0x92   : > { %v4688_v50 = vsel %vm407_vm14, %v3701_v44, %v1040_v4  ;;  %v7800_v18 = vand.u32 4294901760, %v4655_v10  ;;  %v932_v26 = vsel %vm614_vm4, %v3665_v27, %v825_v36  ;;  %vm405_vm6 = vcmp.eq.s32.totalorder %v3604_v39, %v3622_v57 }
  0x93   : > { %7799 = vst [vmem:[#allocation49_spill] sm:$0xff] %v4682_v54  ;;  %1478 = vmatprep.subr.mxu1 %v1477_v6  ;;  %v4697_v8 = vand.u32 4294901760, %v4688_v50  ;;  %v1039_v38 = vsel %vm510_vm3, %v3668_v30, %v932_v26  ;;  %v7480_v61 = vand.u32 4294901760, %v4682_v54  ;;  %vm509_vm7 = vcmp.eq.s32.totalorder %v3604_v39, %v3641_v63 }
  0x94   : > { %v1482_v7 = vsub.f32 %v4655_v10, %v7800_v18  ;;  %v4710_v36 = vsel %vm406_vm2, %v3694_v40, %v1039_v38  ;;  %vm613_vm8 = vcmp.eq.s32.totalorder %v3604_v39, %v3644_v0  ;;  %vm717_vm9 = vcmp.eq.s32.totalorder %v3604_v39, %v3658_v24 }
  0x95   : > { %7801 = vst [vmem:[#allocation50_spill] sm:$0xff] %v4697_v8  ;;  %1251 = vmatpush2.msra.mxu0 %v4697_v8  ;;  %v4718_v26 = vand.u32 4294901760, %v4710_v36  ;;  %v1488_v4 = vsub.f32 %v4682_v54, %v7480_v61  ;;  %v824_v6 = vsel %vm717_vm9, %v3661_v25, 0.0  ;;  %vm404_vm10 = vcmp.eq.s32.totalorder %v3607_v42, %v3616_v52 }
  0x96   : > { %v1483_v18 = vand.u32 4294901760, %v1482_v7  ;;  %v4726_v7 = vsub.f32 %v4494_v23, %v4504_v28  ;;  %v931_v38 = vsel %vm613_vm8, %v3671_v31, %v824_v6  ;;  %vm508_vm11 = vcmp.eq.s32.totalorder %v3607_v42, %v3619_v53 }
  0x97   : > { %7802 = vst [vmem:[#allocation51_spill] sm:$0xff] %v4718_v26  ;;  %vm612_vm12 = vcmp.eq.s32.totalorder %v3607_v42, %v3629_v58  ;;  %1253 = vmatprep.subr.mxu0 %v4718_v26  ;;  %v1489_v61 = vand.u32 4294901760, %v1488_v4  ;;  %v1038_v23 = vsel %vm509_vm7, %v3676_v35, %v931_v38  ;;  %vm716_vm13 = vcmp.eq.s32.totalorder %v3607_v42, %v3632_v59 }
  0x98   : > { %7803 = vst [vmem:[#allocation52_spill] sm:$0xff] %v4726_v7  ;;  %1484 = vmatpush1.msra.mxu1 %v1483_v18  ;;  %v7485_v18 = vand.u32 4294901760, %v4726_v7  ;;  %v4747_v6 = vsel %vm405_vm6, %v3701_v44, %v1038_v23  ;;  %v823_v28 = vsel %vm716_vm13, %v3650_v5, 0.0  ;;  %v4752_v4 = vsub.f32 %v4526_v20, %v4534_v19 }
  0x99   : > { %vm403_vm14 = vcmp.eq.s32.totalorder %v3607_v42, %v3622_v57  ;;  %1490 = vmatprep.subr.mxu1 %v1489_v61  ;;  %v4757_v38 = vand.u32 4294901760, %v4747_v6  ;;  %v930_v39 = vsel %vm612_vm12, %v3665_v27, %v823_v28  ;;  %vm507_vm15 = vcmp.eq.s32.totalorder %v3607_v42, %v3641_v63 }
  0x9a   : > { %7804 = vst [vmem:[#allocation53_spill] sm:$0xff] %v4752_v4  ;;  %v1494_v46 = vsub.f32 %v4726_v7, %v7485_v18  ;;  %v1037_v20 = vsel %vm508_vm11, %v3668_v30, %v930_v39  ;;  %vm611_vm0 = vcmp.eq.s32.totalorder %v3607_v42, %v3644_v0  ;;  %vm715_vm1 = vcmp.eq.s32.totalorder %v3607_v42, %v3658_v24 }
  0x9b   : > { %7805 = vst [vmem:[#allocation54_spill] sm:$0xff] %v4757_v38  ;;  %1255 = vmatpush2.msra.mxu0 %v4757_v38  ;;  %v4779_v28 = vsel %vm404_vm10, %v3694_v40, %v1037_v20  ;;  %v822_v18 = vsel %vm715_vm1, %v3661_v25, 0.0  ;;  %v4784_v39 = vsub.f32 %v4553_v16, %v4562_v13  ;;  %v7808_v19 = vand.u32 4294901760, %v4752_v4 }
  0x9c   : > { %v1495_v61 = vand.u32 4294901760, %v1494_v46  ;;  %v4787_v23 = vand.u32 4294901760, %v4779_v28  ;;  %v929_v46 = vsel %vm611_vm0, %v3671_v31, %v822_v18  ;;  %vm402_vm2 = vcmp.eq.s32.totalorder %v3610_v43, %v3616_v52 }
  0x9d   : > { %7806 = vst [vmem:[#allocation55_spill] sm:$0xff] %v4784_v39  ;;  %v1500_v7 = vsub.f32 %v4752_v4, %v7808_v19  ;;  %v1036_v20 = vsel %vm507_vm15, %v3676_v35, %v929_v46  ;;  %v7492_v54 = vand.u32 4294901760, %v4784_v39  ;;  %vm506_vm3 = vcmp.eq.s32.totalorder %v3610_v43, %v3619_v53 }
  0x9e   : > { %7807 = vst [vmem:[#allocation56_spill] sm:$0xff] %v4787_v23  ;;  %1496 = vmatpush1.msra.mxu1 %v1495_v61  ;;  %vm610_vm4 = vcmp.eq.s32.totalorder %v3610_v43, %v3629_v58  ;;  %1257 = vmatprep.subr.mxu0 %v4787_v23  ;;  %v4806_v19 = vsel %vm403_vm14, %v3701_v44, %v1036_v20 }
  0x9f   : > { %v1501_v16 = vand.u32 4294901760, %v1500_v7  ;;  %vm714_vm5 = vcmp.eq.s32.totalorder %v3610_v43, %v3632_v59  ;;  %v4812_v18 = vsub.f32 %v4591_v56, %v4600_v33  ;;  %v4815_v61 = vand.u32 4294901760, %v4806_v19 }
  0xa0   : > { %v1506_v7 = vsub.f32 %v4784_v39, %v7492_v54  ;;  %v821_v46 = vsel %vm714_vm5, %v3650_v5, 0.0  ;;  %vm401_vm6 = vcmp.eq.s32.totalorder %v3610_v43, %v3622_v57  ;;  %vm505_vm7 = vcmp.eq.s32.totalorder %v3610_v43, %v3641_v63 }
  0xa1   : > { %7809 = vst [vmem:[#allocation57_spill] sm:$0xff] %v4812_v18  ;;  %7810 = vst [vmem:[#allocation58_spill] sm:$0xff] %v4815_v61  ;;  %1502 = vmatprep.subr.mxu1 %v1501_v16  ;;  %v928_v42 = vsel %vm610_vm4, %v3665_v27, %v821_v46  ;;  %v7497_v20 = vand.u32 4294901760, %v4812_v18  ;;  %vm609_vm8 = vcmp.eq.s32.totalorder %v3610_v43, %v3644_v0  ;;  %1259 = vmatpush2.msra.mxu0 %v4815_v61 }
  0xa2   : > { %v1507_v56 = vand.u32 4294901760, %v1506_v7  ;;  %v1035_v54 = vsel %vm506_vm3, %v3668_v30, %v928_v42  ;;  %vm713_vm9 = vcmp.eq.s32.totalorder %v3610_v43, %v3658_v24  ;;  %v4838_v16 = vsub.f32 %v4619_v22, %v4630_v17 }
  0xa3   : > { %v4844_v46 = vsel %vm402_vm2, %v3694_v40, %v1035_v54  ;;  %v1512_v7 = vsub.f32 %v4812_v18, %v7497_v20  ;;  %v820_v33 = vsel %vm713_vm9, %v3661_v25, 0.0  ;;  %vm400_vm10 = vcmp.eq.s32.totalorder %v3613_v49, %v3616_v52 }
  0xa4   : > { %7811 = vst [vmem:[#allocation59_spill] sm:$0xff] %v4838_v16  ;;  %1508 = vmatpush1.msra.mxu1 %v1507_v56  ;;  %v4853_v42 = vand.u32 4294901760, %v4844_v46  ;;  %v927_v22 = vsel %vm609_vm8, %v3671_v31, %v820_v33  ;;  %v7502_v17 = vand.u32 4294901760, %v4838_v16  ;;  %vm504_vm11 = vcmp.eq.s32.totalorder %v3613_v49, %v3619_v53 }
  0xa5   : > { %v1513_v54 = vand.u32 4294901760, %v1512_v7  ;;  %v1034_v20 = vsel %vm505_vm7, %v3676_v35, %v927_v22  ;;  %vm608_vm12 = vcmp.eq.s32.totalorder %v3613_v49, %v3629_v58  ;;  %vm712_vm13 = vcmp.eq.s32.totalorder %v3613_v49, %v3632_v59 }
  0xa6   : > { %7812 = vst [vmem:[#allocation60_spill] sm:$0xff] %v4853_v42  ;;  %1261 = vmatprep.subr.mxu0 %v4853_v42  ;;  %v4872_v33 = vsel %vm401_vm6, %v3701_v44, %v1034_v20  ;;  %v1518_v56 = vsub.f32 %v4838_v16, %v7502_v17  ;;  %v819_v7 = vsel %vm712_vm13, %v3650_v5, 0.0  ;;  %v4880_v22 = vsub.f32 %v4649_v37, %v4660_v3 }
  0xa7   : > { %1514 = vmatprep.subr.mxu1 %v1513_v54  ;;  %v4883_v13 = vand.u32 4294901760, %v4872_v33  ;;  %v926_v18 = vsel %vm608_vm12, %v3665_v27, %v819_v7  ;;  %vm399_vm14 = vcmp.eq.s32.totalorder %v3613_v49, %v3622_v57  ;;  %vm503_vm15 = vcmp.eq.s32.totalorder %v3613_v49, %v3641_v63 }
  0xa8   : > { %7813 = vst [vmem:[#allocation61_spill] sm:$0xff] %v4880_v22  ;;  %v1519_v43 = vand.u32 4294901760, %v1518_v56  ;;  %v1033_v20 = vsel %vm504_vm11, %v3668_v30, %v926_v18  ;;  %v7507_v37 = vand.u32 4294901760, %v4880_v22  ;;  %vm607_vm0 = vcmp.eq.s32.totalorder %v3613_v49, %v3644_v0 }
  0xa9   : > { %7814 = vst [vmem:[#allocation62_spill] sm:$0xff] %v4883_v13  ;;  %1263 = vmatpush2.msra.mxu0 %v4883_v13  ;;  %v4902_v54 = vsel %vm400_vm10, %v3694_v40, %v1033_v20  ;;  %vm711_vm1 = vcmp.eq.s32.totalorder %v3613_v49, %v3658_v24  ;;  %v4908_v56 = vsub.f32 %v4688_v50, %v4697_v8  ;;  %v315_v18 = vadd.s32 208, %v3544_v1 }
  0xaa   : > { %1520 = vmatpush1.msra.mxu1 %v1519_v43  ;;  %v4912_v7 = vand.u32 4294901760, %v4902_v54  ;;  %v1524_v17 = vsub.f32 %v4880_v22, %v7507_v37  ;;  %v818_v20 = vsel %vm711_vm1, %v3661_v25, 0.0  ;;  %v4920_v3 = vsub.f32 %v4710_v36, %v4718_v26 }
  0xab   : > { %7815 = vst [vmem:[#allocation63_spill] sm:$0xff] %v4908_v56  ;;  %v925_v16 = vsel %vm607_vm0, %v3671_v31, %v818_v20  ;;  %v7512_v50 = vand.u32 4294901760, %v4908_v56  ;;  %vm398_vm2 = vcmp.eq.s32.totalorder %v315_v18, %v3616_v52  ;;  %vm502_vm3 = vcmp.eq.s32.totalorder %v315_v18, %v3619_v53 }
  0xac   : > { %7816 = vst [vmem:[#allocation64_spill] sm:$0xff] %v4912_v7  ;;  %7817 = vst [vmem:[#allocation65_spill] sm:$0xff] %v4920_v3  ;;  %1265 = vmatprep.subr.mxu0 %v4912_v7  ;;  %v1525_v43 = vand.u32 4294901760, %v1524_v17  ;;  %v1032_v37 = vsel %vm503_vm15, %v3676_v35, %v925_v16  ;;  %vm606_vm4 = vcmp.eq.s32.totalorder %v315_v18, %v3629_v58  ;;  %v7513_v26 = vand.u32 4294901760, %v4920_v3 }
  0xad   : > { %vm710_vm5 = vcmp.eq.s32.totalorder %v315_v18, %v3632_v59  ;;  %v4937_v36 = vsel %vm399_vm14, %v3701_v44, %v1032_v37  ;;  %v1530_v20 = vsub.f32 %v4908_v56, %v7512_v50  ;;  %vm397_vm6 = vcmp.eq.s32.totalorder %v315_v18, %v3622_v57 }
  0xae   : > { %v817_v17 = vsel %vm710_vm5, %v3650_v5, 0.0  ;;  %1526 = vmatprep.subr.mxu1 %v1525_v43  ;;  %v4945_v16 = vand.u32 4294901760, %v4937_v36  ;;  %vm501_vm7 = vcmp.eq.s32.totalorder %v315_v18, %v3641_v63  ;;  %v1536_v50 = vsub.f32 %v4920_v3, %v7513_v26 }
  0xaf   : > { %v924_v8 = vsel %vm606_vm4, %v3665_v27, %v817_v17  ;;  %v1531_v49 = vand.u32 4294901760, %v1530_v20  ;;  %vm605_vm8 = vcmp.eq.s32.totalorder %v315_v18, %v3644_v0  ;;  %vm709_vm9 = vcmp.eq.s32.totalorder %v315_v18, %v3658_v24 }
  0xb0   : > { %7818 = vst [vmem:[#allocation66_spill] sm:$0xff] %v4945_v16  ;;  %v1031_v37 = vsel %vm502_vm3, %v3668_v30, %v924_v8  ;;  %1267 = vmatpush2.msra.mxu0 %v4945_v16  ;;  %v4966_v20 = vsub.f32 %v4747_v6, %v4757_v38  ;;  %v314_v8 = vadd.s32 200, %v3544_v1  ;;  %v1537_v26 = vand.u32 4294901760, %v1536_v50 }
  0xb1   : > { %v4961_v43 = vsel %vm398_vm2, %v3694_v40, %v1031_v37  ;;  %1532 = vmatpush2.msra.mxu1 %v1531_v49  ;;  %v816_v3 = vsel %vm709_vm9, %v3661_v25, 0.0  ;;  %v4975_v56 = vsub.f32 %v4779_v28, %v4787_v23 }
  0xb2   : > { %7819 = vst [vmem:[#allocation67_spill] sm:$0xff] %v4966_v20  ;;  %v4970_v17 = vand.u32 4294901760, %v4961_v43  ;;  %v923_v37 = vsel %vm605_vm8, %v3671_v31, %v816_v3  ;;  %v7522_v22 = vand.u32 4294901760, %v4966_v20  ;;  %vm396_vm10 = vcmp.eq.s32.totalorder %v314_v8, %v3616_v52  ;;  %1538 = vmatprep.subr.mxu1 %v1537_v26 }
  0xb3   : > { %7821 = vst [vmem:[#allocation69_spill] sm:$0xff] %v4975_v56  ;;  %vm500_vm11 = vcmp.eq.s32.totalorder %v314_v8, %v3619_v53  ;;  %v1030_v6 = vsel %vm501_vm7, %v3676_v35, %v923_v37  ;;  %vm604_vm12 = vcmp.eq.s32.totalorder %v314_v8, %v3629_v58  ;;  %vm708_vm13 = vcmp.eq.s32.totalorder %v314_v8, %v3632_v59 }
  0xb4   : > { %7820 = vst [vmem:[#allocation68_spill] sm:$0xff] %v4970_v17  ;;  %1269 = vmatprep.subr.mxu0 %v4970_v17  ;;  %v7523_v28 = vand.u32 4294901760, %v4975_v56  ;;  %v4991_v3 = vsel %vm397_vm6, %v3701_v44, %v1030_v6  ;;  %v1542_v50 = vsub.f32 %v4966_v20, %v7522_v22  ;;  %v815_v26 = vsel %vm708_vm13, %v3650_v5, 0.0 }
  0xb5   : > { %vm395_vm14 = vcmp.eq.s32.totalorder %v314_v8, %v3622_v57  ;;  %v4999_v49 = vand.u32 4294901760, %v4991_v3  ;;  %v922_v37 = vsel %vm604_vm12, %v3665_v27, %v815_v26  ;;  %vm499_vm15 = vcmp.eq.s32.totalorder %v314_v8, %v3641_v63 }
  0xb6   : > { %v1548_v23 = vsub.f32 %v4975_v56, %v7523_v28  ;;  %v1543_v18 = vand.u32 4294901760, %v1542_v50  ;;  %v1029_v6 = vsel %vm500_vm11, %v3668_v30, %v922_v37  ;;  %vm603_vm0 = vcmp.eq.s32.totalorder %v314_v8, %v3644_v0 }
  0xb7   : > { %7822 = vst [vmem:[#allocation70_spill] sm:$0xff] %v4999_v49  ;;  %vm707_vm1 = vcmp.eq.s32.totalorder %v314_v8, %v3658_v24  ;;  %1271 = vmatpush2.msra.mxu0 %v4999_v49  ;;  %v5015_v26 = vsel %vm396_vm10, %v3694_v40, %v1029_v6  ;;  %v5020_v50 = vsub.f32 %v4806_v19, %v4815_v61  ;;  %v313_v56 = vadd.s32 192, %v3544_v1 }
  0xb8   : > { %v1549_v22 = vand.u32 4294901760, %v1548_v23  ;;  %v814_v28 = vsel %vm707_vm1, %v3661_v25, 0.0  ;;  %1544 = vmatpush2.msra.mxu1 %v1543_v18  ;;  %v5023_v37 = vand.u32 4294901760, %v5015_v26  ;;  %v5029_v20 = vsub.f32 %v4844_v46, %v4853_v42 }
  0xb9   : > { %7823 = vst [vmem:[#allocation71_spill] sm:$0xff] %v5020_v50  ;;  %v921_v38 = vsel %vm603_vm0, %v3671_v31, %v814_v28  ;;  %v7530_v19 = vand.u32 4294901760, %v5020_v50  ;;  %v5037_v18 = vsub.f32 %v4872_v33, %v4883_v13  ;;  %v5040_v6 = vadd.s32 184, %v3544_v1 }
  0xba   : > { %7824 = vst [vmem:[#allocation72_spill] sm:$0xff] %v5023_v37  ;;  %7825 = vst [vmem:[#allocation73_spill] sm:$0xff] %v5029_v20  ;;  %1550 = vmatprep.subr.mxu1 %v1549_v22  ;;  %v1028_v23 = vsel %vm499_vm15, %v3676_v35, %v921_v38  ;;  %1273 = vmatprep.subr.mxu0 %v5023_v37  ;;  %vm394_vm2 = vcmp.eq.s32.totalorder %v313_v56, %v3616_v52  ;;  %v7537_v22 = vand.u32 4294901760, %v5029_v20 }
  0xbb   : > { %7826 = vst [vmem:[#allocation74_spill] sm:$0xff] %v5037_v18  ;;  %v5046_v46 = vsel %vm395_vm14, %v3701_v44, %v1028_v23  ;;  %vm498_vm3 = vcmp.eq.s32.totalorder %v313_v56, %v3619_v53  ;;  %vm602_vm4 = vcmp.eq.s32.totalorder %v313_v56, %v3629_v58  ;;  %v1554_v33 = vsub.f32 %v5020_v50, %v7530_v19 }
  0xbc   : > { %v5052_v38 = vand.u32 4294901760, %v5046_v46  ;;  %vm706_vm5 = vcmp.eq.s32.totalorder %v313_v56, %v3632_v59  ;;  %vm393_vm6 = vcmp.eq.s32.totalorder %v313_v56, %v3622_v57  ;;  %vm497_vm7 = vcmp.eq.s32.totalorder %v313_v56, %v3641_v63 }
  0xbd   : > { %v813_v8 = vsel %vm706_vm5, %v3650_v5, 0.0  ;;  %vm601_vm8 = vcmp.eq.s32.totalorder %v313_v56, %v3644_v0  ;;  %v1555_v28 = vand.u32 4294901760, %v1554_v33  ;;  %v1560_v19 = vsub.f32 %v5029_v20, %v7537_v22 }
  0xbe   : > { %7827 = vst [vmem:[#allocation75_spill] sm:$0xff] %v5052_v38  ;;  %1275 = vmatpush2.msra.mxu0 %v5052_v38  ;;  %v920_v23 = vsel %vm602_vm4, %v3665_v27, %v813_v8  ;;  %vm705_vm9 = vcmp.eq.s32.totalorder %v313_v56, %v3658_v24  ;;  %vm392_vm10 = vcmp.eq.s32.totalorder %v5040_v6, %v3616_v52 }
  0xbf   : > { %v1027_v13 = vsel %vm498_vm3, %v3668_v30, %v920_v23  ;;  %v812_v42 = vsel %vm705_vm9, %v3661_v25, 0.0  ;;  %1556 = vmatpush2.msra.mxu1 %v1555_v28  ;;  %v1561_v8 = vand.u32 4294901760, %v1560_v19  ;;  %vm496_vm11 = vcmp.eq.s32.totalorder %v5040_v6, %v3619_v53 }
  0xc0   : > { %v5077_v33 = vsel %vm394_vm2, %v3694_v40, %v1027_v13  ;;  %v919_v22 = vsel %vm601_vm8, %v3671_v31, %v812_v42  ;;  %v7829_v28 = vand.u32 4294901760, %v5037_v18  ;;  %vm600_vm12 = vcmp.eq.s32.totalorder %v5040_v6, %v3629_v58 }
  0xc1   : > { %v5083_v23 = vand.u32 4294901760, %v5077_v33  ;;  %v1026_v61 = vsel %vm497_vm7, %v3676_v35, %v919_v22  ;;  %1562 = vmatprep.subr.mxu1 %v1561_v8  ;;  %vm704_vm13 = vcmp.eq.s32.totalorder %v5040_v6, %v3632_v59  ;;  %v5102_v42 = vsub.f32 %v4902_v54, %v4912_v7 }
  0xc2   : > { %v1566_v20 = vsub.f32 %v5037_v18, %v7829_v28  ;;  %v5096_v13 = vsel %vm393_vm6, %v3701_v44, %v1026_v61  ;;  %vm391_vm14 = vcmp.eq.s32.totalorder %v5040_v6, %v3622_v57  ;;  %v811_v56 = vsel %vm704_vm13, %v3650_v5, 0.0 }
  0xc3   : > { %7828 = vst [vmem:[#allocation76_spill] sm:$0xff] %v5083_v23  ;;  %7830 = vst [vmem:[#allocation77_spill] sm:$0xff] %v5102_v42  ;;  %1277 = vmatprep.subr.mxu0 %v5083_v23  ;;  %v5108_v19 = vand.u32 4294901760, %v5096_v13  ;;  %vm495_vm15 = vcmp.eq.s32.totalorder %v5040_v6, %v3641_v63  ;;  %v918_v61 = vsel %vm600_vm12, %v3665_v27, %v811_v56  ;;  %v311_v56 = vadd.s32 176, %v3544_v1 }
  0xc4   : > { %v1567_v22 = vand.u32 4294901760, %v1566_v20  ;;  %vm599_vm0 = vcmp.eq.s32.totalorder %v5040_v6, %v3644_v0  ;;  %vm703_vm1 = vcmp.eq.s32.totalorder %v5040_v6, %v3658_v24  ;;  %v1025_v54 = vsel %vm496_vm11, %v3668_v30, %v918_v61 }
  0xc5   : > { %7831 = vst [vmem:[#allocation78_spill] sm:$0xff] %v5108_v19  ;;  %1279 = vmatpush2.msra.mxu0 %v5108_v19  ;;  %v810_v20 = vsel %vm703_vm1, %v3661_v25, 0.0  ;;  %v5127_v28 = vsub.f32 %v4937_v36, %v4945_v16  ;;  %v5134_v8 = vsel %vm392_vm10, %v3694_v40, %v1025_v54  ;;  %v5142_v18 = vsub.f32 %v4961_v43, %v4970_v17 }
  0xc6   : > { %1568 = vmatpush2.msra.mxu1 %v1567_v22  ;;  %v7833_v22 = vand.u32 4294901760, %v5102_v42  ;;  %v917_v61 = vsel %vm599_vm0, %v3671_v31, %v810_v20  ;;  %v5145_v36 = vand.u32 4294901760, %v5134_v8  ;;  %vm390_vm2 = vcmp.eq.s32.totalorder %v311_v56, %v3616_v52 }
  0xc7   : > { %7832 = vst [vmem:[#allocation79_spill] sm:$0xff] %v5127_v28  ;;  %7834 = vst [vmem:[#allocation80_spill] sm:$0xff] %v5142_v18  ;;  %v1024_v16 = vsel %vm495_vm15, %v3676_v35, %v917_v61  ;;  %v7548_v54 = vand.u32 4294901760, %v5127_v28  ;;  %vm494_vm3 = vcmp.eq.s32.totalorder %v311_v56, %v3619_v53  ;;  %vm598_vm4 = vcmp.eq.s32.totalorder %v311_v56, %v3629_v58 }
  0xc8   : > { %v1572_v7 = vsub.f32 %v5102_v42, %v7833_v22  ;;  %7835 = vst [vmem:[#allocation81_spill] sm:$0xff] %v5145_v36  ;;  %v5157_v20 = vsel %vm391_vm14, %v3701_v44, %v1024_v16  ;;  %1281 = vmatprep.subr.mxu0 %v5145_v36  ;;  %vm702_vm5 = vcmp.eq.s32.totalorder %v311_v56, %v3632_v59 }
  0xc9   : > { %v5163_v43 = vand.u32 4294901760, %v5157_v20  ;;  %v1578_v22 = vsub.f32 %v5127_v28, %v7548_v54  ;;  %v809_v16 = vsel %vm702_vm5, %v3650_v5, 0.0  ;;  %vm389_vm6 = vcmp.eq.s32.totalorder %v311_v56, %v3622_v57 }
  0xca   : > { %v1573_v50 = vand.u32 4294901760, %v1572_v7  ;;  %v7553_v7 = vand.u32 4294901760, %v5142_v18  ;;  %vm493_vm7 = vcmp.eq.s32.totalorder %v311_v56, %v3641_v63  ;;  %vm597_vm8 = vcmp.eq.s32.totalorder %v311_v56, %v3644_v0 }
  0xcb   : > { %7836 = vst [vmem:[#allocation82_spill] sm:$0xff] %v5163_v43  ;;  %1283 = vmatpush2.msra.mxu0 %v5163_v43  ;;  %v1579_v6 = vand.u32 4294901760, %v1578_v22  ;;  %v916_v61 = vsel %vm598_vm4, %v3665_v27, %v809_v16  ;;  %vm701_vm9 = vcmp.eq.s32.totalorder %v311_v56, %v3658_v24  ;;  %v5186_v28 = vsub.f32 %v4991_v3, %v4999_v49 }
  0xcc   : > { %1574 = vmatprep.subr.mxu1 %v1573_v50  ;;  %v1584_v54 = vsub.f32 %v5142_v18, %v7553_v7  ;;  %v1023_v50 = vsel %vm494_vm3, %v3668_v30, %v916_v61  ;;  %v808_v17 = vsel %vm701_vm9, %v3661_v25, 0.0  ;;  %v310_v22 = vadd.s32 168, %v3544_v1 }
  0xcd   : > { %7837 = vst [vmem:[#allocation83_spill] sm:$0xff] %v5186_v28  ;;  %1580 = vmatpush2.msra.mxu1 %v1579_v6  ;;  %v5192_v16 = vsel %vm390_vm2, %v3694_v40, %v1023_v50  ;;  %v915_v18 = vsel %vm597_vm8, %v3671_v31, %v808_v17  ;;  %v5197_v61 = vsub.f32 %v5015_v26, %v5023_v37  ;;  %v7558_v6 = vand.u32 4294901760, %v5186_v28 }
  0xce   : > { %v1585_v7 = vand.u32 4294901760, %v1584_v54  ;;  %v5200_v42 = vand.u32 4294901760, %v5192_v16  ;;  %v1022_v3 = vsel %vm493_vm7, %v3676_v35, %v915_v18  ;;  %vm388_vm10 = vcmp.eq.s32.totalorder %v310_v22, %v3616_v52 }
  0xcf   : > { %7838 = vst [vmem:[#allocation84_spill] sm:$0xff] %v5197_v61  ;;  %v5210_v17 = vsel %vm389_vm6, %v3701_v44, %v1022_v3  ;;  %vm492_vm11 = vcmp.eq.s32.totalorder %v310_v22, %v3619_v53  ;;  %vm596_vm12 = vcmp.eq.s32.totalorder %v310_v22, %v3629_v58  ;;  %vm700_vm13 = vcmp.eq.s32.totalorder %v310_v22, %v3632_v59 }
  0xd0   : > { %7839 = vst [vmem:[#allocation85_spill] sm:$0xff] %v5200_v42  ;;  %1586 = vmatprep.subr.mxu1 %v1585_v7  ;;  %1285 = vmatprep.subr.mxu0 %v5200_v42  ;;  %v5217_v26 = vand.u32 4294901760, %v5210_v17  ;;  %v1590_v18 = vsub.f32 %v5186_v28, %v7558_v6  ;;  %v807_v54 = vsel %vm700_vm13, %v3650_v5, 0.0  ;;  %v7563_v56 = vand.u32 4294901760, %v5197_v61 }
  0xd1   : > { %v914_v7 = vsel %vm596_vm12, %v3665_v27, %v807_v54  ;;  %vm387_vm14 = vcmp.eq.s32.totalorder %v310_v22, %v3622_v57  ;;  %vm491_vm15 = vcmp.eq.s32.totalorder %v310_v22, %v3641_v63  ;;  %vm595_vm0 = vcmp.eq.s32.totalorder %v310_v22, %v3644_v0 }
  0xd2   : > { %7840 = vst [vmem:[#allocation86_spill] sm:$0xff] %v5217_v26  ;;  %1287 = vmatpush2.msra.mxu0 %v5217_v26  ;;  %v1591_v50 = vand.u32 4294901760, %v1590_v18  ;;  %v1021_v3 = vsel %vm492_vm11, %v3668_v30, %v914_v7  ;;  %v1596_v6 = vsub.f32 %v5197_v61, %v7563_v56  ;;  %vm699_vm1 = vcmp.eq.s32.totalorder %v310_v22, %v3658_v24 }
  0xd3   : > { %v5237_v54 = vsel %vm388_vm10, %v3694_v40, %v1021_v3  ;;  %v806_v37 = vsel %vm699_vm1, %v3661_v25, 0.0  ;;  %v5242_v49 = vsub.f32 %v5046_v46, %v5052_v38  ;;  %v309_v18 = vadd.s32 160, %v3544_v1 }
  0xd4   : > { %1592 = vmatpush2.msra.mxu1 %v1591_v50  ;;  %v5246_v7 = vand.u32 4294901760, %v5237_v54  ;;  %v1597_v56 = vand.u32 4294901760, %v1596_v6  ;;  %v913_v61 = vsel %vm595_vm0, %v3671_v31, %v806_v37  ;;  %v5251_v28 = vsub.f32 %v5077_v33, %v5083_v23 }
  0xd5   : > { %7841 = vst [vmem:[#allocation87_spill] sm:$0xff] %v5242_v49  ;;  %v1020_v3 = vsel %vm491_vm15, %v3676_v35, %v913_v61  ;;  %v7568_v46 = vand.u32 4294901760, %v5242_v49  ;;  %vm386_vm2 = vcmp.eq.s32.totalorder %v309_v18, %v3616_v52  ;;  %vm490_vm3 = vcmp.eq.s32.totalorder %v309_v18, %v3619_v53 }
  0xd6   : > { %7842 = vst [vmem:[#allocation88_spill] sm:$0xff] %v5246_v7  ;;  %7843 = vst [vmem:[#allocation89_spill] sm:$0xff] %v5251_v28  ;;  %1289 = vmatprep.subr.mxu0 %v5246_v7  ;;  %1598 = vmatprep.subr.mxu1 %v1597_v56  ;;  %v5263_v37 = vsel %vm387_vm14, %v3701_v44, %v1020_v3  ;;  %vm594_vm4 = vcmp.eq.s32.totalorder %v309_v18, %v3629_v58  ;;  %v7569_v33 = vand.u32 4294901760, %v5251_v28 }
  0xd7   : > { %vm698_vm5 = vcmp.eq.s32.totalorder %v309_v18, %v3632_v59  ;;  %v5269_v61 = vand.u32 4294901760, %v5263_v37  ;;  %v1602_v6 = vsub.f32 %v5242_v49, %v7568_v46  ;;  %vm385_vm6 = vcmp.eq.s32.totalorder %v309_v18, %v3622_v57 }
  0xd8   : > { %v805_v56 = vsel %vm698_vm5, %v3650_v5, 0.0  ;;  %v1608_v50 = vsub.f32 %v5251_v28, %v7569_v33  ;;  %vm489_vm7 = vcmp.eq.s32.totalorder %v309_v18, %v3641_v63  ;;  %vm593_vm8 = vcmp.eq.s32.totalorder %v309_v18, %v3644_v0 }
  0xd9   : > { %7844 = vst [vmem:[#allocation90_spill] sm:$0xff] %v5269_v61  ;;  %v912_v22 = vsel %vm594_vm4, %v3665_v27, %v805_v56  ;;  %1291 = vmatpush2.msra.mxu0 %v5269_v61  ;;  %v1603_v3 = vand.u32 4294901760, %v1602_v6  ;;  %vm697_vm9 = vcmp.eq.s32.totalorder %v309_v18, %v3658_v24  ;;  %v5289_v56 = vsub.f32 %v5096_v13, %v5108_v19 }
  0xda   : > { %v1019_v46 = vsel %vm490_vm3, %v3668_v30, %v912_v22  ;;  %v1609_v23 = vand.u32 4294901760, %v1608_v50  ;;  %v804_v38 = vsel %vm697_vm9, %v3661_v25, 0.0  ;;  %v308_v6 = vadd.s32 152, %v3544_v1 }
  0xdb   : > { %7845 = vst [vmem:[#allocation91_spill] sm:$0xff] %v5289_v56  ;;  %v5294_v33 = vsel %vm386_vm2, %v3694_v40, %v1019_v46  ;;  %1604 = vmatpush2.msra.mxu1 %v1603_v3  ;;  %v911_v22 = vsel %vm593_vm8, %v3671_v31, %v804_v38  ;;  %v7578_v49 = vand.u32 4294901760, %v5289_v56  ;;  %v5305_v13 = vsub.f32 %v5134_v8, %v5145_v36 }
  0xdc   : > { %v5299_v28 = vand.u32 4294901760, %v5294_v33  ;;  %1610 = vmatprep.subr.mxu1 %v1609_v23  ;;  %v1018_v46 = vsel %vm489_vm7, %v3676_v35, %v911_v22  ;;  %vm384_vm10 = vcmp.eq.s32.totalorder %v308_v6, %v3616_v52  ;;  %vm488_vm11 = vcmp.eq.s32.totalorder %v308_v6, %v3619_v53 }
  0xdd   : > { %7847 = vst [vmem:[#allocation93_spill] sm:$0xff] %v5305_v13  ;;  %vm592_vm12 = vcmp.eq.s32.totalorder %v308_v6, %v3629_v58  ;;  %v5317_v38 = vsel %vm385_vm6, %v3701_v44, %v1018_v46  ;;  %v1614_v23 = vsub.f32 %v5289_v56, %v7578_v49  ;;  %vm696_vm13 = vcmp.eq.s32.totalorder %v308_v6, %v3632_v59 }
  0xde   : > { %7846 = vst [vmem:[#allocation92_spill] sm:$0xff] %v5299_v28  ;;  %1293 = vmatprep.subr.mxu0 %v5299_v28  ;;  %v7581_v8 = vand.u32 4294901760, %v5305_v13  ;;  %v5325_v50 = vand.u32 4294901760, %v5317_v38  ;;  %v803_v3 = vsel %vm696_vm13, %v3650_v5, 0.0  ;;  %vm383_vm14 = vcmp.eq.s32.totalorder %v308_v6, %v3622_v57 }
  0xdf   : > { %vm487_vm15 = vcmp.eq.s32.totalorder %v308_v6, %v3641_v63  ;;  %v1615_v18 = vand.u32 4294901760, %v1614_v23  ;;  %v910_v22 = vsel %vm592_vm12, %v3665_v27, %v803_v3  ;;  %vm591_vm0 = vcmp.eq.s32.totalorder %v308_v6, %v3644_v0 }
  0xe0   : > { %7848 = vst [vmem:[#allocation94_spill] sm:$0xff] %v5325_v50  ;;  %v1620_v46 = vsub.f32 %v5305_v13, %v7581_v8  ;;  %1295 = vmatpush2.msra.mxu0 %v5325_v50  ;;  %v1017_v49 = vsel %vm488_vm11, %v3668_v30, %v910_v22  ;;  %vm695_vm1 = vcmp.eq.s32.totalorder %v308_v6, %v3658_v24  ;;  %v307_v23 = vadd.s32 144, %v3544_v1 }
  0xe1   : > { %v5342_v36 = vsub.f32 %v5157_v20, %v5163_v43  ;;  %1616 = vmatpush2.msra.mxu1 %v1615_v18  ;;  %v5348_v3 = vsel %vm384_vm10, %v3694_v40, %v1017_v49  ;;  %v802_v19 = vsel %vm695_vm1, %v3661_v25, 0.0  ;;  %v5353_v22 = vsub.f32 %v5192_v16, %v5200_v42 }
  0xe2   : > { %v1621_v8 = vand.u32 4294901760, %v1620_v46  ;;  %v5356_v13 = vand.u32 4294901760, %v5348_v3  ;;  %v909_v20 = vsel %vm591_vm0, %v3671_v31, %v802_v19  ;;  %vm382_vm2 = vcmp.eq.s32.totalorder %v307_v23, %v3616_v52 }
  0xe3   : > { %7849 = vst [vmem:[#allocation95_spill] sm:$0xff] %v5342_v36  ;;  %7850 = vst [vmem:[#allocation96_spill] sm:$0xff] %v5353_v22  ;;  %v7588_v43 = vand.u32 4294901760, %v5342_v36  ;;  %v1016_v49 = vsel %vm487_vm15, %v3676_v35, %v909_v20  ;;  %vm486_vm3 = vcmp.eq.s32.totalorder %v307_v23, %v3619_v53  ;;  %vm590_vm4 = vcmp.eq.s32.totalorder %v307_v23, %v3629_v58 }
  0xe4   : > { %7851 = vst [vmem:[#allocation97_spill] sm:$0xff] %v5356_v13  ;;  %1622 = vmatprep.subr.mxu1 %v1621_v8  ;;  %vm694_vm5 = vcmp.eq.s32.totalorder %v307_v23, %v3632_v59  ;;  %1297 = vmatprep.subr.mxu0 %v5356_v13  ;;  %v5371_v19 = vsel %vm383_vm14, %v3701_v44, %v1016_v49  ;;  %v7589_v18 = vand.u32 4294901760, %v5353_v22 }
  0xe5   : > { %v1626_v16 = vsub.f32 %v5342_v36, %v7588_v43  ;;  %v801_v8 = vsel %vm694_vm5, %v3650_v5, 0.0  ;;  %v5379_v46 = vand.u32 4294901760, %v5371_v19  ;;  %vm381_vm6 = vcmp.eq.s32.totalorder %v307_v23, %v3622_v57 }
  0xe6   : > { %v908_v20 = vsel %vm590_vm4, %v3665_v27, %v801_v8  ;;  %vm485_vm7 = vcmp.eq.s32.totalorder %v307_v23, %v3641_v63  ;;  %v1632_v43 = vsub.f32 %v5353_v22, %v7589_v18  ;;  %vm589_vm8 = vcmp.eq.s32.totalorder %v307_v23, %v3644_v0 }
  0xe7   : > { %7852 = vst [vmem:[#allocation98_spill] sm:$0xff] %v5379_v46  ;;  %v1627_v6 = vand.u32 4294901760, %v1626_v16  ;;  %v1015_v49 = vsel %vm486_vm3, %v3668_v30, %v908_v20  ;;  %1299 = vmatpush2.msra.mxu0 %v5379_v46  ;;  %vm693_vm9 = vcmp.eq.s32.totalorder %v307_v23, %v3658_v24  ;;  %v5399_v16 = vsub.f32 %v5210_v17, %v5217_v26 }
  0xe8   : > { %v5394_v8 = vsel %vm382_vm2, %v3694_v40, %v1015_v49  ;;  %v306_v20 = vadd.s32 136, %v3544_v1  ;;  %v1633_v42 = vand.u32 4294901760, %v1632_v43  ;;  %v800_v22 = vsel %vm693_vm9, %v3661_v25, 0.0 }
  0xe9   : > { %7853 = vst [vmem:[#allocation99_spill] sm:$0xff] %v5399_v16  ;;  %1628 = vmatpush2.msra.mxu1 %v1627_v6  ;;  %v5403_v18 = vand.u32 4294901760, %v5394_v8  ;;  %v5408_v36 = vsub.f32 %v5237_v54, %v5246_v7  ;;  %v907_v49 = vsel %vm589_vm8, %v3671_v31, %v800_v22  ;;  %v7598_v56 = vand.u32 4294901760, %v5399_v16  ;;  %v1182_v7 = vld [vmem:[%s5424_s20 + $0x8] sm:$0xff] }
  0xea   : > { %vm380_vm10 = vcmp.eq.s32.totalorder %v306_v20, %v3616_v52  ;;  %vm484_vm11 = vcmp.eq.s32.totalorder %v306_v20, %v3619_v53  ;;  %1634 = vmatprep.subr.mxu1 %v1633_v42  ;;  %v1014_v43 = vsel %vm485_vm7, %v3676_v35, %v907_v49  ;;  %vm588_vm12 = vcmp.eq.s32.totalorder %v306_v20, %v3629_v58 }
  0xeb   : > { %7854 = vst [vmem:[#allocation100_spill] sm:$0xff] %v5403_v18  ;;  %7855 = vst [vmem:[#allocation101_spill] sm:$0xff] %v5408_v36  ;;  %1301 = vmatprep.subr.mxu0 %v5403_v18  ;;  %vm692_vm13 = vcmp.eq.s32.totalorder %v306_v20, %v3632_v59  ;;  %v7601_v17 = vand.u32 4294901760, %v5408_v36  ;;  %v5429_v42 = vsel %vm381_vm6, %v3701_v44, %v1014_v43 }
  0xec   : > { %v1638_v54 = vsub.f32 %v5399_v16, %v7598_v56  ;;  %v799_v22 = vsel %vm692_vm13, %v3650_v5, 0.0  ;;  %vm379_vm14 = vcmp.eq.s32.totalorder %v306_v20, %v3622_v57  ;;  %v5437_v6 = vand.u32 4294901760, %v5429_v42 }
  0xed   : > { %v906_v49 = vsel %vm588_vm12, %v3665_v27, %v799_v22  ;;  %v1644_v23 = vsub.f32 %v5408_v36, %v7601_v17  ;;  %vm483_vm15 = vcmp.eq.s32.totalorder %v306_v20, %v3641_v63  ;;  %vm587_vm0 = vcmp.eq.s32.totalorder %v306_v20, %v3644_v0 }
  0xee   : > { %7856 = vst [vmem:[#allocation102_spill] sm:$0xff] %v5437_v6  ;;  %v1639_v43 = vand.u32 4294901760, %v1638_v54  ;;  %v1013_v56 = vsel %vm484_vm11, %v3668_v30, %v906_v49  ;;  %vm691_vm1 = vcmp.eq.s32.totalorder %v306_v20, %v3658_v24  ;;  %1303 = vmatpush2.msra.mxu0 %v5437_v6  ;;  %v5459_v54 = vsub.f32 %v5263_v37, %v5269_v61 }
  0xef   : > { %v5454_v22 = vsel %vm380_vm10, %v3694_v40, %v1013_v56  ;;  %v1645_v17 = vand.u32 4294901760, %v1644_v23  ;;  %v798_v26 = vsel %vm691_vm1, %v3661_v25, 0.0  ;;  %v305_v16 = vadd.s32 128, %v3544_v1 }
  0xf0   : > { %7857 = vst [vmem:[#allocation103_spill] sm:$0xff] %v5459_v54  ;;  %1640 = vmatpush2.msra.mxu1 %v1639_v43  ;;  %v5462_v49 = vand.u32 4294901760, %v5454_v22  ;;  %v905_v36 = vsel %vm587_vm0, %v3671_v31, %v798_v26  ;;  %v5468_v39 = vsub.f32 %v5294_v33, %v5299_v28  ;;  %v7610_v37 = vand.u32 4294901760, %v5459_v54 }
  0xf1   : > { %1646 = vmatprep.subr.mxu1 %v1645_v17  ;;  %v1012_v56 = vsel %vm483_vm15, %v3676_v35, %v905_v36  ;;  %v5476_v23 = vsub.f32 %v5317_v38, %v5325_v50  ;;  %v5478_v43 = vand.u32 4294901760, %v1182_v7  ;;  %vm378_vm2 = vcmp.eq.s32.totalorder %v305_v16, %v3616_v52 }
  0xf2   : > { %7858 = vst [vmem:[#allocation104_spill] sm:$0xff] %v5462_v49  ;;  %7859 = vst [vmem:[#allocation105_spill] sm:$0xff] %v5468_v39  ;;  %1305 = vmatprep.subr.mxu0 %v5462_v49  ;;  %v1119_v26 = vsel %vm379_vm14, %v3701_v44, %v1012_v56  ;;  %vm482_vm3 = vcmp.eq.s32.totalorder %v305_v16, %v3619_v53  ;;  %vm586_vm4 = vcmp.eq.s32.totalorder %v305_v16, %v3629_v58 }
  0xf3   : > { %7860 = vst [vmem:[#allocation106_spill] sm:$0xff] %v5478_v43  ;;  %v5487_v36 = vand.u32 4294901760, %v1119_v26  ;;  %v1650_v33 = vsub.f32 %v5459_v54, %v7610_v37  ;;  %vm690_vm5 = vcmp.eq.s32.totalorder %v305_v16, %v3632_v59  ;;  %v7619_v38 = vand.u32 4294901760, %v5468_v39  ;;  %1714 = vmatprep.mubr.f32.mxu1 %v5478_v43 }
  0xf4   : > { %v797_v20 = vsel %vm690_vm5, %v3650_v5, 0.0  ;;  %vm377_vm6 = vcmp.eq.s32.totalorder %v305_v16, %v3622_v57  ;;  %vm481_vm7 = vcmp.eq.s32.totalorder %v305_v16, %v3641_v63  ;;  %vm585_vm8 = vcmp.eq.s32.totalorder %v305_v16, %v3644_v0 }
  0xf5   : > { %7861 = vst [vmem:[#allocation107_spill] sm:$0xff] %v5487_v36  ;;  %1307 = vmatpush2.msra.mxu0 %v5487_v36  ;;  %v1651_v17 = vand.u32 4294901760, %v1650_v33  ;;  %v904_v56 = vsel %vm586_vm4, %v3665_v27, %v797_v20  ;;  %v1656_v37 = vsub.f32 %v5468_v39, %v7619_v38  ;;  %vm689_vm9 = vcmp.eq.s32.totalorder %v305_v16, %v3658_v24  ;;  %v1181_v33 = vld [vmem:[%s5424_s20] sm:$0xff] }
  0xf6   : > { %v1011_v50 = vsel %vm482_vm3, %v3668_v30, %v904_v56  ;;  %v796_v28 = vsel %vm689_vm9, %v3661_v25, 0.0  ;;  %v7626_v61 = vand.u32 4294901760, %v5476_v23  ;;  %v5511_v5 = vsub.f32 %v1182_v7, %v5478_v43 }
  0xf7   : > { %1652 = vmatpush2.msra.mxu1 %v1651_v17  ;;  %v1118_v20 = vsel %vm378_vm2, %v3694_v40, %v1011_v50  ;;  %v1657_v38 = vand.u32 4294901760, %v1656_v37  ;;  %v903_v27 = vsel %vm585_vm8, %v3671_v31, %v796_v28  ;;  %v5532_v28 = vsub.f32 %v5348_v3, %v5356_v13 }
  0xf8   : > { %v5518_v39 = vand.u32 4294901760, %v1118_v20  ;;  %v1010_v56 = vsel %vm481_vm7, %v3676_v35, %v903_v27  ;;  %v1662_v7 = vsub.f32 %v5476_v23, %v7626_v61  ;;  %v7627_v43 = vand.u32 4294901760, %v5511_v5 }
  0xf9   : > { %1658 = vmatprep.subr.mxu1 %v1657_v38  ;;  %v1117_v50 = vsel %vm377_vm6, %v3701_v44, %v1010_v56  ;;  %v5534_v37 = vand.u32 4294901760, %v1181_v33  ;;  %v5544_v38 = vsub.f32 %v5371_v19, %v5379_v46  ;;  %v5552_v56 = vsub.f32 %v5394_v8, %v5403_v18 }
  0xfa   : > { %7862 = vst [vmem:[#allocation108_spill] sm:$0xff] %v5518_v39  ;;  %1309 = vmatprep.subr.mxu0 %v5518_v39  ;;  %v5537_v27 = vand.u32 4294901760, %v1117_v50  ;;  %v1663_v17 = vand.u32 4294901760, %v1662_v7  ;;  %v1315_v61 = vsub.f32 %v5511_v5, %v7627_v43  ;;  %v5556_v7 = vsub.f32 %v5429_v42, %v5437_v6 }
  0xfb   : > { %7863 = vst [vmem:[#allocation109_spill] sm:$0xff] %v5534_v37  ;;  %7865 = vst [vmem:[#allocation111_spill] sm:$0xff] %v5544_v38  ;;  %v5548_v3 = vsub.f32 %v1181_v33, %v5534_v37  ;;  %v7636_v19 = vand.u32 4294901760, %v5544_v38  ;;  %v5562_v16 = vsub.f32 %v5454_v22, %v5462_v49  ;;  %v5565_v33 = vsub.f32 %v1119_v26, %v5487_v36 }
  0xfc   : > { %7864 = vst [vmem:[#allocation110_spill] sm:$0xff] %v5537_v27  ;;  %7866 = vst [vmem:[#allocation112_spill] sm:$0xff] %v5552_v56  ;;  %1311 = vmatpush2.msra.mxu0 %v5537_v27  ;;  %1664 = vmatpush2.msra.mxu1 %v1663_v17  ;;  %v1316_v43 = vand.u32 4294901760, %v1315_v61  ;;  %v7870_v8 = vand.u32 4294901760, %v5532_v28  ;;  %v7645_v17 = vand.u32 4294901760, %v5552_v56  ;;  %v7646_v61 = vand.u32 4294901760, %v5556_v7 }
  0xfd   : > { %7867 = vst [vmem:[#allocation113_spill] sm:$0xff] %v5556_v7  ;;  %7868 = vst [vmem:[#allocation114_spill] sm:$0xff] %v5562_v16  ;;  %1724 = vmatprep.subr.mxu0 %v3861_v51  ;;  %v7641_v42 = vand.u32 4294901760, %v5548_v3  ;;  %v1674_v22 = vsub.f32 %v5544_v38, %v7636_v19  ;;  %v7647_v26 = vand.u32 4294901760, %v5562_v16  ;;  %v5580_v49 = vsub.f32 %v1118_v20, %v5518_v39 }
  0xfe   : > { %7869 = vst [vmem:[#allocation115_spill] sm:$0xff] %v5565_v33  ;;  %v1668_v18 = vsub.f32 %v5532_v28, %v7870_v8  ;;  %1317 = vmatprep.mubr.f32.mxu0 %v1316_v43  ;;  %v1680_v43 = vsub.f32 %v5552_v56, %v7645_v17  ;;  %v1686_v19 = vsub.f32 %v5556_v7, %v7646_v61  ;;  %v7872_v20 = vand.u32 4294901760, %v5565_v33 }
  0xff   : > { %7871 = vst [vmem:[#allocation116_spill] sm:$0xff] %v5580_v49  ;;  %v1321_v6 = vsub.f32 %v5548_v3, %v7641_v42  ;;  %v1675_v46 = vand.u32 4294901760, %v1674_v22  ;;  %v1692_v36 = vsub.f32 %v5562_v16, %v7647_v26  ;;  %v7649_v39 = vand.u32 4294901760, %v5580_v49 }
 0x100   : > { %v1669_v8 = vand.u32 4294901760, %v1668_v18  ;;  %v1698_v18 = vsub.f32 %v5565_v33, %v7872_v20  ;;  %v1681_v51 = vand.u32 4294901760, %v1680_v43  ;;  %v1687_v13 = vand.u32 4294901760, %v1686_v19  ;;  %v7877_v19 = vld [vmem:[#allocation5_spill] sm:$0xff]  ;;  %v7882_v43 = vld [vmem:[#allocation10_spill] sm:$0xff] }
 0x101   : > { %v1322_v42 = vand.u32 4294901760, %v1321_v6  ;;  %v5599_v17 = vsub.f32 %v1117_v50, %v5537_v27  ;;  %v1693_v61 = vand.u32 4294901760, %v1692_v36  ;;  %v1704_v26 = vsub.f32 %v5580_v49, %v7649_v39  ;;  %v7875_v36 = vld [vmem:[#allocation4_spill] sm:$0xff]  ;;  %v7876_v50 = vld [vmem:[#allocation23_spill] sm:$0xff]  ;;  %v7889_v39 = vld [vmem:[#allocation14_spill] sm:$0xff] }
 0x102   : > { %1670 = vmatprep.subr.mxu1 %v1669_v8  ;;  %v1699_v22 = vand.u32 4294901760, %v1698_v18  ;;  %v7881_v8 = vld [vmem:[#allocation8_spill] sm:$0xff]  ;;  %v7883_v18 = vld [vmem:[#allocation29_spill] sm:$0xff] }
 0x103   : > { %7873 = vst [vmem:[#allocation117_spill] sm:$0xff] %v5599_v17  ;;  %1676 = vmatpush2.msra.mxu1 %v1675_v46  ;;  %1323 = vmatmul.mubr.f32.vlgmr.msra.gmra.mxu0 %v1322_v42  ;;  %v7648_v20 = vand.u32 4294901760, %v5599_v17  ;;  %v1705_v6 = vand.u32 4294901760, %v1704_v26  ;;  %v7878_v42 = vld [vmem:[#allocation6_spill] sm:$0xff] }
 0x104   : > { %1682 = vmatprep.subr.mxu1 %v1681_v51  ;;  %1727 = vmatpush1.msra.mxu0 %v3895_v11  ;;  %v7880_v26 = vld [vmem:[#allocation26_spill] sm:$0xff] }
 0x105   : > { %1688 = vmatpush2.msra.mxu1 %v1687_v13  ;;  %1730 = vmatprep.subr.mxu0 %v3923_v45  ;;  %v1710_v46 = vsub.f32 %v5599_v17, %v7648_v20  ;;  %v7874_v13 = vld [vmem:[#allocation20_spill] sm:$0xff] }
 0x106   : > { %1694 = vmatprep.subr.mxu1 %v1693_v61  ;;  %1733 = vmatpush1.msra.mxu0 %v3967_v12  ;;  %v7879_v61 = vld [vmem:[#allocation7_spill] sm:$0xff]  ;;  %v7888_v20 = vld [vmem:[#allocation36_spill] sm:$0xff] }
 0x107   : > { %1700 = vmatpush2.msra.mxu1 %v1699_v22  ;;  %1736 = vmatprep.subr.mxu0 %v3993_v32  ;;  %v1711_v51 = vand.u32 4294901760, %v1710_v46  ;;  %v7884_v22 = vld [vmem:[#allocation11_spill] sm:$0xff]  ;;  %v7886_v46 = vld [vmem:[#allocation33_spill] sm:$0xff] }
 0x108   : > { %1706 = vmatprep.subr.mxu1 %v1705_v6  ;;  %1739 = vmatpush1.msra.mxu0 %v4025_v15  ;;  %v7885_v6 = vld [vmem:[#allocation12_spill] sm:$0xff] }
 0x109   : > { %1916 = vmatprep.mubr.f32.mxu0 %v5511_v5  ;;  %1742 = vmatprep.subr.mxu0 %v4053_v60 }
 0x10a   : > { %1712 = vmatpush2.msra.mxu1 %v1711_v51  ;;  %1745 = vmatpush1.msra.mxu0 %v4079_v62  ;;  %v7887_v51 = vld [vmem:[#allocation13_spill] sm:$0xff] }
 0x10b   : > { %1716 = vmatmul.mubr.f32.vlgmr.msra.gmra.mxu1 %v5534_v37  ;;  %1748 = vmatprep.subr.mxu0 %v4121_v55  ;;  %v7890_v37 = vld [vmem:[#allocation15_spill] sm:$0xff] }
 0x10c   : > { %1926 = vmatprep.subr.mxu1 %v3726_v47  ;;  %1751 = vmatpush1.msra.mxu0 %v4149_v41 }
 0x10d   : > { %1928 = vmatpush1.msra.mxu1 %v3729_v48  ;;  %1754 = vmatprep.subr.mxu0 %v7874_v13 }
 0x10e   : > { %1930 = vmatprep.subr.mxu1 %v7875_v36  ;;  %1757 = vmatpush1.msra.mxu0 %v7876_v50 }
 0x10f   : > { %1932 = vmatpush1.msra.mxu1 %v7877_v19  ;;  %1760 = vmatprep.subr.mxu0 %v4246_v2 }
 0x110   : > { %1934 = vmatprep.subr.mxu1 %v7878_v42  ;;  %1763 = vmatpush1.msra.mxu0 %v4278_v21 }
 0x111   : > { %1936 = vmatpush1.msra.mxu1 %v7879_v61  ;;  %1766 = vmatprep.subr.mxu0 %v7880_v26 }
 0x112   : > { %1938 = vmatprep.subr.mxu1 %v7881_v8  ;;  %1769 = vmatpush1.msra.mxu0 %v4332_v14 }
 0x113   : > { %1940 = vmatpush1.msra.mxu1 %v7882_v43  ;;  %1772 = vmatprep.subr.mxu0 %v7883_v18  ;;  %v7891_v18 = vld [vmem:[#allocation16_spill] sm:$0xff] }
 0x114   : > { %1942 = vmatprep.subr.mxu1 %v7884_v22  ;;  %1775 = vmatpush1.msra.mxu0 %v4402_v34  ;;  %v7892_v22 = vld [vmem:[#allocation41_spill] sm:$0xff] }
 0x115   : > { %1944 = vmatpush1.msra.mxu1 %v7885_v6  ;;  %1778 = vmatprep.subr.mxu0 %v7886_v46  ;;  %v7893_v34 = vld [vmem:[#allocation17_spill] sm:$0xff]  ;;  %v7894_v6 = vld [vmem:[#allocation43_spill] sm:$0xff]  ;;  %v7895_v46 = vld [vmem:[#allocation18_spill] sm:$0xff] }
 0x116   : > { %1946 = vmatprep.subr.mxu1 %v7887_v51  ;;  %1781 = vmatpush1.msra.mxu0 %v7888_v20  ;;  %v7896_v51 = vld [vmem:[#allocation45_spill] sm:$0xff]  ;;  %v7897_v20 = vld [vmem:[#allocation19_spill] sm:$0xff] }
 0x117   : > { %1948 = vmatpush1.msra.mxu1 %v7889_v39  ;;  %1784 = vmatprep.subr.mxu0 %v4499_v9  ;;  %v7898_v9 = vld [vmem:[#allocation21_spill] sm:$0xff]  ;;  %v7956_v39 = vld [vmem:[#allocation76_spill] sm:$0xff] }
 0x118   : > { %1950 = vmatprep.subr.mxu1 %v7890_v37  ;;  %1787 = vmatpush1.msra.mxu0 %v4531_v29  ;;  %v7899_v37 = vld [vmem:[#allocation49_spill] sm:$0xff]  ;;  %v7900_v29 = vld [vmem:[#allocation22_spill] sm:$0xff] }
 0x119   : > { %1952 = vmatpush1.msra.mxu1 %v7891_v18  ;;  %1790 = vmatprep.subr.mxu0 %v7892_v22  ;;  %v7901_v18 = vld [vmem:[#allocation52_spill] sm:$0xff] }
 0x11a   : > { %1954 = vmatprep.subr.mxu1 %v7893_v34  ;;  %1793 = vmatpush1.msra.mxu0 %v7894_v6  ;;  %v7902_v22 = vld [vmem:[#allocation24_spill] sm:$0xff]  ;;  %v7903_v6 = vld [vmem:[#allocation25_spill] sm:$0xff] }
 0x11b   : > { %1956 = vmatpush1.msra.mxu1 %v7895_v46  ;;  %1796 = vmatprep.subr.mxu0 %v7896_v51  ;;  %v7904_v46 = vld [vmem:[#allocation55_spill] sm:$0xff]  ;;  %v7955_v34 = vld [vmem:[#allocation105_spill] sm:$0xff] }
 0x11c   : > { %1958 = vmatprep.subr.mxu1 %v7897_v20  ;;  %1799 = vmatpush1.msra.mxu0 %v4655_v10  ;;  %v7905_v51 = vld [vmem:[#allocation27_spill] sm:$0xff]  ;;  %v7906_v20 = vld [vmem:[#allocation57_spill] sm:$0xff]  ;;  %v7907_v10 = vld [vmem:[#allocation28_spill] sm:$0xff] }
 0x11d   : > { %1960 = vmatpush1.msra.mxu1 %v7898_v9  ;;  %1802 = vmatprep.subr.mxu0 %v7899_v37  ;;  %v7908_v9 = vld [vmem:[#allocation59_spill] sm:$0xff]  ;;  %v7909_v37 = vld [vmem:[#allocation30_spill] sm:$0xff] }
 0x11e   : > { %1962 = vmatprep.subr.mxu1 %v7900_v29  ;;  %1805 = vmatpush1.msra.mxu0 %v7901_v18  ;;  %v7910_v29 = vld [vmem:[#allocation61_spill] sm:$0xff]  ;;  %v7911_v18 = vld [vmem:[#allocation32_spill] sm:$0xff] }
 0x11f   : > { %1964 = vmatpush1.msra.mxu1 %v7902_v22  ;;  %1808 = vmatprep.subr.mxu0 %v4752_v4  ;;  %v7912_v22 = vld [vmem:[#allocation63_spill] sm:$0xff]  ;;  %v7913_v4 = vld [vmem:[#allocation34_spill] sm:$0xff] }
 0x120   : > { %1966 = vmatprep.subr.mxu1 %v7903_v6  ;;  %1811 = vmatpush1.msra.mxu0 %v7904_v46  ;;  %v7914_v6 = vld [vmem:[#allocation65_spill] sm:$0xff]  ;;  %v7915_v46 = vld [vmem:[#allocation35_spill] sm:$0xff] }
 0x121   : > { %1968 = vmatpush1.msra.mxu1 %v7905_v51  ;;  %1814 = vmatprep.subr.mxu0 %v7906_v20  ;;  %v7916_v51 = vld [vmem:[#allocation67_spill] sm:$0xff]  ;;  %v7917_v20 = vld [vmem:[#allocation38_spill] sm:$0xff] }
 0x122   : > { %1970 = vmatprep.subr.mxu1 %v7907_v10  ;;  %1817 = vmatpush1.msra.mxu0 %v7908_v9  ;;  %v7918_v10 = vld [vmem:[#allocation69_spill] sm:$0xff]  ;;  %v7919_v9 = vld [vmem:[#allocation40_spill] sm:$0xff] }
 0x123   : > { %1972 = vmatpush1.msra.mxu1 %v7909_v37  ;;  %1820 = vmatprep.subr.mxu0 %v7910_v29  ;;  %v7920_v37 = vld [vmem:[#allocation71_spill] sm:$0xff]  ;;  %v7921_v29 = vld [vmem:[#allocation42_spill] sm:$0xff] }
 0x124   : > { %1974 = vmatprep.subr.mxu1 %v7911_v18  ;;  %1823 = vmatpush2.msra.mxu0 %v7912_v22  ;;  %v7922_v18 = vld [vmem:[#allocation73_spill] sm:$0xff]  ;;  %v7923_v22 = vld [vmem:[#allocation44_spill] sm:$0xff] }
 0x125   : > { %1976 = vmatpush1.msra.mxu1 %v7913_v4  ;;  %1826 = vmatprep.subr.mxu0 %v7914_v6  ;;  %v7924_v4 = vld [vmem:[#allocation74_spill] sm:$0xff] }
 0x126   : > { %1978 = vmatprep.subr.mxu1 %v7915_v46  ;;  %1829 = vmatpush2.msra.mxu0 %v7916_v51  ;;  %v7925_v6 = vld [vmem:[#allocation46_spill] sm:$0xff]  ;;  %v7926_v46 = vld [vmem:[#allocation77_spill] sm:$0xff]  ;;  %v7927_v51 = vld [vmem:[#allocation48_spill] sm:$0xff] }
 0x127   : > { %1980 = vmatpush1.msra.mxu1 %v7917_v20  ;;  %1832 = vmatprep.subr.mxu0 %v7918_v10  ;;  %v7928_v20 = vld [vmem:[#allocation79_spill] sm:$0xff]  ;;  %v7929_v10 = vld [vmem:[#allocation50_spill] sm:$0xff] }
 0x128   : > { %1982 = vmatprep.subr.mxu1 %v7919_v9  ;;  %1835 = vmatpush2.msra.mxu0 %v7920_v37  ;;  %v7930_v37 = vld [vmem:[#allocation80_spill] sm:$0xff] }
 0x129   : > { %1984 = vmatpush1.msra.mxu1 %v7921_v29  ;;  %1838 = vmatprep.subr.mxu0 %v7922_v18  ;;  %v7931_v29 = vld [vmem:[#allocation51_spill] sm:$0xff]  ;;  %v7943_v9 = vld [vmem:[#allocation64_spill] sm:$0xff] }
 0x12a   : > { %1986 = vmatprep.subr.mxu1 %v7923_v22  ;;  %1841 = vmatpush2.msra.mxu0 %v7924_v4  ;;  %v7932_v18 = vld [vmem:[#allocation83_spill] sm:$0xff]  ;;  %v7933_v22 = vld [vmem:[#allocation54_spill] sm:$0xff]  ;;  %v7934_v4 = vld [vmem:[#allocation84_spill] sm:$0xff] }
 0x12b   : > { %1988 = vmatpush1.msra.mxu1 %v7925_v6  ;;  %1844 = vmatprep.subr.mxu0 %v7926_v46  ;;  %v7935_v6 = vld [vmem:[#allocation56_spill] sm:$0xff]  ;;  %v5692_v46 = vadd.s32 376, %v3544_v1 }
 0x12c   : > { %1990 = vmatprep.subr.mxu1 %v7927_v51  ;;  %1847 = vmatpush2.msra.mxu0 %v7928_v20  ;;  %v7936_v51 = vld [vmem:[#allocation87_spill] sm:$0xff]  ;;  %v7937_v20 = vld [vmem:[#allocation58_spill] sm:$0xff] }
 0x12d   : > { %1992 = vmatpush2.msra.mxu1 %v7929_v10  ;;  %1850 = vmatprep.subr.mxu0 %v7930_v37  ;;  %v7938_v10 = vld [vmem:[#allocation89_spill] sm:$0xff]  ;;  %v7939_v37 = vld [vmem:[#allocation60_spill] sm:$0xff]  ;;  %vm751_vm10 = vcmp.eq.s32.totalorder %v5692_v46, %v3658_v24  ;;  %vm752_vm11 = vcmp.eq.s32.totalorder %v5692_v46, %v3632_v59  ;;  %vm647_vm12 = vcmp.eq.s32.totalorder %v5692_v46, %v3644_v0 }
 0x12e   : > { %1994 = vmatprep.subr.mxu1 %v7931_v29  ;;  %1853 = vmatpush2.msra.mxu0 %v7932_v18  ;;  %v7940_v29 = vld [vmem:[#allocation91_spill] sm:$0xff]  ;;  %v7941_v18 = vld [vmem:[#allocation62_spill] sm:$0xff]  ;;  %vm648_vm14 = vcmp.eq.s32.totalorder %v5692_v46, %v3629_v58  ;;  %vm543_vm15 = vcmp.eq.s32.totalorder %v5692_v46, %v3641_v63  ;;  %vm544_vm1 = vcmp.eq.s32.totalorder %v5692_v46, %v3619_v53 }
 0x12f   : > { %1996 = vmatpush2.msra.mxu1 %v7933_v22  ;;  %1856 = vmatprep.subr.mxu0 %v7934_v4  ;;  %v5701_v22 = vadd.s32 368, %v3544_v1  ;;  %v1183_v4 = vld [vmem:[%s5424_s20 + $0x10] sm:$0xff]  ;;  %vm439_vm3 = vcmp.eq.s32.totalorder %v5692_v46, %v3622_v57  ;;  %vm440_vm6 = vcmp.eq.s32.totalorder %v5692_v46, %v3616_v52 }
 0x130   : > { %1998 = vmatprep.subr.mxu1 %v7935_v6  ;;  %1859 = vmatpush2.msra.mxu0 %v7936_v51  ;;  %v7942_v6 = vld [vmem:[#allocation93_spill] sm:$0xff]  ;;  %v7949_v51 = vld [vmem:[#allocation99_spill] sm:$0xff] }
 0x131   : > { %2000 = vmatpush2.msra.mxu1 %v7937_v20  ;;  %1862 = vmatprep.subr.mxu0 %v7938_v10  ;;  %v7944_v20 = vld [vmem:[#allocation95_spill] sm:$0xff]  ;;  %v7945_v10 = vld [vmem:[#allocation66_spill] sm:$0xff]  ;;  %vm749_vm13 = vcmp.eq.s32.totalorder %v5701_v22, %v3658_v24  ;;  %vm645_vm0 = vcmp.eq.s32.totalorder %v5701_v22, %v3644_v0  ;;  %vm750_vm2 = vcmp.eq.s32.totalorder %v5701_v22, %v3632_v59 }
 0x132   : > { %2002 = vmatprep.subr.mxu1 %v7939_v37  ;;  %1865 = vmatpush2.msra.mxu0 %v7940_v29  ;;  %v7946_v37 = vld [vmem:[#allocation96_spill] sm:$0xff]  ;;  %vm541_vm5 = vcmp.eq.s32.totalorder %v5701_v22, %v3641_v63  ;;  %vm646_vm7 = vcmp.eq.s32.totalorder %v5701_v22, %v3629_v58 }
 0x133   : > { %2004 = vmatpush2.msra.mxu1 %v7941_v18  ;;  %1868 = vmatprep.subr.mxu0 %v7942_v6  ;;  %v7947_v29 = vld [vmem:[#allocation68_spill] sm:$0xff]  ;;  %v5714_v18 = vand.u32 4294901760, %v1183_v4  ;;  %v7950_v6 = vld [vmem:[#allocation70_spill] sm:$0xff] }
 0x134   : > { %2006 = vmatprep.subr.mxu1 %v7943_v9  ;;  %1871 = vmatpush2.msra.mxu0 %v7944_v20  ;;  %v858_v20 = vsel %vm751_vm10, %v3661_v25, 0.0  ;;  %vm437_vm10 = vcmp.eq.s32.totalorder %v5701_v22, %v3622_v57 }
 0x135   : > { %2008 = vmatpush2.msra.mxu1 %v7945_v10  ;;  %1874 = vmatprep.subr.mxu0 %v7946_v37  ;;  %7948 = vst [vmem:[#allocation20_spill] sm:$0xff] %v5714_v18  ;;  %v7951_v37 = vld [vmem:[#allocation101_spill] sm:$0xff]  ;;  %v5726_v10 = vadd.s32 360, %v3544_v1 }
 0x136   : > { %2010 = vmatprep.subr.mxu1 %v7947_v29  ;;  %1877 = vmatpush2.msra.mxu0 %v7949_v51  ;;  %v7952_v29 = vld [vmem:[#allocation72_spill] sm:$0xff]  ;;  %v7953_v51 = vld [vmem:[#allocation75_spill] sm:$0xff] }
 0x137   : > { %2012 = vmatpush2.msra.mxu1 %v7950_v6  ;;  %1880 = vmatprep.subr.mxu0 %v7951_v37  ;;  %v7954_v6 = vld [vmem:[#allocation2_spill] sm:$0xff]  ;;  %vm747_vm4 = vcmp.eq.s32.totalorder %v5726_v10, %v3658_v24  ;;  %vm748_vm8 = vcmp.eq.s32.totalorder %v5726_v10, %v3632_v59  ;;  %vm643_vm9 = vcmp.eq.s32.totalorder %v5726_v10, %v3644_v0 }
 0x138   : > { %2014 = vmatprep.subr.mxu1 %v7952_v29  ;;  %1883 = vmatpush2.msra.mxu0 %v5459_v54  ;;  %v859_v9 = vsel %vm752_vm11, %v7954_v6, 0.0  ;;  %v965_v29 = vsel %vm647_vm12, %v3671_v31, %v858_v20  ;;  %v856_v54 = vsel %vm749_vm13, %v3661_v25, 0.0  ;;  %v7958_v37 = vld [vmem:[#allocation78_spill] sm:$0xff]  ;;  %v7959_v20 = vld [vmem:[#allocation81_spill] sm:$0xff]  ;;  %vm438_vm11 = vcmp.eq.s32.totalorder %v5701_v22, %v3616_v52 }
 0x139   : > { %2016 = vmatpush2.msra.mxu1 %v7953_v51  ;;  %1886 = vmatprep.subr.mxu0 %v7955_v34  ;;  %v5742_v51 = vsub.f32 %v1183_v4, %v5714_v18  ;;  %v7961_v4 = vld [vmem:[#allocation82_spill] sm:$0xff]  ;;  %v1072_v18 = vsel %vm543_vm15, %v3676_v35, %v965_v29  ;;  %v857_v29 = vsel %vm750_vm2, %v7954_v6, 0.0  ;;  %vm542_vm12 = vcmp.eq.s32.totalorder %v5701_v22, %v3619_v53 }
 0x13a   : > { %2018 = vmatprep.subr.mxu1 %v7956_v39  ;;  %1889 = vmatpush2.msra.mxu0 %v5476_v23  ;;  %v7960_v39 = vld [vmem:[#allocation3_spill] sm:$0xff]  ;;  %vm644_vm13 = vcmp.eq.s32.totalorder %v5726_v10, %v3629_v58  ;;  %vm435_vm2 = vcmp.eq.s32.totalorder %v5726_v10, %v3622_v57 }
 0x13b   : > { %7957 = vst [vmem:[#allocation4_spill] sm:$0xff] %v5742_v51  ;;  %2020 = vmatpush2.msra.mxu1 %v7958_v37  ;;  %1892 = vmatprep.subr.mxu0 %v5532_v28  ;;  %v966_v34 = vsel %vm648_vm14, %v7960_v39, %v859_v9  ;;  %v963_v9 = vsel %vm645_vm0, %v3671_v31, %v856_v54  ;;  %v7962_v51 = vld [vmem:[#allocation85_spill] sm:$0xff] }
 0x13c   : > { %2022 = vmatprep.subr.mxu1 %v7959_v20  ;;  %1895 = vmatpush2.msra.mxu0 %v5544_v38  ;;  %v7963_v38 = vld [vmem:[#allocation86_spill] sm:$0xff]  ;;  %v1073_v54 = vsel %vm544_vm1, %v3668_v30, %v966_v34  ;;  %v1179_v34 = vsel %vm439_vm3, %v3701_v44, %v1072_v18  ;;  %v964_v18 = vsel %vm646_vm7, %v7960_v39, %v857_v29 }
 0x13d   : > { %2024 = vmatpush2.msra.mxu1 %v7961_v4  ;;  %1898 = vmatprep.subr.mxu0 %v5552_v56  ;;  %v5777_v4 = vadd.s32 352, %v3544_v1  ;;  %v7965_v56 = vld [vmem:[#allocation90_spill] sm:$0xff]  ;;  %vm539_vm14 = vcmp.eq.s32.totalorder %v5726_v10, %v3641_v63  ;;  %v1071_v46 = vsel %vm542_vm12, %v3668_v30, %v964_v18  ;;  %vm436_vm0 = vcmp.eq.s32.totalorder %v5726_v10, %v3616_v52 }
 0x13e   : > { %2026 = vmatprep.subr.mxu1 %v7962_v51  ;;  %1901 = vmatpush2.msra.mxu0 %v5556_v7  ;;  %v854_v51 = vsel %vm747_vm4, %v3661_v25, 0.0  ;;  %v7964_v7 = vld [vmem:[#allocation88_spill] sm:$0xff]  ;;  %vm540_vm1 = vcmp.eq.s32.totalorder %v5726_v10, %v3619_v53 }
 0x13f   : > { %2028 = vmatpush2.msra.mxu1 %v7963_v38  ;;  %1904 = vmatprep.subr.mxu0 %v5562_v16  ;;  %v1070_v38 = vsel %vm541_vm5, %v3676_v35, %v963_v9  ;;  %v855_v9 = vsel %vm748_vm8, %v7954_v6, 0.0  ;;  %v961_v29 = vsel %vm643_vm9, %v3671_v31, %v854_v51  ;;  %vm745_vm15 = vcmp.eq.s32.totalorder %v5777_v4, %v3658_v24  ;;  %v7968_v51 = vld [vmem:[#allocation97_spill] sm:$0xff] }
 0x140   : > { %2030 = vmatprep.subr.mxu1 %v7964_v7  ;;  %1907 = vmatpush2.msra.mxu0 %v5565_v33  ;;  %v7966_v7 = vld [vmem:[#allocation92_spill] sm:$0xff]  ;;  %v1177_v33 = vsel %vm437_vm10, %v3701_v44, %v1070_v38  ;;  %v5854_v38 = vadd.s32 344, %v3544_v1  ;;  %v1068_v18 = vsel %vm539_vm14, %v3676_v35, %v961_v29  ;;  %v7972_v16 = vand.u32 4294901760, %v3895_v11  ;;  %v7975_v11 = vld [vmem:[#allocation102_spill] sm:$0xff] }
 0x141   : > { %2032 = vmatpush2.msra.mxu1 %v7965_v56  ;;  %1910 = vmatprep.subr.mxu0 %v5580_v49  ;;  %v7967_v49 = vld [vmem:[#allocation94_spill] sm:$0xff]  ;;  %v5835_v56 = vand.u32 4294901760, %v1179_v34  ;;  %vm746_vm3 = vcmp.eq.s32.totalorder %v5777_v4, %v3632_v59  ;;  %vm641_vm4 = vcmp.eq.s32.totalorder %v5777_v4, %v3644_v0  ;;  %v7974_v29 = vand.u32 4294901760, %v3923_v45 }
 0x142   : > { %2034 = vmatprep.subr.mxu1 %v7966_v7  ;;  %1913 = vmatpush2.msra.mxu0 %v5599_v17  ;;  %v1180_v7 = vsel %vm440_vm6, %v3694_v40, %v1073_v54  ;;  %v7969_v54 = vld [vmem:[#allocation9_spill] sm:$0xff]  ;;  %v7971_v17 = vld [vmem:[#allocation98_spill] sm:$0xff]  ;;  %vm434_vm5 = vcmp.eq.s32.totalorder %v5777_v4, %v3616_v52  ;;  %v7977_v45 = vand.u32 4294901760, %v3967_v12  ;;  %vm744_vm6 = vcmp.eq.s32.totalorder %v5854_v38, %v3632_v59 }
 0x143   : > { %2036 = vmatpush2.msra.mxu1 %v7967_v49  ;;  %1919 = vmatmul.mubr.f32.vlgmr.msra.gmra.mxu0 %v5548_v3  ;;  %v7970_v49 = vand.u32 4294901760, %v7969_v54  ;;  %v7973_v54 = vld [vmem:[#allocation100_spill] sm:$0xff]  ;;  %v7979_v12 = vand.u32 4294901760, %v3993_v32  ;;  %vm642_vm7 = vcmp.eq.s32.totalorder %v5777_v4, %v3629_v58  ;;  %vm537_vm8 = vcmp.eq.s32.totalorder %v5777_v4, %v3641_v63 }
 0x144   : > { %2038 = vmatprep.subr.mxu1 %v7968_v51  ;;  %v962_v51 = vsel %vm644_vm13, %v7960_v39, %v855_v9  ;;  %v852_v9 = vsel %vm745_vm15, %v3661_v25, 0.0  ;;  %v7981_v32 = vand.u32 4294901760, %v4025_v15  ;;  %vm538_vm9 = vcmp.eq.s32.totalorder %v5777_v4, %v3619_v53 }
 0x145   : > { %2069 = vmatprep.subr.mxu0 %v7970_v49  ;;  %2040 = vmatpush2.msra.mxu1 %v7971_v17  ;;  %v5872_v49 = vand.u32 4294901760, %v1177_v33  ;;  %v5897_v17 = vadd.s32 336, %v3544_v1  ;;  %v1069_v22 = vsel %vm540_vm1, %v3668_v30, %v962_v51  ;;  %v853_v51 = vsel %vm746_vm3, %v7954_v6, 0.0 }
 0x146   : > { %2073 = vmatpush1.msra.mxu0 %v7972_v16  ;;  %2042 = vmatprep.subr.mxu1 %v7973_v54  ;;  %v5886_v16 = vsub.f32 %v1179_v34, %v5835_v56  ;;  %v5892_v54 = vsel %vm438_vm11, %v3694_v40, %v1071_v46  ;;  %v1175_v34 = vsel %vm435_vm2, %v3701_v44, %v1068_v18  ;;  %v7980_v46 = vld [vmem:[#allocation107_spill] sm:$0xff]  ;;  %v851_v15 = vsel %vm744_vm6, %v7954_v6, 0.0 }
 0x147   : > { %2077 = vmatprep.subr.mxu0 %v7974_v29  ;;  %2044 = vmatpush2.msra.mxu1 %v7975_v11  ;;  %v7978_v29 = vld [vmem:[#allocation104_spill] sm:$0xff]  ;;  %v5902_v11 = vand.u32 4294901760, %v1180_v7  ;;  %v959_v18 = vsel %vm641_vm4, %v3671_v31, %v852_v9  ;;  %vm433_vm10 = vcmp.eq.s32.totalorder %v5777_v4, %v3622_v57  ;;  %v5942_v9 = vand.u32 4294901760, %v1175_v34 }
 0x148   : > { %7976 = vst [vmem:[#allocation23_spill] sm:$0xff] %v5886_v16  ;;  %2081 = vmatpush1.msra.mxu0 %v7977_v45  ;;  %2046 = vmatprep.subr.mxu1 %v7978_v29  ;;  %v7982_v45 = vld [vmem:[#allocation108_spill] sm:$0xff]  ;;  %vm640_vm11 = vcmp.eq.s32.totalorder %v5854_v38, %v3629_v58  ;;  %vm743_vm12 = vcmp.eq.s32.totalorder %v5854_v38, %v3658_v24 }
 0x149   : > { %2085 = vmatprep.subr.mxu0 %v7979_v12  ;;  %2048 = vmatpush2.msra.mxu1 %v7980_v46  ;;  %v5933_v12 = vsub.f32 %v1177_v33, %v5872_v49  ;;  %v7984_v46 = vand.u32 4294901760, %v4053_v60  ;;  %v7985_v33 = vand.u32 4294901760, %v5511_v5  ;;  %v7986_v60 = vand.u32 4294901760, %v4079_v62 }
 0x14a   : > { %2089 = vmatpush1.msra.mxu0 %v7981_v32  ;;  %2050 = vmatprep.subr.mxu1 %v7982_v45  ;;  %v1066_v32 = vsel %vm537_vm8, %v3676_v35, %v959_v18  ;;  %v7988_v45 = vand.u32 4294901760, %v5548_v3  ;;  %v7989_v5 = vand.u32 4294901760, %v4121_v55  ;;  %v5975_v62 = vsel %vm436_vm0, %v3694_v40, %v1069_v22 }
 0x14b   : > { %7983 = vst [vmem:[#allocation5_spill] sm:$0xff] %v5933_v12  ;;  %2093 = vmatprep.subr.mxu0 %v7984_v46  ;;  %2052 = vmatpush2.msra.mxu1 %v5537_v27  ;;  %v960_v46 = vsel %vm642_vm7, %v7960_v39, %v853_v51  ;;  %v5965_v27 = vsub.f32 %v1180_v7, %v5902_v11  ;;  %v7669_v51 = vand.u32 4294901760, %v5886_v16  ;;  %v7990_v3 = vand.u32 4294901760, %v4149_v41 }
 0x14c   : > { %2056 = vmatprep.mubr.f32.mxu1 %v7985_v33  ;;  %2097 = vmatpush1.msra.mxu0 %v7986_v60  ;;  %vm432_vm13 = vcmp.eq.s32.totalorder %v5854_v38, %v3616_v52  ;;  %vm741_vm14 = vcmp.eq.s32.totalorder %v5897_v17, %v3658_v24  ;;  %vm536_vm15 = vcmp.eq.s32.totalorder %v5854_v38, %v3619_v53  ;;  %v850_v10 = vsel %vm743_vm12, %v3661_v25, 0.0 }
 0x14d   : > { %7987 = vst [vmem:[#allocation6_spill] sm:$0xff] %v5965_v27  ;;  %2060 = vmatmul.mubr.f32.vlgmr.msra.gmra.mxu1 %v7988_v45  ;;  %2101 = vmatprep.subr.mxu0 %v7989_v5  ;;  %v958_v55 = vsel %vm640_vm11, %v7960_v39, %v851_v15  ;;  %vm639_vm0 = vcmp.eq.s32.totalorder %v5854_v38, %v3644_v0  ;;  %v6012_v18 = vadd.s32 328, %v3544_v1 }
 0x14e   : > { %2332 = vmatprep.subr.mxu1 %v3726_v47  ;;  %2105 = vmatpush1.msra.mxu0 %v7990_v3  ;;  %v7991_v47 = vand.u32 4294901760, %v7874_v13  ;;  %v6001_v41 = vsub.f32 %v1175_v34, %v5942_v9  ;;  %v1067_v7 = vsel %vm538_vm9, %v3668_v30, %v960_v46  ;;  %v1173_v22 = vsel %vm433_vm10, %v3701_v44, %v1066_v32 }
 0x14f   : > { %2334 = vmatpush1.msra.mxu1 %v3729_v48  ;;  %v7993_v48 = vand.u32 4294901760, %v7876_v50  ;;  %v7670_v13 = vand.u32 4294901760, %v5965_v27  ;;  %vm742_vm1 = vcmp.eq.s32.totalorder %v5897_v17, %v3632_v59  ;;  %vm637_vm2 = vcmp.eq.s32.totalorder %v5897_v17, %v3644_v0 }
 0x150   : > { %2109 = vmatprep.subr.mxu0 %v7991_v47  ;;  %7992 = vst [vmem:[#allocation7_spill] sm:$0xff] %v6001_v41  ;;  %2336 = vmatprep.subr.mxu1 %v7875_v36  ;;  %v848_v34 = vsel %vm741_vm14, %v3661_v25, 0.0  ;;  %v7994_v36 = vand.u32 4294901760, %v4246_v2  ;;  %v6030_v50 = vand.u32 4294901760, %v5892_v54  ;;  %v1065_v45 = vsel %vm536_vm15, %v3668_v30, %v958_v55  ;;  %v8002_v47 = vld [vmem:[#allocation31_spill] sm:$0xff] }
 0x151   : > { %2113 = vmatpush1.msra.mxu0 %v7993_v48  ;;  %2338 = vmatpush1.msra.mxu1 %v7877_v19  ;;  %vm535_vm3 = vcmp.eq.s32.totalorder %v5854_v38, %v3641_v63  ;;  %v957_v15 = vsel %vm639_vm0, %v3671_v31, %v850_v10  ;;  %v7995_v2 = vand.u32 4294901760, %v4278_v21  ;;  %v6049_v19 = vsel %vm434_vm5, %v3694_v40, %v1067_v7  ;;  %v8001_v10 = vld [vmem:[#allocation11_spill] sm:$0xff] }
 0x152   : > { %2117 = vmatprep.subr.mxu0 %v7994_v36  ;;  %2340 = vmatprep.subr.mxu1 %v7878_v42  ;;  %v6051_v33 = vand.u32 4294901760, %v1173_v22  ;;  %vm431_vm4 = vcmp.eq.s32.totalorder %v5854_v38, %v3622_v57  ;;  %v6058_v60 = vsub.f32 %v5886_v16, %v7669_v51  ;;  %v7996_v21 = vand.u32 4294901760, %v7880_v26  ;;  %v8005_v36 = vld [vmem:[#allocation33_spill] sm:$0xff]  ;;  %v8011_v38 = vld [vmem:[#allocation14_spill] sm:$0xff]  ;;  %v8067_v16 = vld [vmem:[#allocation35_spill] sm:$0xff] }
 0x153   : > { %2121 = vmatpush1.msra.mxu0 %v7995_v2  ;;  %2342 = vmatpush1.msra.mxu1 %v7879_v61  ;;  %vm638_vm6 = vcmp.eq.s32.totalorder %v5897_v17, %v3629_v58  ;;  %v849_v42 = vsel %vm742_vm1, %v7954_v6, 0.0  ;;  %vm533_vm5 = vcmp.eq.s32.totalorder %v5897_v17, %v3641_v63  ;;  %v955_v4 = vsel %vm637_vm2, %v3671_v31, %v848_v34  ;;  %v8004_v34 = vld [vmem:[#allocation12_spill] sm:$0xff] }
 0x154   : > { %2125 = vmatprep.subr.mxu0 %v7996_v21  ;;  %2344 = vmatprep.subr.mxu1 %v7881_v8  ;;  %v7997_v61 = vand.u32 4294901760, %v4332_v14  ;;  %v6082_v26 = vsel %vm432_vm13, %v3694_v40, %v1065_v45  ;;  %v6087_v46 = vsub.f32 %v5965_v27, %v7670_v13  ;;  %v1064_v32 = vsel %vm535_vm3, %v3676_v35, %v957_v15  ;;  %v7998_v14 = vld [vmem:[#allocation29_spill] sm:$0xff]  ;;  %v8026_v13 = vld [vmem:[#allocation18_spill] sm:$0xff] }
 0x155   : > { %v6094_v8 = vadd.s32 320, %v3544_v1  ;;  %2346 = vmatpush1.msra.mxu1 %v7882_v43  ;;  %v7999_v5 = vand.u32 4294901760, %v7998_v14  ;;  %v6100_v3 = vand.u32 4294901760, %v5975_v62  ;;  %vm534_vm7 = vcmp.eq.s32.totalorder %v5897_v17, %v3619_v53 }
 0x156   : > { %2129 = vmatpush1.msra.mxu0 %v7997_v61  ;;  %v6106_v55 = vsub.f32 %v5892_v54, %v6030_v50  ;;  %vm740_vm8 = vcmp.eq.s32.totalorder %v6012_v18, %v3632_v59  ;;  %2348 = vmatprep.subr.mxu1 %v8001_v10  ;;  %v8003_v43 = vand.u32 4294901760, %v8002_v47  ;;  %v956_v7 = vsel %vm638_vm6, %v7960_v39, %v849_v42  ;;  %v8009_v61 = vld [vmem:[#allocation36_spill] sm:$0xff]  ;;  %v8032_v47 = vld [vmem:[#allocation21_spill] sm:$0xff] }
 0x157   : > { %2133 = vmatprep.subr.mxu0 %v7999_v5  ;;  %vm429_vm9 = vcmp.eq.s32.totalorder %v5897_v17, %v3622_v57  ;;  %v1062_v54 = vsel %vm533_vm5, %v3676_v35, %v955_v4  ;;  %v7671_v48 = vand.u32 4294901760, %v5933_v12  ;;  %2350 = vmatpush1.msra.mxu1 %v8004_v34  ;;  %v8006_v45 = vand.u32 4294901760, %v8005_v36  ;;  %v8008_v4 = vld [vmem:[#allocation13_spill] sm:$0xff]  ;;  %v8014_v36 = vld [vmem:[#allocation15_spill] sm:$0xff] }
 0x158   : > { %8000 = vst [vmem:[#allocation26_spill] sm:$0xff] %v6106_v55  ;;  %2137 = vmatpush1.msra.mxu0 %v8003_v43  ;;  %v6128_v15 = vand.u32 4294901760, %v6049_v19  ;;  %v6131_v2 = vsub.f32 %v1173_v22, %v6051_v33  ;;  %v1171_v21 = vsel %vm431_vm4, %v3701_v44, %v1064_v32  ;;  %v7672_v42 = vand.u32 4294901760, %v6001_v41  ;;  %2352 = vmatprep.subr.mxu1 %v8008_v4  ;;  %v8012_v32 = vld [vmem:[#allocation37_spill] sm:$0xff] }
 0x159   : > { %2141 = vmatprep.subr.mxu0 %v8006_v45  ;;  %v8010_v14 = vand.u32 4294901760, %v8009_v61  ;;  %v6142_v5 = vand.u32 4294901760, %v6082_v26  ;;  %vm636_vm10 = vcmp.eq.s32.totalorder %v6012_v18, %v3629_v58  ;;  %v847_v22 = vsel %vm740_vm8, %v7954_v6, 0.0  ;;  %2354 = vmatpush1.msra.mxu1 %v8011_v38  ;;  %v8015_v45 = vld [vmem:[#allocation39_spill] sm:$0xff] }
 0x15a   : > { %8007 = vst [vmem:[#allocation8_spill] sm:$0xff] %v6131_v2  ;;  %vm739_vm11 = vcmp.eq.s32.totalorder %v6012_v18, %v3658_v24  ;;  %v8013_v10 = vand.u32 4294901760, %v8012_v32  ;;  %vm430_vm12 = vcmp.eq.s32.totalorder %v5897_v17, %v3616_v52  ;;  %v1063_v43 = vsel %vm534_vm7, %v3668_v30, %v956_v7  ;;  %2356 = vmatprep.subr.mxu1 %v8014_v36  ;;  %v8018_v7 = vld [vmem:[#allocation16_spill] sm:$0xff]  ;;  %v8021_v36 = vld [vmem:[#allocation17_spill] sm:$0xff] }
 0x15b   : > { %2145 = vmatpush1.msra.mxu0 %v8010_v14  ;;  %v1169_v34 = vsel %vm429_vm9, %v3701_v44, %v1062_v54  ;;  %v8016_v4 = vand.u32 4294901760, %v8015_v45  ;;  %v6170_v14 = vand.u32 4294901760, %v1171_v21  ;;  %v7673_v38 = vand.u32 4294901760, %v6106_v55  ;;  %2358 = vmatpush1.msra.mxu1 %v8018_v7  ;;  %v8022_v45 = vld [vmem:[#allocation43_spill] sm:$0xff] }
 0x15c   : > { %2149 = vmatprep.subr.mxu0 %v8013_v10  ;;  %v6175_v32 = vsub.f32 %v5975_v62, %v6100_v3  ;;  %v8019_v10 = vld [vmem:[#allocation41_spill] sm:$0xff]  ;;  %vm532_vm13 = vcmp.eq.s32.totalorder %v6012_v18, %v3619_v53  ;;  %v954_v54 = vsel %vm636_vm10, %v7960_v39, %v847_v22  ;;  %vm635_vm14 = vcmp.eq.s32.totalorder %v6012_v18, %v3644_v0 }
 0x15d   : > { %2153 = vmatpush1.msra.mxu0 %v8016_v4  ;;  %v8020_v51 = vand.u32 4294901760, %v8019_v10  ;;  %v846_v62 = vsel %vm739_vm11, %v3661_v25, 0.0  ;;  %2360 = vmatprep.subr.mxu1 %v8021_v36  ;;  %v6199_v4 = vsel %vm430_vm12, %v3694_v40, %v1063_v43  ;;  %v6201_v22 = vand.u32 4294901760, %v1169_v34  ;;  %v8027_v36 = vld [vmem:[#allocation45_spill] sm:$0xff]  ;;  %v8029_v43 = vld [vmem:[#allocation19_spill] sm:$0xff] }
 0x15e   : > { %8017 = vst [vmem:[#allocation10_spill] sm:$0xff] %v6175_v32  ;;  %v6206_v7 = vsub.f32 %v5933_v12, %v7671_v48  ;;  %2362 = vmatpush1.msra.mxu1 %v8026_v13  ;;  %vm428_vm15 = vcmp.eq.s32.totalorder %v6012_v18, %v3616_v52  ;;  %vm531_vm0 = vcmp.eq.s32.totalorder %v6012_v18, %v3641_v63  ;;  %v6219_v17 = vadd.s32 312, %v3544_v1  ;;  %v8050_v12 = vld [vmem:[#allocation27_spill] sm:$0xff] }
 0x15f   : > { %2157 = vmatprep.subr.mxu0 %v8020_v51  ;;  %v8023_v51 = vand.u32 4294901760, %v8022_v45  ;;  %8024 = vst [vmem:[#allocation2_spill] sm:$0xff] %v6201_v22  ;;  %v8028_v45 = vand.u32 4294901760, %v8027_v36  ;;  %vm738_vm1 = vcmp.eq.s32.totalorder %v6094_v8, %v3632_v59  ;;  %2364 = vmatprep.subr.mxu1 %v8029_v43  ;;  %v1061_v13 = vsel %vm532_vm13, %v3668_v30, %v954_v54  ;;  %v8033_v43 = vld [vmem:[#allocation49_spill] sm:$0xff] }
 0x160   : > { %8025 = vst [vmem:[#allocation78_spill] sm:$0xff] %v6206_v7  ;;  %v7680_v36 = vand.u32 4294901760, %v6175_v32  ;;  %vm737_vm2 = vcmp.eq.s32.totalorder %v6094_v8, %v3658_v24  ;;  %2366 = vmatpush1.msra.mxu1 %v8032_v47  ;;  %v6242_v54 = vand.u32 4294901760, %v6199_v4  ;;  %v6247_v61 = vsub.f32 %v6106_v55, %v7673_v38  ;;  %v8038_v47 = vld [vmem:[#allocation52_spill] sm:$0xff] }
 0x161   : > { %2161 = vmatpush1.msra.mxu0 %v8023_v51  ;;  %v8030_v51 = vld [vmem:[#allocation47_spill] sm:$0xff]  ;;  %vm427_vm3 = vcmp.eq.s32.totalorder %v6012_v18, %v3622_v57  ;;  %v8039_v10 = vand.u32 4294901760, %v8038_v47  ;;  %vm634_vm4 = vcmp.eq.s32.totalorder %v6094_v8, %v3629_v58  ;;  %v8043_v47 = vld [vmem:[#allocation53_spill] sm:$0xff]  ;;  %vm633_vm6 = vcmp.eq.s32.totalorder %v6094_v8, %v3644_v0 }
 0x162   : > { %2165 = vmatprep.subr.mxu0 %v8028_v45  ;;  %v8031_v48 = vand.u32 4294901760, %v8030_v51  ;;  %v953_v45 = vsel %vm635_vm14, %v3671_v31, %v846_v62  ;;  %v8034_v51 = vand.u32 4294901760, %v8033_v43  ;;  %8036 = vst [vmem:[#allocation3_spill] sm:$0xff] %v6247_v61  ;;  %v8037_v62 = vld [vmem:[#allocation22_spill] sm:$0xff]  ;;  %v6255_v43 = vsub.f32 %v1169_v34, %v6201_v22 }
 0x163   : > { %2368 = vmatprep.subr.mxu1 %v8037_v62  ;;  %v8042_v62 = vld [vmem:[#allocation24_spill] sm:$0xff]  ;;  %v6275_v34 = vsel %vm428_vm15, %v3694_v40, %v1061_v13  ;;  %vm735_vm5 = vcmp.eq.s32.totalorder %v6219_v17, %v3658_v24  ;;  %vm530_vm7 = vcmp.eq.s32.totalorder %v6094_v8, %v3619_v53  ;;  %vm736_vm8 = vcmp.eq.s32.totalorder %v6219_v17, %v3632_v59 }
 0x164   : > { %2169 = vmatpush1.msra.mxu0 %v8031_v48  ;;  %v6239_v48 = vsub.f32 %v1171_v21, %v6170_v14  ;;  %8040 = vst [vmem:[#allocation9_spill] sm:$0xff] %v6255_v43  ;;  %v6260_v21 = vsub.f32 %v6001_v41, %v7672_v42  ;;  %2370 = vmatpush1.msra.mxu1 %v8042_v62  ;;  %v844_v62 = vsel %vm737_vm2, %v3661_v25, 0.0  ;;  %v842_v18 = vsel %vm735_vm5, %v3661_v25, 0.0 }
 0x165   : > { %2173 = vmatprep.subr.mxu0 %v8034_v51  ;;  %v845_v51 = vsel %vm738_vm1, %v7954_v6, 0.0  ;;  %v1060_v42 = vsel %vm531_vm0, %v3676_v35, %v953_v45  ;;  %v6294_v41 = vsub.f32 %v6175_v32, %v7680_v36  ;;  %v6298_v45 = vsub.f32 %v6049_v19, %v6128_v15  ;;  %v8053_v19 = vld [vmem:[#allocation28_spill] sm:$0xff]  ;;  %v8054_v36 = vld [vmem:[#allocation59_spill] sm:$0xff] }
 0x166   : > { %8035 = vst [vmem:[#allocation81_spill] sm:$0xff] %v6239_v48  ;;  %2177 = vmatpush1.msra.mxu0 %v8039_v10  ;;  %8041 = vst [vmem:[#allocation104_spill] sm:$0xff] %v6260_v21  ;;  %v8044_v10 = vand.u32 4294901760, %v8043_v47  ;;  %v8045_v47 = vld [vmem:[#allocation25_spill] sm:$0xff]  ;;  %vm529_vm9 = vcmp.eq.s32.totalorder %v6094_v8, %v3641_v63  ;;  %vm426_vm10 = vcmp.eq.s32.totalorder %v6094_v8, %v3616_v52  ;;  %v843_v13 = vsel %vm736_vm8, %v7954_v6, 0.0  ;;  %v8089_v21 = vld [vmem:[#allocation48_spill] sm:$0xff] }
 0x167   : > { %2372 = vmatprep.subr.mxu1 %v8045_v47  ;;  %8048 = vst [vmem:[#allocation29_spill] sm:$0xff] %v6294_v41  ;;  %8049 = vst [vmem:[#allocation11_spill] sm:$0xff] %v6298_v45  ;;  %v8051_v47 = vld [vmem:[#allocation57_spill] sm:$0xff]  ;;  %vm425_vm11 = vcmp.eq.s32.totalorder %v6094_v8, %v3622_v57  ;;  %vm631_vm12 = vcmp.eq.s32.totalorder %v6219_v17, %v3644_v0  ;;  %vm632_vm13 = vcmp.eq.s32.totalorder %v6219_v17, %v3629_v58  ;;  %v8083_v8 = vld [vmem:[#allocation74_spill] sm:$0xff] }
 0x168   : > { %2181 = vmatprep.subr.mxu0 %v8044_v10  ;;  %v8046_v10 = vld [vmem:[#allocation55_spill] sm:$0xff]  ;;  %2374 = vmatpush1.msra.mxu1 %v8050_v12  ;;  %v8052_v55 = vand.u32 4294901760, %v8051_v47  ;;  %v8055_v12 = vand.u32 4294901760, %v8054_v36  ;;  %v6328_v47 = vadd.s32 304, %v3544_v1  ;;  %v8057_v36 = vld [vmem:[#allocation61_spill] sm:$0xff]  ;;  %vm424_vm14 = vcmp.eq.s32.totalorder %v6219_v17, %v3616_v52 }
 0x169   : > { %v8047_v38 = vand.u32 4294901760, %v8046_v10  ;;  %v952_v10 = vsel %vm634_vm4, %v7960_v39, %v845_v51  ;;  %2376 = vmatprep.subr.mxu1 %v8053_v19  ;;  %v951_v51 = vsel %vm633_vm6, %v3671_v31, %v844_v62  ;;  %v8056_v19 = vld [vmem:[#allocation30_spill] sm:$0xff]  ;;  %v8060_v62 = vld [vmem:[#allocation63_spill] sm:$0xff]  ;;  %vm528_vm15 = vcmp.eq.s32.totalorder %v6219_v17, %v3619_v53 }
 0x16a   : > { %2378 = vmatpush1.msra.mxu1 %v8056_v19  ;;  %v8061_v19 = vand.u32 4294901760, %v8060_v62  ;;  %vm527_vm0 = vcmp.eq.s32.totalorder %v6219_v17, %v3641_v63  ;;  %vm734_vm1 = vcmp.eq.s32.totalorder %v6328_v47, %v3632_v59  ;;  %v8076_v27 = vand.u32 4294901760, %v6298_v45  ;;  %v8090_v41 = vld [vmem:[#allocation79_spill] sm:$0xff] }
 0x16b   : > { %2185 = vmatpush1.msra.mxu0 %v8047_v38  ;;  %v8062_v38 = vld [vmem:[#allocation34_spill] sm:$0xff]  ;;  %v6418_v7 = vsub.f32 %v6082_v26, %v6142_v5  ;;  %vm423_vm2 = vcmp.eq.s32.totalorder %v6219_v17, %v3622_v57  ;;  %v8082_v26 = vld [vmem:[#allocation44_spill] sm:$0xff]  ;;  %vm630_vm4 = vcmp.eq.s32.totalorder %v6328_v47, %v3629_v58  ;;  %v8091_v22 = vand.u32 4294901760, %v8090_v41 }
 0x16c   : > { %2189 = vmatprep.subr.mxu0 %v8052_v55  ;;  %v1167_v55 = vsel %vm427_vm3, %v3701_v44, %v1060_v42  ;;  %v8059_v42 = vld [vmem:[#allocation32_spill] sm:$0xff]  ;;  %vm733_vm3 = vcmp.eq.s32.totalorder %v6328_v47, %v3658_v24  ;;  %vm629_vm6 = vcmp.eq.s32.totalorder %v6328_v47, %v3644_v0  ;;  %vm526_vm5 = vcmp.eq.s32.totalorder %v6328_v47, %v3619_v53 }
 0x16d   : > { %2193 = vmatpush1.msra.mxu0 %v8055_v12  ;;  %v8058_v12 = vand.u32 4294901760, %v8057_v36  ;;  %2380 = vmatprep.subr.mxu1 %v8059_v42  ;;  %v1059_v36 = vsel %vm530_vm7, %v3668_v30, %v952_v10  ;;  %v8063_v42 = vld [vmem:[#allocation65_spill] sm:$0xff]  ;;  %v1058_v10 = vsel %vm529_vm9, %v3676_v35, %v951_v51  ;;  %v949_v51 = vsel %vm631_vm12, %v3671_v31, %v842_v18  ;;  %v8073_v18 = vld [vmem:[#allocation40_spill] sm:$0xff] }
 0x16e   : > { %2382 = vmatpush1.msra.mxu1 %v8062_v38  ;;  %v8064_v62 = vand.u32 4294901760, %v8063_v42  ;;  %v8068_v38 = vld [vmem:[#allocation67_spill] sm:$0xff]  ;;  %8078 = vst [vmem:[#allocation33_spill] sm:$0xff] %v6418_v7  ;;  %v6496_v17 = vsub.f32 %v6199_v4, %v6242_v54  ;;  %vm525_vm8 = vcmp.eq.s32.totalorder %v6328_v47, %v3641_v63  ;;  %vm422_vm9 = vcmp.eq.s32.totalorder %v6328_v47, %v3616_v52 }
 0x16f   : > { %2197 = vmatprep.subr.mxu0 %v8058_v12  ;;  %2384 = vmatprep.subr.mxu1 %v8067_v16  ;;  %v8069_v42 = vand.u32 4294901760, %v8068_v38  ;;  %v8071_v16 = vld [vmem:[#allocation69_spill] sm:$0xff]  ;;  %v6389_v38 = vand.u32 4294901760, %v1167_v55  ;;  %vm421_vm12 = vcmp.eq.s32.totalorder %v6328_v47, %v3622_v57 }
 0x170   : > { %2201 = vmatpush2.msra.mxu0 %v8061_v19  ;;  %v8065_v19 = vand.u32 4294901760, %v6131_v2  ;;  %v8072_v32 = vand.u32 4294901760, %v8071_v16  ;;  %8099 = vst [vmem:[#allocation14_spill] sm:$0xff] %v6496_v17  ;;  %v8106_v16 = vld [vmem:[#allocation56_spill] sm:$0xff] }
 0x171   : > { %2205 = vmatprep.subr.mxu0 %v8064_v62  ;;  %v6376_v62 = vand.u32 4294901760, %v6275_v34 }
 0x172   : > { %v6367_v12 = vsub.f32 %v6131_v2, %v8065_v19  ;;  %2209 = vmatpush2.msra.mxu0 %v8069_v42  ;;  %v8070_v19 = vld [vmem:[#allocation38_spill] sm:$0xff]  ;;  %v6395_v42 = vsel %vm426_vm10, %v3694_v40, %v1059_v36  ;;  %v950_v2 = vsel %vm632_vm13, %v7960_v39, %v843_v13  ;;  %v6410_v36 = vsub.f32 %v6298_v45, %v8076_v27 }
 0x173   : > { %2386 = vmatpush1.msra.mxu1 %v8070_v19  ;;  %2213 = vmatprep.subr.mxu0 %v8072_v32  ;;  %v8074_v19 = vld [vmem:[#allocation71_spill] sm:$0xff]  ;;  %v1165_v13 = vsel %vm425_vm11, %v3701_v44, %v1058_v10  ;;  %v1056_v27 = vsel %vm527_vm0, %v3676_v35, %v949_v51  ;;  %v8084_v10 = vand.u32 4294901760, %v8083_v8  ;;  %v841_v51 = vsel %vm734_vm1, %v7954_v6, 0.0  ;;  %v8100_v45 = vld [vmem:[#allocation54_spill] sm:$0xff] }
 0x174   : > { %8066 = vst [vmem:[#allocation31_spill] sm:$0xff] %v6367_v12  ;;  %2388 = vmatprep.subr.mxu1 %v8073_v18  ;;  %v8075_v32 = vand.u32 4294901760, %v8074_v19  ;;  %8077 = vst [vmem:[#allocation12_spill] sm:$0xff] %v6410_v36  ;;  %v8079_v18 = vld [vmem:[#allocation42_spill] sm:$0xff]  ;;  %v8080_v19 = vld [vmem:[#allocation73_spill] sm:$0xff]  ;;  %v6462_v61 = vand.u32 4294901760, %v1165_v13 }
 0x175   : > { %2390 = vmatpush1.msra.mxu1 %v8079_v18  ;;  %v1057_v18 = vsel %vm528_vm15, %v3668_v30, %v950_v2  ;;  %v6455_v2 = vand.u32 4294901760, %v6395_v42 }
 0x176   : > { %2217 = vmatpush2.msra.mxu0 %v8075_v32  ;;  %v8081_v32 = vand.u32 4294901760, %v8080_v19  ;;  %2392 = vmatprep.subr.mxu1 %v8082_v26  ;;  %v6446_v19 = vadd.s32 296, %v3544_v1  ;;  %v8086_v26 = vld [vmem:[#allocation77_spill] sm:$0xff]  ;;  %8092 = vst [vmem:[#allocation36_spill] sm:$0xff] %v6462_v61 }
 0x177   : > { %v8087_v8 = vand.u32 4294901760, %v8086_v26  ;;  %v8093_v26 = vld [vmem:[#allocation50_spill] sm:$0xff] }
 0x178   : > { %2221 = vmatprep.subr.mxu0 %v8081_v32  ;;  %v8085_v32 = vld [vmem:[#allocation46_spill] sm:$0xff]  ;;  %vm731_vm7 = vcmp.eq.s32.totalorder %v6446_v19, %v3658_v24  ;;  %vm732_vm10 = vcmp.eq.s32.totalorder %v6446_v19, %v3632_v59  ;;  %vm627_vm11 = vcmp.eq.s32.totalorder %v6446_v19, %v3644_v0  ;;  %vm523_vm15 = vcmp.eq.s32.totalorder %v6446_v19, %v3641_v63 }
 0x179   : > { %2225 = vmatpush2.msra.mxu0 %v8084_v10  ;;  %2394 = vmatpush1.msra.mxu1 %v8085_v32  ;;  %v6452_v10 = vsub.f32 %v1167_v55, %v6389_v38  ;;  %v1163_v55 = vsel %vm423_vm2, %v3701_v44, %v1056_v27  ;;  %v840_v32 = vsel %vm733_vm3, %v3661_v25, 0.0  ;;  %vm524_vm1 = vcmp.eq.s32.totalorder %v6446_v19, %v3619_v53 }
 0x17a   : > { %2229 = vmatprep.subr.mxu0 %v8087_v8  ;;  %2396 = vmatprep.subr.mxu1 %v8089_v21  ;;  %v8094_v21 = vld [vmem:[#allocation80_spill] sm:$0xff]  ;;  %v948_v8 = vsel %vm630_vm4, %v7960_v39, %v841_v51  ;;  %v947_v4 = vsel %vm629_vm6, %v3671_v31, %v840_v32  ;;  %v8110_v32 = vld [vmem:[#allocation58_spill] sm:$0xff]  ;;  %vm419_vm3 = vcmp.eq.s32.totalorder %v6446_v19, %v3622_v57 }
 0x17b   : > { %8088 = vst [vmem:[#allocation13_spill] sm:$0xff] %v6452_v10  ;;  %2233 = vmatpush2.msra.mxu0 %v8091_v22  ;;  %2398 = vmatpush2.msra.mxu1 %v8093_v26  ;;  %v8095_v41 = vand.u32 4294901760, %v8094_v21  ;;  %v6481_v22 = vsel %vm424_vm14, %v3694_v40, %v1057_v18  ;;  %v8096_v26 = vld [vmem:[#allocation51_spill] sm:$0xff]  ;;  %v6501_v18 = vadd.s32 288, %v3544_v1  ;;  %v8101_v51 = vld [vmem:[#allocation84_spill] sm:$0xff]  ;;  %vm628_vm14 = vcmp.eq.s32.totalorder %v6446_v19, %v3629_v58 }
 0x17c   : > { %2400 = vmatprep.subr.mxu1 %v8096_v26  ;;  %v8097_v21 = vld [vmem:[#allocation83_spill] sm:$0xff]  ;;  %v8102_v27 = vand.u32 4294901760, %v8101_v51  ;;  %v6506_v26 = vand.u32 4294901760, %v1163_v55  ;;  %v6526_v12 = vand.u32 4294901760, %v6481_v22 }
 0x17d   : > { %2237 = vmatprep.subr.mxu0 %v8095_v41  ;;  %v8098_v41 = vand.u32 4294901760, %v8097_v21  ;;  %2402 = vmatpush2.msra.mxu1 %v8100_v45  ;;  %v8104_v21 = vand.u32 4294901760, %v6239_v48  ;;  %v8107_v45 = vld [vmem:[#allocation87_spill] sm:$0xff]  ;;  %vm729_vm13 = vcmp.eq.s32.totalorder %v6501_v18, %v3658_v24  ;;  %vm625_vm0 = vcmp.eq.s32.totalorder %v6501_v18, %v3644_v0 }
 0x17e   : > { %8103 = vst [vmem:[#allocation37_spill] sm:$0xff] %v6506_v26  ;;  %2404 = vmatprep.subr.mxu1 %v8106_v16  ;;  %v8108_v51 = vand.u32 4294901760, %v8107_v45  ;;  %v8111_v16 = vld [vmem:[#allocation89_spill] sm:$0xff]  ;;  %v8113_v45 = vand.u32 4294901760, %v6418_v7  ;;  %vm730_vm2 = vcmp.eq.s32.totalorder %v6501_v18, %v3632_v59  ;;  %vm521_vm4 = vcmp.eq.s32.totalorder %v6501_v18, %v3641_v63 }
 0x17f   : > { %2241 = vmatpush2.msra.mxu0 %v8098_v41  ;;  %v6511_v41 = vsub.f32 %v6239_v48, %v8104_v21  ;;  %v1055_v21 = vsel %vm526_vm5, %v3668_v30, %v948_v8  ;;  %2406 = vmatpush2.msra.mxu1 %v8110_v32  ;;  %v8112_v48 = vand.u32 4294901760, %v8111_v16  ;;  %v838_v8 = vsel %vm731_vm7, %v3661_v25, 0.0  ;;  %v8116_v32 = vld [vmem:[#allocation91_spill] sm:$0xff] }
 0x180   : > { %2245 = vmatprep.subr.mxu0 %v8102_v27  ;;  %v6523_v27 = vsub.f32 %v1165_v13, %v6462_v61  ;;  %v6540_v13 = vsub.f32 %v6418_v7, %v8113_v45  ;;  %v1054_v45 = vsel %vm525_vm8, %v3676_v35, %v947_v4  ;;  %v8118_v7 = vld [vmem:[#allocation62_spill] sm:$0xff]  ;;  %v8119_v61 = vld [vmem:[#allocation93_spill] sm:$0xff]  ;;  %v6573_v16 = vsel %vm422_vm9, %v3694_v40, %v1055_v21 }
 0x181   : > { %8105 = vst [vmem:[#allocation15_spill] sm:$0xff] %v6511_v41  ;;  %2249 = vmatpush2.msra.mxu0 %v8108_v51  ;;  %v8115_v51 = vld [vmem:[#allocation60_spill] sm:$0xff]  ;;  %v8121_v4 = vand.u32 4294901760, %v6255_v43  ;;  %v945_v21 = vsel %vm627_vm11, %v3671_v31, %v838_v8  ;;  %v836_v8 = vsel %vm729_vm13, %v3661_v25, 0.0  ;;  %v8135_v41 = vld [vmem:[#allocation101_spill] sm:$0xff]  ;;  %v6645_v47 = vand.u32 4294901760, %v6573_v16 }
 0x182   : > { %8109 = vst [vmem:[#allocation39_spill] sm:$0xff] %v6523_v27  ;;  %2253 = vmatprep.subr.mxu0 %v8112_v48  ;;  %8114 = vst [vmem:[#allocation16_spill] sm:$0xff] %v6540_v13  ;;  %2408 = vmatprep.subr.mxu1 %v8115_v51  ;;  %v8117_v48 = vand.u32 4294901760, %v8116_v32  ;;  %v8120_v51 = vand.u32 4294901760, %v8119_v61  ;;  %v6566_v32 = vsub.f32 %v1163_v55, %v6506_v26  ;;  %v8124_v61 = vld [vmem:[#allocation95_spill] sm:$0xff]  ;;  %v839_v55 = vsel %vm732_vm10, %v7954_v6, 0.0 }
 0x183   : > { %2410 = vmatpush2.msra.mxu1 %v8118_v7  ;;  %v6578_v36 = vsub.f32 %v6255_v43, %v8121_v4  ;;  %v8123_v7 = vld [vmem:[#allocation64_spill] sm:$0xff]  ;;  %v8126_v4 = vld [vmem:[#allocation66_spill] sm:$0xff]  ;;  %v8142_v26 = vld [vmem:[#allocation105_spill] sm:$0xff]  ;;  %vm626_vm6 = vcmp.eq.s32.totalorder %v6501_v18, %v3629_v58  ;;  %v6667_v13 = vsub.f32 %v6395_v42, %v6455_v2  ;;  %vm420_vm5 = vcmp.eq.s32.totalorder %v6446_v19, %v3616_v52 }
 0x184   : > { %2257 = vmatpush2.msra.mxu0 %v8117_v48  ;;  %2412 = vmatprep.subr.mxu1 %v8123_v7  ;;  %v8127_v7 = vld [vmem:[#allocation96_spill] sm:$0xff]  ;;  %v6604_v48 = vsub.f32 %v6275_v34, %v6376_v62  ;;  %v8134_v43 = vld [vmem:[#allocation70_spill] sm:$0xff]  ;;  %vm417_vm7 = vcmp.eq.s32.totalorder %v6501_v18, %v3622_v57  ;;  %vm522_vm9 = vcmp.eq.s32.totalorder %v6501_v18, %v3619_v53 }
 0x185   : > { %2261 = vmatprep.subr.mxu0 %v8120_v51  ;;  %8122 = vst [vmem:[#allocation41_spill] sm:$0xff] %v6578_v36  ;;  %v8125_v51 = vand.u32 4294901760, %v8124_v61  ;;  %2414 = vmatpush2.msra.mxu1 %v8126_v4  ;;  %v8128_v61 = vand.u32 4294901760, %v8127_v7  ;;  %v8130_v4 = vld [vmem:[#allocation68_spill] sm:$0xff]  ;;  %v8131_v7 = vld [vmem:[#allocation99_spill] sm:$0xff]  ;;  %8144 = vst [vmem:[#allocation18_spill] sm:$0xff] %v6667_v13 }
 0x186   : > { %8129 = vst [vmem:[#allocation17_spill] sm:$0xff] %v6604_v48  ;;  %2416 = vmatprep.subr.mxu1 %v8130_v4  ;;  %v8136_v4 = vand.u32 4294901760, %v8135_v41  ;;  %v8138_v41 = vld [vmem:[#allocation103_spill] sm:$0xff]  ;;  %v8169_v36 = vld [vmem:[#allocation92_spill] sm:$0xff] }
 0x187   : > { %2265 = vmatpush2.msra.mxu0 %v8125_v51  ;;  %v1161_v51 = vsel %vm421_vm12, %v3701_v44, %v1054_v45  ;;  %v8133_v45 = vand.u32 4294901760, %v6496_v17  ;;  %2418 = vmatpush2.msra.mxu1 %v8134_v43  ;;  %v8137_v43 = vld [vmem:[#allocation72_spill] sm:$0xff]  ;;  %vm418_vm12 = vcmp.eq.s32.totalorder %v6501_v18, %v3616_v52 }
 0x188   : > { %2269 = vmatprep.subr.mxu0 %v8128_v61  ;;  %v8132_v61 = vand.u32 4294901760, %v8131_v7  ;;  %v946_v7 = vsel %vm628_vm14, %v7960_v39, %v839_v55  ;;  %2420 = vmatprep.subr.mxu1 %v8137_v43  ;;  %v6647_v55 = vand.u32 4294901760, %v1161_v51  ;;  %v8143_v43 = vand.u32 4294901760, %v8142_v26 }
 0x189   : > { %v6619_v34 = vsub.f32 %v6496_v17, %v8133_v45  ;;  %v6639_v45 = vadd.s32 280, %v3544_v1  ;;  %v8141_v17 = vld [vmem:[#allocation75_spill] sm:$0xff] }
 0x18a   : > { %2273 = vmatpush2.msra.mxu0 %v8132_v61  ;;  %v1052_v61 = vsel %vm523_vm15, %v3676_v35, %v945_v21  ;;  %8140 = vst [vmem:[#allocation43_spill] sm:$0xff] %v6647_v55  ;;  %v943_v21 = vsel %vm625_vm0, %v3671_v31, %v836_v8  ;;  %2422 = vmatpush2.msra.mxu1 %v8141_v17  ;;  %v8145_v8 = vld [vmem:[#allocation76_spill] sm:$0xff]  ;;  %v8146_v17 = vand.u32 4294901760, %v5476_v23  ;;  %v8147_v23 = vand.u32 4294901760, %v5532_v28 }
 0x18b   : > { %2277 = vmatprep.subr.mxu0 %v8136_v4  ;;  %v8139_v4 = vand.u32 4294901760, %v8138_v41  ;;  %v7713_v41 = vand.u32 4294901760, %v6604_v48  ;;  %2424 = vmatprep.subr.mxu1 %v8145_v8  ;;  %v1159_v42 = vsel %vm419_vm3, %v3701_v44, %v1052_v61  ;;  %v7716_v8 = vand.u32 4294901760, %v6452_v10  ;;  %v8148_v61 = vld [vmem:[#allocation111_spill] sm:$0xff] }
 0x18c   : > { %2426 = vmatpush2.msra.mxu1 %v7958_v37  ;;  %vm728_vm8 = vcmp.eq.s32.totalorder %v6639_v45, %v3632_v59  ;;  %v8149_v37 = vand.u32 4294901760, %v8148_v61  ;;  %v6699_v28 = vsub.f32 %v1161_v51, %v6647_v55  ;;  %vm727_vm10 = vcmp.eq.s32.totalorder %v6639_v45, %v3658_v24  ;;  %v8177_v55 = vld [vmem:[#allocation98_spill] sm:$0xff] }
 0x18d   : > { %2281 = vmatpush2.msra.mxu0 %v8139_v4  ;;  %v837_v4 = vsel %vm730_vm2, %v7954_v6, 0.0  ;;  %2428 = vmatprep.subr.mxu1 %v7959_v20  ;;  %v8151_v20 = vld [vmem:[#allocation112_spill] sm:$0xff]  ;;  %v6722_v61 = vsub.f32 %v6604_v48, %v7713_v41  ;;  %vm624_vm11 = vcmp.eq.s32.totalorder %v6639_v45, %v3629_v58  ;;  %v8157_v41 = vld [vmem:[#allocation86_spill] sm:$0xff]  ;;  %vm623_vm13 = vcmp.eq.s32.totalorder %v6639_v45, %v3644_v0 }
 0x18e   : > { %2285 = vmatprep.subr.mxu0 %v8143_v43  ;;  %v1053_v43 = vsel %vm524_vm1, %v3668_v30, %v946_v7  ;;  %v1050_v7 = vsel %vm521_vm4, %v3676_v35, %v943_v21  ;;  %v6708_v21 = vadd.s32 272, %v3544_v1  ;;  %v8152_v26 = vand.u32 4294901760, %v8151_v20  ;;  %v8160_v48 = vld [vmem:[#allocation88_spill] sm:$0xff] }
 0x18f   : > { %2289 = vmatpush2.msra.mxu0 %v8146_v17  ;;  %v944_v17 = vsel %vm626_vm6, %v7960_v39, %v837_v4  ;;  %v6717_v51 = vsel %vm420_vm5, %v3694_v40, %v1053_v43  ;;  %v6730_v20 = vand.u32 4294901760, %v1159_v42  ;;  %v1157_v19 = vsel %vm417_vm7, %v3701_v44, %v1050_v7 }
 0x190   : > { %2293 = vmatprep.subr.mxu0 %v8147_v23  ;;  %v8150_v23 = vld [vmem:[#allocation82_spill] sm:$0xff]  ;;  %v835_v43 = vsel %vm728_vm8, %v7954_v6, 0.0  ;;  %v1051_v7 = vsel %vm522_vm9, %v3668_v30, %v944_v17  ;;  %vm726_vm14 = vcmp.eq.s32.totalorder %v6708_v21, %v3632_v59  ;;  %v6780_v4 = vand.u32 4294901760, %v1157_v19 }
 0x191   : > { %2297 = vmatpush2.msra.mxu0 %v8149_v37  ;;  %2430 = vmatpush2.msra.mxu1 %v8150_v23  ;;  %v8153_v37 = vld [vmem:[#allocation85_spill] sm:$0xff]  ;;  %8156 = vst [vmem:[#allocation45_spill] sm:$0xff] %v6730_v20  ;;  %v8164_v17 = vld [vmem:[#allocation90_spill] sm:$0xff]  ;;  %vm520_vm15 = vcmp.eq.s32.totalorder %v6639_v45, %v3619_v53  ;;  %vm519_vm0 = vcmp.eq.s32.totalorder %v6639_v45, %v3641_v63  ;;  %v833_v18 = vsel %vm726_vm14, %v7954_v6, 0.0 }
 0x192   : > { %2301 = vmatprep.subr.mxu0 %v8152_v26  ;;  %2432 = vmatprep.subr.mxu1 %v8153_v37  ;;  %v8154_v23 = vld [vmem:[#allocation113_spill] sm:$0xff]  ;;  %v8158_v37 = vld [vmem:[#allocation114_spill] sm:$0xff]  ;;  %8168 = vst [vmem:[#allocation47_spill] sm:$0xff] %v6780_v4  ;;  %vm622_vm1 = vcmp.eq.s32.totalorder %v6708_v21, %v3629_v58  ;;  %vm416_vm2 = vcmp.eq.s32.totalorder %v6639_v45, %v3616_v52 }
 0x193   : > { %v8155_v26 = vand.u32 4294901760, %v8154_v23  ;;  %2434 = vmatpush2.msra.mxu1 %v8157_v41  ;;  %v8159_v23 = vand.u32 4294901760, %v8158_v37  ;;  %v8161_v41 = vld [vmem:[#allocation115_spill] sm:$0xff]  ;;  %vm415_vm3 = vcmp.eq.s32.totalorder %v6639_v45, %v3622_v57  ;;  %vm725_vm4 = vcmp.eq.s32.totalorder %v6708_v21, %v3658_v24 }
 0x194   : > { %2436 = vmatprep.subr.mxu1 %v8160_v48  ;;  %v8162_v37 = vand.u32 4294901760, %v8161_v41  ;;  %v8165_v48 = vld [vmem:[#allocation116_spill] sm:$0xff]  ;;  %vm518_vm6 = vcmp.eq.s32.totalorder %v6708_v21, %v3619_v53  ;;  %vm414_vm5 = vcmp.eq.s32.totalorder %v6708_v21, %v3616_v52  ;;  %vm621_vm8 = vcmp.eq.s32.totalorder %v6708_v21, %v3644_v0 }
 0x195   : > { %2305 = vmatpush2.msra.mxu0 %v8155_v26  ;;  %v6748_v26 = vsub.f32 %v6452_v10, %v7716_v8  ;;  %v834_v8 = vsel %vm727_vm10, %v3661_v25, 0.0  ;;  %2438 = vmatpush2.msra.mxu1 %v8164_v17  ;;  %v8166_v41 = vand.u32 4294901760, %v8165_v48  ;;  %v942_v10 = vsel %vm624_vm11, %v7960_v39, %v835_v43  ;;  %v8170_v17 = vld [vmem:[#allocation117_spill] sm:$0xff]  ;;  %v8172_v43 = vld [vmem:[#allocation106_spill] sm:$0xff] }
 0x196   : > { %2309 = vmatprep.subr.mxu0 %v8159_v23  ;;  %v6762_v23 = vsub.f32 %v6481_v22, %v6526_v12  ;;  %2440 = vmatprep.subr.mxu1 %v8169_v36  ;;  %v8171_v48 = vand.u32 4294901760, %v8170_v17  ;;  %v8173_v36 = vld [vmem:[#allocation94_spill] sm:$0xff]  ;;  %v941_v17 = vsel %vm623_vm13, %v3671_v31, %v834_v8  ;;  %v1049_v8 = vsel %vm520_vm15, %v3668_v30, %v942_v10  ;;  %v8178_v10 = vld [vmem:[#allocation100_spill] sm:$0xff] }
 0x197   : > { %2313 = vmatpush2.msra.mxu0 %v8162_v37  ;;  %v8167_v37 = vand.u32 4294901760, %v6667_v13  ;;  %2323 = vmatprep.mubr.f32.mxu0 %v8172_v43  ;;  %vm517_vm13 = vcmp.eq.s32.totalorder %v6708_v21, %v3641_v63  ;;  %vm413_vm15 = vcmp.eq.s32.totalorder %v6708_v21, %v3622_v57 }
 0x198   : > { %8163 = vst [vmem:[#allocation19_spill] sm:$0xff] %v6762_v23  ;;  %2317 = vmatprep.subr.mxu0 %v8166_v41  ;;  %2442 = vmatpush2.msra.mxu1 %v8173_v36  ;;  %v8176_v36 = vand.u32 4294901760, %v6523_v27 }
 0x199   : > { %v6778_v22 = vsub.f32 %v6667_v13, %v8167_v37  ;;  %2321 = vmatpush2.msra.mxu0 %v8171_v48  ;;  %v6793_v37 = vsub.f32 %v1159_v42, %v6730_v20  ;;  %v6799_v13 = vsel %vm418_vm12, %v3694_v40, %v1051_v7  ;;  %v6816_v42 = vadd.s32 264, %v3544_v1  ;;  %v8174_v7 = vld [vmem:[#allocation109_spill] sm:$0xff]  ;;  %v8182_v20 = vld [vmem:[#allocation107_spill] sm:$0xff]  ;;  %2460 = vmatprep.mubr.f32.mxu1 %v8172_v43 }
 0x19a   : > { %2325 = vmatmul.mubr.f32.vlgmr.msra.gmra.mxu0 %v8174_v7  ;;  %v8175_v48 = vld [vmem:[#allocation97_spill] sm:$0xff]  ;;  %v6823_v41 = vsub.f32 %v6523_v27, %v8176_v36  ;;  %2469 = vmatprep.subr.mxu0 %v5902_v11  ;;  %v6842_v36 = vadd.s32 256, %v3544_v1  ;;  %v940_v1 = vsel %vm622_vm1, %v7960_v39, %v833_v18  ;;  %v8181_v18 = vand.u32 4294901760, %v6762_v23  ;;  %v8183_v27 = vld [vmem:[#allocation108_spill] sm:$0xff] }
 0x19b   : > { %2444 = vmatprep.subr.mxu1 %v8175_v48  ;;  %v6835_v48 = vsub.f32 %v1157_v19, %v6780_v4  ;;  %2471 = vmatpush1.msra.mxu0 %v5835_v56  ;;  %v8179_v19 = vld [vmem:[#allocation102_spill] sm:$0xff]  ;;  %vm724_vm7 = vcmp.eq.s32.totalorder %v6816_v42, %v3632_v59  ;;  %vm723_vm9 = vcmp.eq.s32.totalorder %v6816_v42, %v3658_v24  ;;  %v6964_v43 = vand.u32 4294901760, %v6799_v13 }
 0x19c   : > { %2446 = vmatpush2.msra.mxu1 %v8177_v55  ;;  %v1048_v55 = vsel %vm519_vm0, %v3676_v35, %v941_v17  ;;  %2473 = vmatprep.subr.mxu0 %v6030_v50  ;;  %v6866_v17 = vsel %vm416_vm2, %v3694_v40, %v1049_v8  ;;  %v832_v8 = vsel %vm725_vm4, %v3661_v25, 0.0  ;;  %vm722_vm10 = vcmp.eq.s32.totalorder %v6842_v36, %v3632_v59 }
 0x19d   : > { %2448 = vmatprep.subr.mxu1 %v8178_v10  ;;  %v6860_v10 = vand.u32 4294901760, %v6717_v51  ;;  %2475 = vmatpush1.msra.mxu0 %v5872_v49  ;;  %vm620_vm11 = vcmp.eq.s32.totalorder %v6816_v42, %v3629_v58  ;;  %v831_v45 = vsel %vm724_vm7, %v7954_v6, 0.0  ;;  %vm721_vm12 = vcmp.eq.s32.totalorder %v6842_v36, %v3658_v24  ;;  %8186 = vst [vmem:[#allocation49_spill] sm:$0xff] %v6964_v43 }
 0x19e   : > { %2450 = vmatpush2.msra.mxu1 %v8179_v19  ;;  %v6877_v19 = vsub.f32 %v6762_v23, %v8181_v18  ;;  %2477 = vmatprep.subr.mxu0 %v6100_v3  ;;  %v6894_v18 = vsel %vm415_vm3, %v3701_v44, %v1048_v55  ;;  %v1047_v23 = vsel %vm518_vm6, %v3668_v30, %v940_v1  ;;  %v8184_v55 = vld [vmem:[#allocation110_spill] sm:$0xff]  ;;  %v828_v59 = vsel %vm721_vm12, %v3661_v25, 0.0 }
 0x19f   : > { %8180 = vst [vmem:[#allocation21_spill] sm:$0xff] %v6860_v10  ;;  %2452 = vmatprep.subr.mxu1 %v7978_v29  ;;  %2479 = vmatpush1.msra.mxu0 %v5942_v9  ;;  %vm619_vm14 = vcmp.eq.s32.totalorder %v6816_v42, %v3644_v0  ;;  %v6936_v1 = vsel %vm414_vm5, %v3694_v40, %v1047_v23 }
 0x1a0   : > { %2454 = vmatpush2.msra.mxu1 %v8182_v20  ;;  %v6906_v20 = vsub.f32 %v6573_v16, %v6645_v47  ;;  %2481 = vmatprep.subr.mxu0 %v6128_v15  ;;  %v830_v16 = vsel %vm723_vm9, %v3661_v25, 0.0  ;;  %vm618_vm0 = vcmp.eq.s32.totalorder %v6842_v36, %v3629_v58  ;;  %vm516_vm1 = vcmp.eq.s32.totalorder %v6816_v42, %v3619_v53 }
 0x1a1   : > { %2456 = vmatprep.subr.mxu1 %v8183_v27  ;;  %v939_v27 = vsel %vm621_vm8, %v3671_v31, %v832_v8  ;;  %2483 = vmatpush1.msra.mxu0 %v6051_v33  ;;  %v829_v8 = vsel %vm722_vm10, %v7954_v6, 0.0  ;;  %v938_v23 = vsel %vm620_vm11, %v7960_v39, %v831_v45  ;;  %vm617_vm2 = vcmp.eq.s32.totalorder %v6842_v36, %v3644_v0 }
 0x1a2   : > { %2458 = vmatpush2.msra.mxu1 %v8184_v55  ;;  %2485 = vmatprep.subr.mxu0 %v6142_v5  ;;  %v8185_v6 = vand.u32 4294901760, %v6087_v46  ;;  %vm515_vm3 = vcmp.eq.s32.totalorder %v6816_v42, %v3641_v63  ;;  %v937_v24 = vsel %vm619_vm14, %v3671_v31, %v830_v16  ;;  %v8187_v25 = vand.u32 4294901760, %v6058_v60  ;;  %v8188_v55 = vld [vmem:[#allocation3_spill] sm:$0xff]  ;;  %v8190_v60 = vld [vmem:[#allocation2_spill] sm:$0xff] }
 0x1a3   : > { %2462 = vmatmul.mubr.f32.vlgmr.msra.gmra.mxu1 %v8174_v7  ;;  %2487 = vmatpush1.msra.mxu0 %v6170_v14  ;;  %v1046_v7 = vsel %vm517_vm13, %v3676_v35, %v939_v27  ;;  %vm412_vm4 = vcmp.eq.s32.totalorder %v6816_v42, %v3616_v52  ;;  %vm514_vm6 = vcmp.eq.s32.totalorder %v6842_v36, %v3619_v53  ;;  %v8189_v27 = vand.u32 4294901760, %v8188_v55 }
 0x1a4   : > { %2581 = vmatprep.subr.mxu1 %v8185_v6  ;;  %2489 = vmatprep.subr.mxu0 %v6242_v54  ;;  %v936_v45 = vsel %vm618_vm0, %v7960_v39, %v829_v8  ;;  %v7730_v16 = vand.u32 4294901760, %v6566_v32  ;;  %v1045_v6 = vsel %vm516_vm1, %v3668_v30, %v938_v23  ;;  %vm513_vm5 = vcmp.eq.s32.totalorder %v6842_v36, %v3641_v63  ;;  %v8191_v39 = vld [vmem:[#allocation78_spill] sm:$0xff]  ;;  %v8200_v63 = vld [vmem:[#allocation31_spill] sm:$0xff] }
 0x1a5   : > { %2587 = vmatpush1.msra.mxu1 %v8187_v25  ;;  %2491 = vmatpush1.msra.mxu0 %v8190_v60  ;;  %v935_v58 = vsel %vm617_vm2, %v3671_v31, %v828_v59  ;;  %v8192_v8 = vand.u32 4294901760, %v8191_v39  ;;  %v7008_v55 = vsub.f32 %v6717_v51, %v6860_v10  ;;  %vm411_vm7 = vcmp.eq.s32.totalorder %v6816_v42, %v3622_v57  ;;  %v8193_v31 = vld [vmem:[#allocation29_spill] sm:$0xff] }
 0x1a6   : > { %2593 = vmatprep.subr.mxu1 %v8189_v27  ;;  %2493 = vmatprep.subr.mxu0 %v6376_v62  ;;  %v1044_v0 = vsel %vm515_vm3, %v3676_v35, %v937_v24  ;;  %v8194_v23 = vand.u32 4294901760, %v8193_v31  ;;  %v7020_v59 = vand.u32 4294901760, %v6866_v17  ;;  %v1153_v51 = vsel %vm413_vm15, %v3701_v44, %v1046_v7  ;;  %v8195_v27 = vld [vmem:[#allocation104_spill] sm:$0xff] }
 0x1a7   : > { %2599 = vmatpush1.msra.mxu1 %v8192_v8  ;;  %2495 = vmatpush1.msra.mxu0 %v6389_v38  ;;  %vm410_vm8 = vcmp.eq.s32.totalorder %v6842_v36, %v3616_v52  ;;  %v1043_v24 = vsel %vm514_vm6, %v3668_v30, %v936_v45  ;;  %v8196_v39 = vand.u32 4294901760, %v8195_v27  ;;  %v7036_v8 = vand.u32 4294901760, %v6894_v18  ;;  %v8197_v30 = vld [vmem:[#allocation12_spill] sm:$0xff]  ;;  %v8206_v52 = vld [vmem:[#allocation15_spill] sm:$0xff] }
 0x1a8   : > { %2605 = vmatprep.subr.mxu1 %v8194_v23  ;;  %2497 = vmatprep.subr.mxu0 %v6455_v2  ;;  %v1152_v21 = vsel %vm412_vm4, %v3694_v40, %v1045_v6  ;;  %vm409_vm9 = vcmp.eq.s32.totalorder %v6842_v36, %v3622_v57  ;;  %v1042_v53 = vsel %vm513_vm5, %v3676_v35, %v935_v58  ;;  %v8198_v7 = vand.u32 4294901760, %v8197_v30  ;;  %v8199_v45 = vld [vmem:[#allocation36_spill] sm:$0xff]  ;;  %v8209_v36 = vld [vmem:[#allocation43_spill] sm:$0xff] }
 0x1a9   : > { %2611 = vmatpush1.msra.mxu1 %v8196_v39  ;;  %2499 = vmatpush1.msra.mxu0 %v8199_v45  ;;  %v7052_v31 = vand.u32 4294901760, %v6936_v1  ;;  %v7731_v23 = vand.u32 4294901760, %v6906_v20  ;;  %v1151_v6 = vsel %vm411_vm7, %v3701_v44, %v1044_v0  ;;  %v7061_v27 = vsub.f32 %v6799_v13, %v6964_v43  ;;  %v8203_v13 = vld [vmem:[#allocation16_spill] sm:$0xff] }
 0x1aa   : > { %2617 = vmatprep.subr.mxu1 %v8198_v7  ;;  %v8201_v35 = vand.u32 4294901760, %v8200_v63  ;;  %2501 = vmatprep.subr.mxu0 %v6526_v12  ;;  %v2681_v58 = vsub.f32 %v6566_v32, %v7730_v16  ;;  %v7069_v39 = vand.u32 4294901760, %v1153_v51  ;;  %v7732_v30 = vand.u32 4294901760, %v6699_v28  ;;  %v8205_v7 = vld [vmem:[#allocation37_spill] sm:$0xff] }
 0x1ab   : > { %v1150_v42 = vsel %vm410_vm8, %v3694_v40, %v1043_v24  ;;  %v8204_v0 = vand.u32 4294901760, %v8203_v13  ;;  %2503 = vmatpush1.msra.mxu0 %v8205_v7  ;;  %v7079_v63 = vand.u32 4294901760, %v1152_v21  ;;  %v1149_v16 = vsel %vm409_vm9, %v3701_v44, %v1042_v53 }
 0x1ac   : > { %2623 = vmatpush1.msra.mxu1 %v8201_v35  ;;  %8202 = vst [vmem:[#allocation22_spill] sm:$0xff] %v7069_v39  ;;  %v7733_v35 = vand.u32 4294901760, %v7008_v55  ;;  %v7088_v25 = vsub.f32 %v6866_v17, %v7020_v59  ;;  %v8207_v40 = vand.u32 4294901760, %v8206_v52  ;;  %2505 = vmatprep.subr.mxu0 %v6645_v47  ;;  %v2676_v24 = vand.u32 4294901760, %v6877_v19  ;;  %v8210_v52 = vld [vmem:[#allocation41_spill] sm:$0xff] }
 0x1ad   : > { %2629 = vmatprep.subr.mxu1 %v8204_v0  ;;  %v7096_v13 = vsub.f32 %v6894_v18, %v7036_v8  ;;  %v7098_v0 = vand.u32 4294901760, %v1151_v6  ;;  %v8208_v44 = vand.u32 4294901760, %v6619_v34  ;;  %2507 = vmatpush1.msra.mxu0 %v8209_v36  ;;  %v2687_v17 = vsub.f32 %v6906_v20, %v7731_v23 }
 0x1ae   : > { %2635 = vmatpush1.msra.mxu1 %v8207_v40  ;;  %v7107_v53 = vand.u32 4294901760, %v1150_v42  ;;  %v7112_v18 = vsub.f32 %v6936_v1, %v7052_v31  ;;  %v8211_v40 = vand.u32 4294901760, %v8210_v52  ;;  %2509 = vmatprep.subr.mxu0 %v6860_v10  ;;  %v7118_v34 = vsub.f32 %v1153_v51, %v7069_v39  ;;  %v8214_v1 = vld [vmem:[#allocation45_spill] sm:$0xff] }
 0x1af   : > { %2641 = vmatprep.subr.mxu1 %v8208_v44  ;;  %v2693_v44 = vsub.f32 %v6699_v28, %v7732_v30  ;;  %v7123_v23 = vand.u32 4294901760, %v1149_v16  ;;  %v8213_v46 = vand.u32 4294901760, %v6722_v61  ;;  %2511 = vmatpush1.msra.mxu0 %v8214_v1  ;;  %v2699_v52 = vsub.f32 %v7008_v55, %v7733_v35 }
 0x1b0   : > { %2647 = vmatpush1.msra.mxu1 %v8211_v40  ;;  %v8215_v40 = vld [vmem:[#allocation4_spill] sm:$0xff]  ;;  %v7135_v29 = vsub.f32 %v1152_v21, %v7079_v63  ;;  %v8216_v30 = vand.u32 4294901760, %v6748_v26  ;;  %2513 = vmatprep.subr.mxu0 %v6964_v43  ;;  %v2682_v61 = vand.u32 4294901760, %v2681_v58  ;;  %v8217_v19 = vand.u32 4294901760, %v6793_v37 }
 0x1b1   : > { %8212 = vst [vmem:[#allocation52_spill] sm:$0xff] %v7123_v23  ;;  %2653 = vmatprep.subr.mxu1 %v8213_v46  ;;  %v7141_v46 = vsub.f32 %v1151_v6, %v7098_v0  ;;  %v7736_v51 = vand.u32 4294901760, %v7096_v13  ;;  %v8218_v57 = vand.u32 4294901760, %v6778_v22  ;;  %2515 = vmatpush1.msra.mxu0 %v6780_v4  ;;  %v2688_v21 = vand.u32 4294901760, %v2687_v17 }
 0x1b2   : > { %2659 = vmatpush1.msra.mxu1 %v8216_v30  ;;  %v2705_v35 = vsub.f32 %v6793_v37, %v8217_v19  ;;  %v8219_v26 = vand.u32 4294901760, %v7061_v27  ;;  %v7155_v6 = vsub.f32 %v1150_v42, %v7107_v53  ;;  %v8220_v43 = vand.u32 4294901760, %v6823_v41  ;;  %2517 = vmatprep.subr.mxu0 %v7020_v59 }
 0x1b3   : > { %2665 = vmatprep.subr.mxu1 %v8218_v57  ;;  %v2694_v19 = vand.u32 4294901760, %v2693_v44  ;;  %v7161_v22 = vsub.f32 %v1149_v16, %v7123_v23  ;;  %v8222_v57 = vand.u32 4294901760, %v6835_v48  ;;  %2519 = vmatpush1.msra.mxu0 %v7036_v8  ;;  %v2700_v42 = vand.u32 4294901760, %v2699_v52 }
 0x1b4   : > { %v2711_v30 = vsub.f32 %v7061_v27, %v8219_v26  ;;  %2671 = vmatpush1.msra.mxu1 %v8220_v43  ;;  %v8223_v58 = vand.u32 4294901760, %v8215_v40  ;;  %v8224_v43 = vand.u32 4294901760, %v7088_v25  ;;  %2521 = vmatprep.subr.mxu0 %v7052_v31  ;;  %v8225_v26 = vand.u32 4294901760, %v7112_v18 }
 0x1b5   : > { %8221 = vst [vmem:[#allocation24_spill] sm:$0xff] %v7161_v22  ;;  %v2717_v17 = vsub.f32 %v6835_v48, %v8222_v57  ;;  %2677 = vmatprep.subr.mxu1 %v2676_v24  ;;  %v2706_v57 = vand.u32 4294901760, %v2705_v35  ;;  %v2729_v24 = vsub.f32 %v7096_v13, %v7736_v51  ;;  %2523 = vmatpush1.msra.mxu0 %v7069_v39  ;;  %v7743_v52 = vand.u32 4294901760, %v7161_v22 }
 0x1b6   : > { %v2568_v41 = vsub.f32 %v8215_v40, %v8223_v58  ;;  %v2723_v44 = vsub.f32 %v7088_v25, %v8224_v43  ;;  %2683 = vmatpush1.msra.mxu1 %v2682_v61  ;;  %v2712_v58 = vand.u32 4294901760, %v2711_v30  ;;  %v2735_v43 = vsub.f32 %v7112_v18, %v8225_v26  ;;  %2525 = vmatprep.subr.mxu0 %v7079_v63 }
 0x1b7   : > { %2689 = vmatprep.subr.mxu1 %v2688_v21  ;;  %v2718_v35 = vand.u32 4294901760, %v2717_v17  ;;  %v8226_v61 = vand.u32 4294901760, %v7118_v34  ;;  %2527 = vmatpush1.msra.mxu0 %v7098_v0  ;;  %v8227_v39 = vand.u32 4294901760, %v7135_v29  ;;  %v8228_v17 = vand.u32 4294901760, %v7141_v46 }
 0x1b8   : > { %2695 = vmatpush1.msra.mxu1 %v2694_v19  ;;  %v2569_v21 = vand.u32 4294901760, %v2568_v41  ;;  %v2724_v30 = vand.u32 4294901760, %v2723_v44  ;;  %2529 = vmatprep.subr.mxu0 %v7107_v53  ;;  %v2730_v19 = vand.u32 4294901760, %v2729_v24  ;;  %v7741_v44 = vmov 0.0  }
 0x1b9   : > { %v2741_v51 = vsub.f32 %v7118_v34, %v8226_v61  ;;  %2701 = vmatprep.subr.mxu1 %v2700_v42  ;;  %v2747_v26 = vsub.f32 %v7135_v29, %v8227_v39  ;;  %v2753_v16 = vsub.f32 %v7141_v46, %v8228_v17  ;;  %2531 = vmatpush1.msra.mxu0 %v7123_v23  ;;  %v2736_v42 = vand.u32 4294901760, %v2735_v43  ;;  %v8231_v17 = vld [vmem:[#allocation23_spill] sm:$0xff]  ;;  %v8232_v23 = vld [vmem:[#allocation26_spill] sm:$0xff] }
 0x1ba   : > { %2707 = vmatpush1.msra.mxu1 %v2706_v57  ;;  %v8229_v61 = vand.u32 4294901760, %v7155_v6  ;;  %2564 = vmatprep.mubr.f32.mxu0 %v7741_v44  ;;  %v2765_v57 = vsub.f32 %v7161_v22, %v7743_v52  ;;  %v8234_v44 = vld [vmem:[#allocation10_spill] sm:$0xff]  ;;  %v8248_v52 = vld [vmem:[#allocation19_spill] sm:$0xff] }
 0x1bb   : > { %2713 = vmatprep.subr.mxu1 %v2712_v58  ;;  %v2742_v39 = vand.u32 4294901760, %v2741_v51  ;;  %2570 = vmatmul.mubr.f32.vlgmr.msra.gmra.mxu0 %v2569_v21  ;;  %v2748_v24 = vand.u32 4294901760, %v2747_v26  ;;  %v8230_v58 = vld [vmem:[#allocation6_spill] sm:$0xff]  ;;  %v2754_v43 = vand.u32 4294901760, %v2753_v16  ;;  %v8233_v51 = vld [vmem:[#allocation5_spill] sm:$0xff]  ;;  %v8235_v21 = vld [vmem:[#allocation7_spill] sm:$0xff] }
 0x1bc   : > { %v2759_v41 = vsub.f32 %v7155_v6, %v8229_v61  ;;  %2719 = vmatpush1.msra.mxu1 %v2718_v35  ;;  %2810 = vmatprep.subr.mxu0 %v8230_v58  ;;  %v2766_v35 = vand.u32 4294901760, %v2765_v57  ;;  %v8237_v16 = vmov 0.0   ;;  %v8238_v26 = vld [vmem:[#allocation8_spill] sm:$0xff]  ;;  %v8243_v57 = vld [vmem:[#allocation9_spill] sm:$0xff] }
 0x1bd   : > { %2725 = vmatprep.subr.mxu1 %v2724_v30  ;;  %2813 = vmatpush1.msra.mxu0 %v8231_v17  ;;  %v8236_v30 = vld [vmem:[#allocation11_spill] sm:$0xff] }
 0x1be   : > { %2731 = vmatpush1.msra.mxu1 %v2730_v19  ;;  %v2760_v61 = vand.u32 4294901760, %v2759_v41  ;;  %2816 = vmatprep.subr.mxu0 %v8232_v23  ;;  %v8239_v19 = vld [vmem:[#allocation20_spill] sm:$0xff]  ;;  %v8241_v41 = vld [vmem:[#allocation81_spill] sm:$0xff] }
 0x1bf   : > { %2737 = vmatprep.subr.mxu1 %v2736_v42  ;;  %2819 = vmatpush1.msra.mxu0 %v8233_v51  ;;  %v8240_v42 = vld [vmem:[#allocation33_spill] sm:$0xff] }
 0x1c0   : > { %2743 = vmatpush1.msra.mxu1 %v2742_v39  ;;  %2822 = vmatprep.subr.mxu0 %v8234_v44  ;;  %v8242_v39 = vld [vmem:[#allocation14_spill] sm:$0xff] }
 0x1c1   : > { %2749 = vmatprep.subr.mxu1 %v2748_v24  ;;  %2825 = vmatpush1.msra.mxu0 %v8235_v21  ;;  %v8244_v24 = vld [vmem:[#allocation17_spill] sm:$0xff] }
 0x1c2   : > { %2755 = vmatpush1.msra.mxu1 %v2754_v43  ;;  %2828 = vmatprep.subr.mxu0 %v8236_v30  ;;  %v8245_v43 = vld [vmem:[#allocation13_spill] sm:$0xff] }
 0x1c3   : > { %2761 = vmatprep.subr.mxu1 %v2760_v61  ;;  %2800 = vmatprep.mubr.f32.mxu1 %v8237_v16  ;;  %v8246_v61 = vld [vmem:[#allocation18_spill] sm:$0xff] }
 0x1c4   : > { %2767 = vmatpush1.msra.mxu1 %v2766_v35  ;;  %2831 = vmatpush1.msra.mxu0 %v8238_v26  ;;  %v8247_v35 = vld [vmem:[#allocation39_spill] sm:$0xff] }
 0x1c5   : > { %2802 = vmatmul.mubr.f32.vlgmr.msra.gmra.mxu1 %v8239_v19  ;;  %2834 = vmatprep.subr.mxu0 %v8240_v42  ;;  %v8249_v19 = vld [vmem:[#allocation49_spill] sm:$0xff] }
 0x1c6   : > { %2946 = vmatprep.subr.mxu1 %v5902_v11  ;;  %2837 = vmatpush1.msra.mxu0 %v8241_v41 }
 0x1c7   : > { %2948 = vmatpush1.msra.mxu1 %v5835_v56  ;;  %2840 = vmatprep.subr.mxu0 %v8242_v39 }
 0x1c8   : > { %2950 = vmatprep.subr.mxu1 %v6030_v50  ;;  %2843 = vmatpush1.msra.mxu0 %v8243_v57 }
 0x1c9   : > { %2952 = vmatpush1.msra.mxu1 %v5872_v49  ;;  %2846 = vmatprep.subr.mxu0 %v8244_v24 }
 0x1ca   : > { %2954 = vmatprep.subr.mxu1 %v6100_v3  ;;  %2849 = vmatpush1.msra.mxu0 %v8245_v43 }
 0x1cb   : > { %2956 = vmatpush1.msra.mxu1 %v5942_v9  ;;  %2852 = vmatprep.subr.mxu0 %v8246_v61 }
 0x1cc   : > { %2958 = vmatprep.subr.mxu1 %v6128_v15  ;;  %2855 = vmatpush1.msra.mxu0 %v8247_v35 }
 0x1cd   : > { %2960 = vmatpush1.msra.mxu1 %v6051_v33  ;;  %2858 = vmatprep.subr.mxu0 %v8248_v52 }
 0x1ce   : > { %2962 = vmatprep.subr.mxu1 %v6142_v5  ;;  %2861 = vmatpush1.msra.mxu0 %v6566_v32 }
 0x1cf   : > { %2964 = vmatpush1.msra.mxu1 %v6170_v14  ;;  %2864 = vmatprep.subr.mxu0 %v6906_v20 }
 0x1d0   : > { %2966 = vmatprep.subr.mxu1 %v6242_v54  ;;  %2867 = vmatpush1.msra.mxu0 %v6699_v28 }
 0x1d1   : > { %2968 = vmatpush1.msra.mxu1 %v8190_v60  ;;  %2870 = vmatprep.subr.mxu0 %v7008_v55 }
 0x1d2   : > { %2970 = vmatprep.subr.mxu1 %v6376_v62  ;;  %2873 = vmatpush1.msra.mxu0 %v6793_v37 }
 0x1d3   : > { %2972 = vmatpush1.msra.mxu1 %v6389_v38  ;;  %2876 = vmatprep.subr.mxu0 %v7061_v27 }
 0x1d4   : > { %2974 = vmatprep.subr.mxu1 %v6455_v2  ;;  %2879 = vmatpush1.msra.mxu0 %v6835_v48 }
 0x1d5   : > { %2976 = vmatpush1.msra.mxu1 %v8199_v45  ;;  %2882 = vmatprep.subr.mxu0 %v7088_v25 }
 0x1d6   : > { %2978 = vmatprep.subr.mxu1 %v6526_v12  ;;  %2885 = vmatpush1.msra.mxu0 %v7096_v13 }
 0x1d7   : > { %2980 = vmatpush1.msra.mxu1 %v8205_v7  ;;  %2888 = vmatprep.subr.mxu0 %v7112_v18 }
 0x1d8   : > { %2982 = vmatprep.subr.mxu1 %v6645_v47  ;;  %2891 = vmatpush1.msra.mxu0 %v7118_v34 }
 0x1d9   : > { %2984 = vmatpush1.msra.mxu1 %v8209_v36  ;;  %2894 = vmatprep.subr.mxu0 %v7135_v29 }
 0x1da   : > { %2986 = vmatprep.subr.mxu1 %v6860_v10  ;;  %2897 = vmatpush1.msra.mxu0 %v7141_v46  ;;  %v8250_v10 = vand.u32 4294901760, %v8230_v58  ;;  %v8255_v58 = vand.u32 4294901760, %v8234_v44  ;;  %v8261_v44 = vand.u32 4294901760, %v8240_v42 }
 0x1db   : > { %2988 = vmatpush1.msra.mxu1 %v8214_v1  ;;  %2900 = vmatprep.subr.mxu0 %v7155_v6  ;;  %v8251_v1 = vand.u32 4294901760, %v8231_v17  ;;  %v8262_v17 = vand.u32 4294901760, %v8241_v41 }
 0x1dc   : > { %2990 = vmatprep.subr.mxu1 %v8249_v19  ;;  %2903 = vmatpush1.msra.mxu0 %v7161_v22  ;;  %v8252_v22 = vand.u32 4294901760, %v8232_v23  ;;  %v8253_v19 = vld [vmem:[#allocation22_spill] sm:$0xff]  ;;  %v8257_v23 = vand.u32 4294901760, %v8236_v30 }
 0x1dd   : > { %2936 = vmatprep.mubr.f32.mxu0 %v8237_v16  ;;  %2992 = vmatpush1.msra.mxu1 %v6780_v4  ;;  %v8254_v4 = vand.u32 4294901760, %v8233_v51  ;;  %v8263_v51 = vand.u32 4294901760, %v8242_v39 }
 0x1de   : > { %2939 = vmatmul.mubr.f32.vlgmr.msra.gmra.mxu0 %v8215_v40  ;;  %2994 = vmatprep.subr.mxu1 %v7020_v59 }
 0x1df   : > { %3054 = vmatprep.subr.mxu0 %v8250_v10  ;;  %2996 = vmatpush1.msra.mxu1 %v7036_v8  ;;  %v8256_v10 = vand.u32 4294901760, %v8235_v21  ;;  %v8264_v21 = vand.u32 4294901760, %v8243_v57 }
 0x1e0   : > { %3058 = vmatpush1.msra.mxu0 %v8251_v1  ;;  %2998 = vmatprep.subr.mxu1 %v7052_v31  ;;  %v8258_v1 = vld [vmem:[#allocation52_spill] sm:$0xff] }
 0x1e1   : > { %3062 = vmatprep.subr.mxu0 %v8252_v22  ;;  %3000 = vmatpush1.msra.mxu1 %v8253_v19  ;;  %v8260_v22 = vand.u32 4294901760, %v8215_v40  ;;  %v8265_v40 = vand.u32 4294901760, %v8244_v24 }
 0x1e2   : > { %3066 = vmatpush1.msra.mxu0 %v8254_v4  ;;  %3002 = vmatprep.subr.mxu1 %v7079_v63  ;;  %v8259_v4 = vand.u32 4294901760, %v8238_v26 }
 0x1e3   : > { %3070 = vmatprep.subr.mxu0 %v8255_v58  ;;  %3004 = vmatpush1.msra.mxu1 %v7098_v0 }
 0x1e4   : > { %3074 = vmatpush1.msra.mxu0 %v8256_v10  ;;  %3006 = vmatprep.subr.mxu1 %v7107_v53 }
 0x1e5   : > { %3078 = vmatprep.subr.mxu0 %v8257_v23  ;;  %3008 = vmatpush1.msra.mxu1 %v8258_v1 }
 0x1e6   : > { %3041 = vmatprep.mubr.f32.mxu1 %v8237_v16  ;;  %3082 = vmatpush1.msra.mxu0 %v8259_v4 }
 0x1e7   : > { %3045 = vmatmul.mubr.f32.vlgmr.msra.gmra.mxu1 %v8260_v22  ;;  %3086 = vmatprep.subr.mxu0 %v8261_v44 }
 0x1e8   : > { %3220 = vmatprep.subr.mxu1 %v5902_v11  ;;  %3090 = vmatpush1.msra.mxu0 %v8262_v17  ;;  %v8266_v11 = vand.u32 4294901760, %v8245_v43 }
 0x1e9   : > { %3222 = vmatpush1.msra.mxu1 %v5835_v56  ;;  %3094 = vmatprep.subr.mxu0 %v8263_v51  ;;  %v8267_v56 = vand.u32 4294901760, %v8246_v61 }
 0x1ea   : > { %3224 = vmatprep.subr.mxu1 %v6030_v50  ;;  %3098 = vmatpush1.msra.mxu0 %v8264_v21  ;;  %v8268_v50 = vand.u32 4294901760, %v8247_v35 }
 0x1eb   : > { %3226 = vmatpush1.msra.mxu1 %v5872_v49  ;;  %3102 = vmatprep.subr.mxu0 %v8265_v40  ;;  %v8269_v49 = vand.u32 4294901760, %v8248_v52 }
 0x1ec   : > { %3228 = vmatprep.subr.mxu1 %v6100_v3  ;;  %3106 = vmatpush1.msra.mxu0 %v8266_v11  ;;  %v8270_v3 = vand.u32 4294901760, %v6566_v32  ;;  %v8277_v32 = vand.u32 4294901760, %v7088_v25 }
 0x1ed   : > { %3230 = vmatpush1.msra.mxu1 %v5942_v9  ;;  %3110 = vmatprep.subr.mxu0 %v8267_v56  ;;  %v8271_v9 = vand.u32 4294901760, %v6906_v20  ;;  %v8285_v20 = vand.u32 4294901760, %v7155_v6 }
 0x1ee   : > { %3232 = vmatprep.subr.mxu1 %v6128_v15  ;;  %3114 = vmatpush1.msra.mxu0 %v8268_v50  ;;  %v8272_v15 = vand.u32 4294901760, %v6699_v28  ;;  %v8281_v28 = vand.u32 4294901760, %v7135_v29  ;;  %v8290_v29 = vld [vmem:[#allocation20_spill] sm:$0xff] }
 0x1ef   : > { %3234 = vmatpush1.msra.mxu1 %v6051_v33  ;;  %3118 = vmatprep.subr.mxu0 %v8269_v49  ;;  %v8273_v33 = vand.u32 4294901760, %v7008_v55  ;;  %v8289_v55 = vld [vmem:[#allocation47_spill] sm:$0xff] }
 0x1f0   : > { %3236 = vmatprep.subr.mxu1 %v6142_v5  ;;  %3122 = vmatpush1.msra.mxu0 %v8270_v3  ;;  %v8274_v5 = vand.u32 4294901760, %v6793_v37  ;;  %v8282_v37 = vld [vmem:[#allocation21_spill] sm:$0xff] }
 0x1f1   : > { %3238 = vmatpush1.msra.mxu1 %v6170_v14  ;;  %3126 = vmatprep.subr.mxu0 %v8271_v9  ;;  %v8275_v14 = vand.u32 4294901760, %v7061_v27  ;;  %v1717_v27 = vpop.f32.mrf.mxu1 }
 0x1f2   : > { %3240 = vmatprep.subr.mxu1 %v6242_v54  ;;  %3130 = vmatpush1.msra.mxu0 %v8272_v15  ;;  %v8276_v54 = vand.u32 4294901760, %v6835_v48  ;;  %v8284_v48 = vld [vmem:[#allocation45_spill] sm:$0xff] }
 0x1f3   : > { %3242 = vmatpush1.msra.mxu1 %v8190_v60  ;;  %3134 = vmatprep.subr.mxu0 %v8273_v33  ;;  %v8286_v60 = vld [vmem:[#allocation49_spill] sm:$0xff] }
 0x1f4   : > { %3244 = vmatprep.subr.mxu1 %v6376_v62  ;;  %3138 = vmatpush1.msra.mxu0 %v8274_v5  ;;  %v8278_v62 = vand.u32 4294901760, %v7096_v13 }
 0x1f5   : > { %3246 = vmatpush1.msra.mxu1 %v6389_v38  ;;  %3142 = vmatprep.subr.mxu0 %v8275_v14  ;;  %v8279_v38 = vand.u32 4294901760, %v7112_v18 }
 0x1f6   : > { %3248 = vmatprep.subr.mxu1 %v6455_v2  ;;  %3146 = vmatpush1.msra.mxu0 %v8276_v54  ;;  %v8280_v2 = vand.u32 4294901760, %v7118_v34 }
 0x1f7   : > { %3250 = vmatpush1.msra.mxu1 %v8199_v45  ;;  %3150 = vmatprep.subr.mxu0 %v8277_v32  ;;  %v1324_v45 = vpop.f32.mrf.mxu0 }
 0x1f8   : > { %3252 = vmatprep.subr.mxu1 %v6526_v12  ;;  %3154 = vmatpush1.msra.mxu0 %v8278_v62  ;;  %v8283_v12 = vand.u32 4294901760, %v7141_v46  ;;  %v1718_v6 = vadd.f32 %v1717_v27, %v1324_v45 }
 0x1f9   : > { %3254 = vmatpush1.msra.mxu1 %v8205_v7  ;;  %3158 = vmatprep.subr.mxu0 %v8279_v38  ;;  %v1719_v7 = vpop.f32.mrf.mxu1 }
 0x1fa   : > { %3256 = vmatprep.subr.mxu1 %v6645_v47  ;;  %3162 = vmatpush1.msra.mxu0 %v8280_v2  ;;  %v8287_v47 = vld [vmem:[#allocation24_spill] sm:$0xff] }
 0x1fb   : > { %3258 = vmatpush1.msra.mxu1 %v8209_v36  ;;  %3166 = vmatprep.subr.mxu0 %v8281_v28  ;;  %v8288_v25 = vand.u32 4294901760, %v8287_v47 }
 0x1fc   : > { %3260 = vmatprep.subr.mxu1 %v8282_v37  ;;  %3170 = vmatpush1.msra.mxu0 %v8283_v12 }
 0x1fd   : > { %3262 = vmatpush1.msra.mxu1 %v8284_v48  ;;  %3174 = vmatprep.subr.mxu0 %v8285_v20 }
 0x1fe   : > { %3264 = vmatprep.subr.mxu1 %v8286_v60  ;;  %3178 = vmatpush1.msra.mxu0 %v8288_v25 }
 0x1ff   : > { %3211 = vmatprep.mubr.f32.mxu0 %v8237_v16  ;;  %3266 = vmatpush1.msra.mxu1 %v8289_v55 }
 0x200   : > { %3213 = vmatmul.mubr.f32.vlgmr.msra.gmra.mxu0 %v8290_v29  ;;  %3268 = vmatprep.subr.mxu1 %v7020_v59  ;;  %v1326_v59 = vpop.f32.mrf.mxu0 }
 0x201   : > { %3270 = vmatpush1.msra.mxu1 %v7036_v8  ;;  %3315 = vmatprep.mubr.f32.mxu1 %v8237_v16 }
 0x202   : > { %3272 = vmatprep.subr.mxu1 %v7052_v31 }
 0x203   : > { %3274 = vmatpush1.msra.mxu1 %v8253_v19  ;;  %v1920_v8 = vpop.f32.mrf.mxu0 }
 0x204   : > { %3276 = vmatprep.subr.mxu1 %v7079_v63 }
 0x205   : > { %3278 = vmatpush1.msra.mxu1 %v7098_v0  ;;  %v1922_v13 = vpop.f32.mrf.mxu0  ;;  %v1720_v0 = vadd.f32 %v1719_v7, %v1326_v59 }
 0x206   : > { %3280 = vmatprep.subr.mxu1 %v7107_v53  ;;  %v1921_v53 = vadd.f32 %v1920_v8, %v1718_v6 }
 0x207   : > { %3282 = vmatpush1.msra.mxu1 %v8258_v1  ;;  %v1923_v30 = vadd.f32 %v1922_v13, %v1720_v0 }
 0x208   : > { %3317 = vmatmul.mubr.f32.vlgmr.msra.gmra.mxu1 %v8290_v29 }
 0x20d   : > { %v2061_v36 = vpop.f32.mrf.mxu1 }
 0x20e   : > { %v2062_v19 = vadd.f32 %v2061_v36, %v1921_v53 }
 0x20f   : > { %v2063_v18 = vpop.f32.mrf.mxu1 }
 0x210   : > { %v2064_v42 = vadd.f32 %v2063_v18, %v1923_v30 }
 0x25a   : > { %v2326_v31 = vpop.f32.mrf.mxu0 }
 0x25b   : > { %v2327_v39 = vadd.f32 %v2326_v31, %v2062_v19 }
 0x25c   : > { %v2328_v34 = vpop.f32.mrf.mxu0 }
 0x25d   : > { %v2329_v57 = vadd.f32 %v2328_v34, %v2064_v42 }
 0x263   : > { %v2463_v46 = vpop.f32.mrf.mxu1 }
 0x264   : > { %v2464_v43 = vadd.f32 %v2463_v46, %v2327_v39 }
 0x265   : > { %v2465_v52 = vpop.f32.mrf.mxu1 }
 0x266   : > { %v2466_v61 = vadd.f32 %v2465_v52, %v2329_v57 }
 0x27b   : > { %v2571_v63 = vpop.f32.mrf.mxu0 }
 0x27c   : > { %v2572_v10 = vadd.f32 %v2571_v63, %v2464_v43 }
 0x27d   : > { %v2573_v16 = vpop.f32.mrf.mxu0 }
 0x27e   : > { %v2574_v23 = vadd.f32 %v2573_v16, %v2466_v61 }
 0x285   : > { %v2803_v26 = vpop.f32.mrf.mxu1 }
 0x286   : > { %v2804_v4 = vadd.f32 %v2803_v26, %v2572_v10 }
 0x287   : > { %v2805_v24 = vpop.f32.mrf.mxu1 }
 0x288   : > { %v2806_v22 = vadd.f32 %v2805_v24, %v2574_v23 }
 0x29e   : > { %v2940_v41 = vpop.f32.mrf.mxu0 }
 0x29f   : > { %v2941_v17 = vadd.f32 %v2940_v41, %v2804_v4 }
 0x2a0   : > { %v2942_v35 = vpop.f32.mrf.mxu0 }
 0x2a1   : > { %v2943_v51 = vadd.f32 %v2942_v35, %v2806_v22 }
 0x2a7   : > { %v3046_v58 = vpop.f32.mrf.mxu1 }
 0x2a8   : > { %v3047_v40 = vadd.f32 %v3046_v58, %v2941_v17 }
 0x2a9   : > { %v3048_v44 = vpop.f32.mrf.mxu1 }
 0x2aa   : > { %v3049_v11 = vadd.f32 %v3048_v44, %v2943_v51 }
 0x2c0   : > { %v3214_v1 = vpop.f32.mrf.mxu0 }
 0x2c1   : > { %v3215_v50 = vadd.f32 %v3214_v1, %v3047_v40 }
 0x2c2   : > { %v3216_v21 = vpop.f32.mrf.mxu0 }
 0x2c3   : > { %v3217_v49 = vadd.f32 %v3216_v21, %v3049_v11 }
 0x2c8   : > { %v3318_v56 = vpop.f32.mrf.mxu1 }
 0x2c9   : > { %v3319_v9 = vadd.f32 %v3318_v56, %v3215_v50 }
 0x2ca   : > { %v3320_v3 = vpop.f32.mrf.mxu1 }
 0x2cb   : > { %v3321_v15 = vadd.f32 %v3320_v3, %v3217_v49 }
 0x2cd   : > { %v3326_v33 = vcombine.low %v3319_v9, %v3321_v15 }
 0x2cf   : > { %3329 = vst [vmem:[%s224_s24] sm:$0xff] %v3326_v33 }
 0x2d0 PF: > { %s12_s11 = sadd.s32 1, %s3505_s11   ;;  %s8291_s9 = smov %s3501_s10 }
 0x2d1   : > { %p9_p5 = scmp.ge.s32.totalorder %s12_s11, 4   ;;  %s8292_s10 = smov %s8294_s12 }
 0x2d3   :  { %11 = sbr.rel (!%p9_p5) target bundleno = 2 (0x2), region = 66 }

</bundles_post_ra>
